<compile_context>
chip_gen: v5e
topology: v5e:2x2
jax: 0.10.0
libtpu: 0.0.40
codegen_flags: <defaults>
</compile_context>

<pallas_src>
import functools

import jax
import jax.numpy as jnp
from jax import lax
from jax.experimental import pallas as pl
from jax.experimental.pallas import tpu as pltpu

EPS = 1e-5  # nn.InstanceNorm3d default


def _cdiv(a, b):
    return -(-a // b)


def _vmem_capacity_bytes():
    """Physical VMEM of the current TPU generation (fallback: v7x-safe 64 MiB)."""
    try:
        cap = getattr(pltpu.get_tpu_info(), "vmem_capacity_bytes", None)
        if cap:
            return int(cap)
    except Exception:
        pass
    return 64 * 1024 * 1024


def _vmem_bytes_estimate(c_in, c_out, tp, th):
    bf, f4 = 2, 4
    per_step = (8 * c_in * tp * bf          # main input window (bf16)
                + 8 * c_in * th * bf        # halo window (bf16)
                + 64 * c_out * c_in * bf    # folded weights (constant index map)
                + tp * f4                   # validity mask
                + c_out * tp * bf           # bf16 y output tile
                + c_out * 2 * f4)           # stats tile
    scratch = 8 * c_in * tp * bf + c_out * tp * f4   # staging + f32 accumulator
    temps = 8 * c_in * tp * bf + c_out * tp * f4     # transient relayout copies
    return 2 * per_step + scratch + temps            # x2: double-buffered pipeline


def _pick_tile_p(c_in, c_out, th, budget_bytes):
    tp = th
    cand = th
    while cand <= 8192:
        if _vmem_bytes_estimate(c_in, c_out, cand, th) <= budget_bytes:
            tp = cand
        cand += th
    return tp


def _conv_stats_kernel(xm_ref, xh_ref, w_ref, mask_ref, y_ref, st_ref,
                       stage_ref, acc_ref, *, offsets, tp, c_in):
    """One (n, p_tile): stride-2 Conv3d as 8 parity matmuls (K = 8*C_in) + IN stats.

    xm_ref:    (1, 8, C_in, TP)    bf16  main window of the 8 parity slabs
    xh_ref:    (1, 8, C_in, TH)    bf16  halo window (prefix of the next tile)
    w_ref:     (8, C_out, 8*C_in)  bf16  folded weights [parity, C_out, tap*C_in]
    mask_ref:  (1, TP)             f32   1.0 on valid output positions
    y_ref:     (1, C_out, TP)      bf16  un-normalized conv output (lane-dense)
    st_ref:    (1, 1, C_out, 2)    f32   per-tile [sum, sum_sq] over valid positions
    stage_ref: (8*C_in, TP)        bf16  VMEM scratch: 8 shifted tap views per parity
    acc_ref:   (C_out, TP)         f32   VMEM accumulator
    """
    acc_ref[...] = jnp.zeros_like(acc_ref)
    for r in range(8):                                   # parity (rd, rh, rw)
        xr = jnp.concatenate([xm_ref[0, r], xh_ref[0, r]], axis=-1)  # (C_in, TP+TH)
        for q, off in enumerate(offsets):                # tap (qd, qh, qw): static shift
            stage_ref[q * c_in:(q + 1) * c_in, :] = xr[:, off:off + tp]
        acc_ref[...] += jnp.dot(w_ref[r], stage_ref[...],
                                preferred_element_type=jnp.float32)

    acc = acc_ref[...]
    y_ref[0] = acc.astype(y_ref.dtype)

    am = acc * mask_ref[...]                             # masked, f32
    st_ref[0, 0] = jnp.concatenate(
        [jnp.sum(am, axis=-1, keepdims=True),
         jnp.sum(am * acc, axis=-1, keepdims=True)], axis=-1)


def _norm_act_kernel(y_ref, st_ref, o_ref, *, inv_count, neg_slope):
    """InstanceNorm from per-tile partial sums + ReLU/LeakyReLU, streaming over P."""
    s = jnp.sum(st_ref[0], axis=0)                       # (C_out, 2): reduce n_pt partials
    mean = s[:, 0:1] * inv_count
    var = jnp.maximum(s[:, 1:2] * inv_count - mean * mean, 0.0)
    scale = lax.rsqrt(var + EPS)
    yn = (y_ref[0].astype(jnp.float32) - mean) * scale
    o_ref[0] = jnp.where(yn > 0, yn, neg_slope * yn)


@functools.partial(jax.jit, static_argnames=("act", "use_dropout", "training",
                                             "tile_p", "vmem_budget_bytes"))
def block_down_forward(x, weight, *, act="leaky", use_dropout=False, training=False,
                       tile_p=None, vmem_budget_bytes=None):
    """Block(down=True) forward. x: (N, C_in, D, H, W) f32; weight: (C_out, C_in, 4, 4, 4)."""
    N, C_in, D, H, W = x.shape
    C_out = weight.shape[0]
    assert weight.shape == (C_out, C_in, 4, 4, 4), weight.shape
    assert min(D, H, W) >= 2, "reflect padding with pad=1 requires spatial dims >= 2"
    # TODO(synk): odd spatial dims not supported by the parity decomposition below
    # (SPGAN uses power-of-two volumes).
    assert D % 2 == 0 and H % 2 == 0 and W % 2 == 0, "spatial dims must be even"
    if use_dropout and training:
        # TODO(synk): training-mode Dropout(0.5) not implemented; eval-mode is identity.
        raise NotImplementedError("training-mode Dropout(0.5) is not implemented")

    # Reflect padding (pad=1) == PyTorch padding_mode='reflect'.
    xp = jnp.pad(x, ((0, 0), (0, 0), (1, 1), (1, 1), (1, 1)), mode="reflect")

    Dm, Hm, Wm = D // 2 + 1, H // 2 + 1, W // 2 + 1       # parity-grid extents
    Do, Ho, Wo = D // 2, H // 2, W // 2                   # conv output extents
    Pm = Dm * Hm * Wm                                     # padded flat spatial size
    P = Do * Ho * Wo                                      # valid flat spatial size

    # Space-to-depth parity split (no im2col blow-up; same bytes as the input):
    # xs[n, r, c, flat(d,h,w)] = xp[n, c, 2d+rd, 2h+rh, 2w+rw],  r = rd*4 + rh*2 + rw.
    xs = xp.reshape(N, C_in, Dm, 2, Hm, 2, Wm, 2)
    xs = xs.transpose(0, 3, 5, 7, 1, 2, 4, 6).reshape(N, 8, C_in, Pm)
    xs = xs.astype(jnp.bfloat16)

    # Flat-index shift for tap q = (qd, qh, qw) inside a parity slab.
    offsets = tuple(qd * Hm * Wm + qh * Wm + qw
                    for qd in (0, 1) for qh in (0, 1) for qw in (0, 1))
    halo = max(offsets)
    TH = _cdiv(halo + 1, 128) * 128               # halo window (strictly > halo), lane-aligned

    vmem_cap = _vmem_capacity_bytes()             # 64 MiB on v7x, 128 MiB on v5e/v6e
    if vmem_budget_bytes is None:
        vmem_budget_bytes = int(0.45 * vmem_cap)
    if tile_p is None:
        TP = _pick_tile_p(C_in, C_out, TH, vmem_budget_bytes)
    else:
        TP = _cdiv(max(tile_p, TH), TH) * TH      # multiple of TH (and of 128)
    TP = min(TP, _cdiv(Pm, TH) * TH)              # don't exceed the problem size
    n_pt = _cdiv(Pm, TP)
    if N * n_pt < 2 and TP > TH:                  # keep both v7x TensorCores busy at batch 1
        TP = max(TH, (TP // (2 * TH)) * TH)
        n_pt = _cdiv(Pm, TP)
    ratio = TP // TH
    Pm_out = n_pt * TP
    Pm_alloc = (n_pt + 1) * TP                    # zero pad so halo reads stay in-bounds
    xs = jnp.pad(xs, ((0, 0), (0, 0), (0, 0), (0, Pm_alloc - Pm)))

    # Epilogue tile: large, lane-dense, decoupled from TP (exact divisor of Pm_out).
    n_p2 = max(1, _cdiv(Pm_out, 4096))
    while Pm_out % n_p2 != 0 or (Pm_out // n_p2) % 128 != 0:
        n_p2 += 1
    TP2 = Pm_out // n_p2

    # Validity mask (parity-grid garbage rows are excluded from the IN statistics).
    pidx = jnp.arange(Pm_out)
    mask = ((pidx < Pm)
            & (pidx // (Hm * Wm) < Do)
            & ((pidx // Wm) % Hm < Ho)
            & (pidx % Wm < Wo)).astype(jnp.float32)[None, :]          # (1, Pm_out)

    # Weight folding: kd = 2*qd + rd etc. -> (8 parities, C_out, 8 taps * C_in) bf16,
    # matching the stage layout stage[q*C_in + ci, p] = x_parity[ci, p + offsets[q]].
    wf = weight.reshape(C_out, C_in, 2, 2, 2, 2, 2, 2)   # (co, ci, qd, rd, qh, rh, qw, rw)
    wf = wf.transpose(3, 5, 7, 0, 2, 4, 6, 1).reshape(8, C_out, 8 * C_in)
    wf = wf.astype(jnp.bfloat16)

    est = _vmem_bytes_estimate(C_in, C_out, TP, TH)
    vmem_limit = int(min(int(0.75 * vmem_cap), max(32 * 1024 * 1024, int(1.3 * est))))
    vmem_limit = max(vmem_limit, int(1.2 * est))

    kernel1 = functools.partial(_conv_stats_kernel, offsets=offsets, tp=TP, c_in=C_in)
    y_raw, stats_part = pl.pallas_call(
        kernel1,
        out_shape=(
            jax.ShapeDtypeStruct((N, C_out, Pm_out), jnp.bfloat16),
            jax.ShapeDtypeStruct((N, n_pt, C_out, 2), jnp.float32),
        ),
        grid_spec=pltpu.PrefetchScalarGridSpec(
            num_scalar_prefetch=0,
            grid=(N, n_pt),
            in_specs=[
                pl.BlockSpec((1, 8, C_in, TP), lambda n, p: (n, 0, 0, p)),
                pl.BlockSpec((1, 8, C_in, TH), lambda n, p: (n, 0, 0, (p + 1) * ratio)),
                # TODO(synk): weights keep the default double-buffering even though the
                # index map is constant; single-buffering them would free VMEM for a
                # larger TP on the deep (256+ channel) SPGAN blocks (v7x).
                pl.BlockSpec((8, C_out, 8 * C_in), lambda n, p: (0, 0, 0)),
                pl.BlockSpec((1, TP), lambda n, p: (0, p)),
            ],
            out_specs=[
                pl.BlockSpec((1, C_out, TP), lambda n, p: (n, 0, p)),
                pl.BlockSpec((1, 1, C_out, 2), lambda n, p: (n, p, 0, 0)),
            ],
            scratch_shapes=[
                pltpu.VMEM((8 * C_in, TP), jnp.bfloat16),
                pltpu.VMEM((C_out, TP), jnp.float32),
            ],
        ),
        compiler_params=pltpu.CompilerParams(
            dimension_semantics=("parallel", "parallel"),
            vmem_limit_bytes=vmem_limit,
        ),
    )(xs, xs, wf, mask)

    neg_slope = 0.0 if act == "relu" else 0.2
    kernel2 = functools.partial(_norm_act_kernel, inv_count=1.0 / P, neg_slope=neg_slope)
    out = pl.pallas_call(
        kernel2,
        out_shape=jax.ShapeDtypeStruct((N, C_out, Pm_out), jnp.float32),
        grid_spec=pltpu.PrefetchScalarGridSpec(
            num_scalar_prefetch=0,
            grid=(N, n_p2),
            in_specs=[
                pl.BlockSpec((1, C_out, TP2), lambda n, p: (n, 0, p)),
                pl.BlockSpec((1, n_pt, C_out, 2), lambda n, p: (n, 0, 0, 0)),
            ],
            out_specs=pl.BlockSpec((1, C_out, TP2), lambda n, p: (n, 0, p)),
        ),
        compiler_params=pltpu.CompilerParams(
            dimension_semantics=("parallel", "parallel"),
            vmem_limit_bytes=vmem_limit,
        ),
    )(y_raw, stats_part)

    # Drop parity-grid garbage rows and restore NCDHW.
    # TODO(synk): this compaction is one extra XLA pass over the output; downstream
    # SPGAN blocks could consume the parity-grid (N, C_out, Pm) layout directly.
    y = out[:, :, :Pm].reshape(N, C_out, Dm, Hm, Wm)[:, :, :Do, :Ho, :Wo]

    # TODO(synk): the down=False (Upsample + Conv3d k=3) path and the SPADE /
    # bottleneck / in_tr / out_tr submodules of SPADEGenerator are outside the
    # scope of this kernel.
    return y


def _reference(x, weight, act):
    """Plain-JAX reference (same bf16 matmul precision) for a sanity check."""
    xp = jnp.pad(x, ((0, 0), (0, 0), (1, 1), (1, 1), (1, 1)), mode="reflect")
    y = lax.conv_general_dilated(
        xp.astype(jnp.bfloat16), weight.astype(jnp.bfloat16),
        window_strides=(2, 2, 2), padding="VALID",
        dimension_numbers=("NCDHW", "OIDHW", "NCDHW"),
        preferred_element_type=jnp.float32)
    mean = jnp.mean(y, axis=(2, 3, 4), keepdims=True)
    var = jnp.mean((y - mean) ** 2, axis=(2, 3, 4), keepdims=True)
    yn = (y - mean) * lax.rsqrt(var + EPS)
    slope = 0.0 if act == "relu" else 0.2
    return jnp.where(yn > 0, yn, slope * yn)


if __name__ == "__main__":
    key = jax.random.PRNGKey(0)
    kx, kw = jax.random.split(key)

    # Matches SPADEGenerator.initial_down-style shapes (features=16 -> 32).
    N, C_in, C_out, D = 2, 16, 32, 16
    x = jax.random.normal(kx, (N, C_in, D, D, D), dtype=jnp.float32)
    weight = jax.random.normal(kw, (C_out, C_in, 4, 4, 4), dtype=jnp.float32) * 0.05

    # First run forces the multi-tile (halo-crossing) path; second uses the auto tile.
    for act, tp in (("leaky", 256), ("relu", None)):
        y = block_down_forward(x, weight, act=act, use_dropout=False, tile_p=tp)
        y = jax.block_until_ready(y)
        y_ref = _reference(x, weight, act)
        assert y.shape == (N, C_out, D // 2, D // 2, D // 2), y.shape
        err = float(jnp.max(jnp.abs(y - y_ref)))
        assert jnp.allclose(y, y_ref, atol=3e-2, rtol=3e-2), err

    print("KERNEL_OK")
</pallas_src>

<mosaic_0001>
module attributes {stable_mosaic.version = 11 : i64} {
  func.func @_conv_stats_kernel(%arg0: i32, %arg1: i32, %arg2: memref<1x8x16x256xbf16, #tpu.memory_space<vmem>>, %arg3: memref<1x8x16x128xbf16, #tpu.memory_space<vmem>>, %arg4: memref<8x32x128xbf16, #tpu.memory_space<vmem>>, %arg5: memref<1x256xf32, #tpu.memory_space<vmem>>, %arg6: memref<1x32x256xbf16, #tpu.memory_space<vmem>>, %arg7: memref<1x1x32x2xf32, #tpu.memory_space<vmem>>, %arg8: memref<128x256xbf16, #tpu.memory_space<vmem>>, %arg9: memref<32x256xf32, #tpu.memory_space<vmem>>) attributes {dimension_semantics = [#tpu.dimension_semantics<parallel>, #tpu.dimension_semantics<parallel>], iteration_bounds = array<i64: 2, 3>, scalar_prefetch = 0 : i64, scratch_operands = 2 : i64, tpu.core_type = #tpu.core_type<tc>, window_params = [{transform_indices = @transform_0, window_bounds = array<i64: 1, 8, 16, 256>}, {transform_indices = @transform_1, window_bounds = array<i64: 1, 8, 16, 128>}, {pipeline_mode = #tpu.pipeline_mode<synchronous>, transform_indices = @transform_2, window_bounds = array<i64: 8, 32, 128>}, {transform_indices = @transform_3, window_bounds = array<i64: 1, 256>}, {transform_indices = @transform_4, window_bounds = array<i64: 1, 32, 256>}, {transform_indices = @transform_5, window_bounds = array<i64: 1, 1, 32, 2>}]} {
    %cst = arith.constant 0.000000e+00 : f32
    %0 = vector.broadcast %cst : f32 to vector<32x256xf32>
    %c0 = arith.constant 0 : index
    %c0_0 = arith.constant 0 : index
    %1 = vector.load %arg9[%c0, %c0_0] : memref<32x256xf32, #tpu.memory_space<vmem>>, vector<32x256xf32>
    tpu.vector_store %arg9[%c0, %c0_0], %0 {strides = array<i32>} : memref<32x256xf32, #tpu.memory_space<vmem>>, vector<32x256xf32>,
    %c0_1 = arith.constant 0 : index
    %c0_2 = arith.constant 0 : index
    %c0_3 = arith.constant 0 : index
    %c0_4 = arith.constant 0 : index
    %2 = vector.load %arg2[%c0_1, %c0_2, %c0_3, %c0_4] : memref<1x8x16x256xbf16, #tpu.memory_space<vmem>>, vector<1x1x16x256xbf16>
    %3 = vector.shape_cast %2 : vector<1x1x16x256xbf16> to vector<16x256xbf16>
    %c0_5 = arith.constant 0 : index
    %c0_6 = arith.constant 0 : index
    %c0_7 = arith.constant 0 : index
    %c0_8 = arith.constant 0 : index
    %4 = vector.load %arg3[%c0_5, %c0_6, %c0_7, %c0_8] : memref<1x8x16x128xbf16, #tpu.memory_space<vmem>>, vector<1x1x16x128xbf16>
    %5 = vector.shape_cast %4 : vector<1x1x16x128xbf16> to vector<16x128xbf16>
    %6 = tpu.concatenate %3, %5 in 1 : vector<16x256xbf16>, vector<16x128xbf16> -> vector<16x384xbf16>
    %7 = vector.extract_strided_slice %6 {offsets = [0, 0], sizes = [16, 256], strides = [1, 1]} : vector<16x384xbf16> to vector<16x256xbf16>
    %c0_9 = arith.constant 0 : index
    %c0_10 = arith.constant 0 : index
    %8 = vector.load %arg8[%c0_9, %c0_10] : memref<128x256xbf16, #tpu.memory_space<vmem>>, vector<16x256xbf16>
    tpu.vector_store %arg8[%c0_9, %c0_10], %7 {strides = array<i32>} : memref<128x256xbf16, #tpu.memory_space<vmem>>, vector<16x256xbf16>,
    %9 = vector.extract_strided_slice %6 {offsets = [0, 1], sizes = [16, 256], strides = [1, 1]} : vector<16x384xbf16> to vector<16x256xbf16>
    %c16 = arith.constant 16 : index
    %c0_11 = arith.constant 0 : index
    %10 = vector.load %arg8[%c16, %c0_11] : memref<128x256xbf16, #tpu.memory_space<vmem>>, vector<16x256xbf16>
    tpu.vector_store %arg8[%c16, %c0_11], %9 {strides = array<i32>} : memref<128x256xbf16, #tpu.memory_space<vmem>>, vector<16x256xbf16>,
    %11 = vector.extract_strided_slice %6 {offsets = [0, 9], sizes = [16, 256], strides = [1, 1]} : vector<16x384xbf16> to vector<16x256xbf16>
    %c32 = arith.constant 32 : index
    %c0_12 = arith.constant 0 : index
    %12 = vector.load %arg8[%c32, %c0_12] : memref<128x256xbf16, #tpu.memory_space<vmem>>, vector<16x256xbf16>
    tpu.vector_store %arg8[%c32, %c0_12], %11 {strides = array<i32>} : memref<128x256xbf16, #tpu.memory_space<vmem>>, vector<16x256xbf16>,
    %13 = vector.extract_strided_slice %6 {offsets = [0, 10], sizes = [16, 256], strides = [1, 1]} : vector<16x384xbf16> to vector<16x256xbf16>
    %c48 = arith.constant 48 : index
    %c0_13 = arith.constant 0 : index
    %14 = vector.load %arg8[%c48, %c0_13] : memref<128x256xbf16, #tpu.memory_space<vmem>>, vector<16x256xbf16>
    tpu.vector_store %arg8[%c48, %c0_13], %13 {strides = array<i32>} : memref<128x256xbf16, #tpu.memory_space<vmem>>, vector<16x256xbf16>,
    %15 = vector.extract_strided_slice %6 {offsets = [0, 81], sizes = [16, 256], strides = [1, 1]} : vector<16x384xbf16> to vector<16x256xbf16>
    %c64 = arith.constant 64 : index
    %c0_14 = arith.constant 0 : index
    %16 = vector.load %arg8[%c64, %c0_14] : memref<128x256xbf16, #tpu.memory_space<vmem>>, vector<16x256xbf16>
    tpu.vector_store %arg8[%c64, %c0_14], %15 {strides = array<i32>} : memref<128x256xbf16, #tpu.memory_space<vmem>>, vector<16x256xbf16>,
    %17 = vector.extract_strided_slice %6 {offsets = [0, 82], sizes = [16, 256], strides = [1, 1]} : vector<16x384xbf16> to vector<16x256xbf16>
    %c80 = arith.constant 80 : index
    %c0_15 = arith.constant 0 : index
    %18 = vector.load %arg8[%c80, %c0_15] : memref<128x256xbf16, #tpu.memory_space<vmem>>, vector<16x256xbf16>
    tpu.vector_store %arg8[%c80, %c0_15], %17 {strides = array<i32>} : memref<128x256xbf16, #tpu.memory_space<vmem>>, vector<16x256xbf16>,
    %19 = vector.extract_strided_slice %6 {offsets = [0, 90], sizes = [16, 256], strides = [1, 1]} : vector<16x384xbf16> to vector<16x256xbf16>
    %c96 = arith.constant 96 : index
    %c0_16 = arith.constant 0 : index
    %20 = vector.load %arg8[%c96, %c0_16] : memref<128x256xbf16, #tpu.memory_space<vmem>>, vector<16x256xbf16>
    tpu.vector_store %arg8[%c96, %c0_16], %19 {strides = array<i32>} : memref<128x256xbf16, #tpu.memory_space<vmem>>, vector<16x256xbf16>,
    %21 = vector.extract_strided_slice %6 {offsets = [0, 91], sizes = [16, 256], strides = [1, 1]} : vector<16x384xbf16> to vector<16x256xbf16>
    %c112 = arith.constant 112 : index
    %c0_17 = arith.constant 0 : index
    %22 = vector.load %arg8[%c112, %c0_17] : memref<128x256xbf16, #tpu.memory_space<vmem>>, vector<16x256xbf16>
    tpu.vector_store %arg8[%c112, %c0_17], %21 {strides = array<i32>} : memref<128x256xbf16, #tpu.memory_space<vmem>>, vector<16x256xbf16>,
    %c0_18 = arith.constant 0 : index
    %c0_19 = arith.constant 0 : index
    %23 = vector.load %arg9[%c0_18, %c0_19] : memref<32x256xf32, #tpu.memory_space<vmem>>, vector<32x256xf32>
    %c0_20 = arith.constant 0 : index
    %c0_21 = arith.constant 0 : index
    %c0_22 = arith.constant 0 : index
    %24 = vector.load %arg4[%c0_20, %c0_21, %c0_22] : memref<8x32x128xbf16, #tpu.memory_space<vmem>>, vector<1x32x128xbf16>
    %25 = vector.shape_cast %24 : vector<1x32x128xbf16> to vector<32x128xbf16>
    %c0_23 = arith.constant 0 : index
    %c0_24 = arith.constant 0 : index
    %26 = vector.load %arg8[%c0_23, %c0_24] : memref<128x256xbf16, #tpu.memory_space<vmem>>, vector<128x256xbf16>
    %cst_25 = arith.constant dense<0.000000e+00> : vector<32x256xf32>
    %27 = tpu.matmul %25, %26, %cst_25 {dimension_numbers = #tpu.dot_dimension_numbers<[1], [0], [0], [1], [0, 0, 1, 1], [], []>} : vector<32x128xbf16>, vector<128x256xbf16>, vector<32x256xf32> -> vector<32x256xf32>
    %28 = arith.addf %23, %27 : vector<32x256xf32>
    %c0_26 = arith.constant 0 : index
    %c0_27 = arith.constant 0 : index
    %29 = vector.load %arg9[%c0_26, %c0_27] : memref<32x256xf32, #tpu.memory_space<vmem>>, vector<32x256xf32>
    tpu.vector_store %arg9[%c0_26, %c0_27], %28 {strides = array<i32>} : memref<32x256xf32, #tpu.memory_space<vmem>>, vector<32x256xf32>,
    %c0_28 = arith.constant 0 : index
    %c1 = arith.constant 1 : index
    %c0_29 = arith.constant 0 : index
    %c0_30 = arith.constant 0 : index
    %30 = vector.load %arg2[%c0_28, %c1, %c0_29, %c0_30] : memref<1x8x16x256xbf16, #tpu.memory_space<vmem>>, vector<1x1x16x256xbf16>
    %31 = vector.shape_cast %30 : vector<1x1x16x256xbf16> to vector<16x256xbf16>
    %c0_31 = arith.constant 0 : index
    %c1_32 = arith.constant 1 : index
    %c0_33 = arith.constant 0 : index
    %c0_34 = arith.constant 0 : index
    %32 = vector.load %arg3[%c0_31, %c1_32, %c0_33, %c0_34] : memref<1x8x16x128xbf16, #tpu.memory_space<vmem>>, vector<1x1x16x128xbf16>
    %33 = vector.shape_cast %32 : vector<1x1x16x128xbf16> to vector<16x128xbf16>
    %34 = tpu.concatenate %31, %33 in 1 : vector<16x256xbf16>, vector<16x128xbf16> -> vector<16x384xbf16>
    %35 = vector.extract_strided_slice %34 {offsets = [0, 0], sizes = [16, 256], strides = [1, 1]} : vector<16x384xbf16> to vector<16x256xbf16>
    %c0_35 = arith.constant 0 : index
    %c0_36 = arith.constant 0 : index
    %36 = vector.load %arg8[%c0_35, %c0_36] : memref<128x256xbf16, #tpu.memory_space<vmem>>, vector<16x256xbf16>
    tpu.vector_store %arg8[%c0_35, %c0_36], %35 {strides = array<i32>} : memref<128x256xbf16, #tpu.memory_space<vmem>>, vector<16x256xbf16>,
    %37 = vector.extract_strided_slice %34 {offsets = [0, 1], sizes = [16, 256], strides = [1, 1]} : vector<16x384xbf16> to vector<16x256xbf16>
    %c16_37 = arith.constant 16 : index
    %c0_38 = arith.constant 0 : index
    %38 = vector.load %arg8[%c16_37, %c0_38] : memref<128x256xbf16, #tpu.memory_space<vmem>>, vector<16x256xbf16>
    tpu.vector_store %arg8[%c16_37, %c0_38], %37 {strides = array<i32>} : memref<128x256xbf16, #tpu.memory_space<vmem>>, vector<16x256xbf16>,
    %39 = vector.extract_strided_slice %34 {offsets = [0, 9], sizes = [16, 256], strides = [1, 1]} : vector<16x384xbf16> to vector<16x256xbf16>
    %c32_39 = arith.constant 32 : index
    %c0_40 = arith.constant 0 : index
    %40 = vector.load %arg8[%c32_39, %c0_40] : memref<128x256xbf16, #tpu.memory_space<vmem>>, vector<16x256xbf16>
    tpu.vector_store %arg8[%c32_39, %c0_40], %39 {strides = array<i32>} : memref<128x256xbf16, #tpu.memory_space<vmem>>, vector<16x256xbf16>,
    %41 = vector.extract_strided_slice %34 {offsets = [0, 10], sizes = [16, 256], strides = [1, 1]} : vector<16x384xbf16> to vector<16x256xbf16>
    %c48_41 = arith.constant 48 : index
    %c0_42 = arith.constant 0 : index
    %42 = vector.load %arg8[%c48_41, %c0_42] : memref<128x256xbf16, #tpu.memory_space<vmem>>, vector<16x256xbf16>
    tpu.vector_store %arg8[%c48_41, %c0_42], %41 {strides = array<i32>} : memref<128x256xbf16, #tpu.memory_space<vmem>>, vector<16x256xbf16>,
    %43 = vector.extract_strided_slice %34 {offsets = [0, 81], sizes = [16, 256], strides = [1, 1]} : vector<16x384xbf16> to vector<16x256xbf16>
    %c64_43 = arith.constant 64 : index
    %c0_44 = arith.constant 0 : index
    %44 = vector.load %arg8[%c64_43, %c0_44] : memref<128x256xbf16, #tpu.memory_space<vmem>>, vector<16x256xbf16>
    tpu.vector_store %arg8[%c64_43, %c0_44], %43 {strides = array<i32>} : memref<128x256xbf16, #tpu.memory_space<vmem>>, vector<16x256xbf16>,
    %45 = vector.extract_strided_slice %34 {offsets = [0, 82], sizes = [16, 256], strides = [1, 1]} : vector<16x384xbf16> to vector<16x256xbf16>
    %c80_45 = arith.constant 80 : index
    %c0_46 = arith.constant 0 : index
    %46 = vector.load %arg8[%c80_45, %c0_46] : memref<128x256xbf16, #tpu.memory_space<vmem>>, vector<16x256xbf16>
    tpu.vector_store %arg8[%c80_45, %c0_46], %45 {strides = array<i32>} : memref<128x256xbf16, #tpu.memory_space<vmem>>, vector<16x256xbf16>,
    %47 = vector.extract_strided_slice %34 {offsets = [0, 90], sizes = [16, 256], strides = [1, 1]} : vector<16x384xbf16> to vector<16x256xbf16>
    %c96_47 = arith.constant 96 : index
    %c0_48 = arith.constant 0 : index
    %48 = vector.load %arg8[%c96_47, %c0_48] : memref<128x256xbf16, #tpu.memory_space<vmem>>, vector<16x256xbf16>
    tpu.vector_store %arg8[%c96_47, %c0_48], %47 {strides = array<i32>} : memref<128x256xbf16, #tpu.memory_space<vmem>>, vector<16x256xbf16>,
    %49 = vector.extract_strided_slice %34 {offsets = [0, 91], sizes = [16, 256], strides = [1, 1]} : vector<16x384xbf16> to vector<16x256xbf16>
    %c112_49 = arith.constant 112 : index
    %c0_50 = arith.constant 0 : index
    %50 = vector.load %arg8[%c112_49, %c0_50] : memref<128x256xbf16, #tpu.memory_space<vmem>>, vector<16x256xbf16>
    tpu.vector_store %arg8[%c112_49, %c0_50], %49 {strides = array<i32>} : memref<128x256xbf16, #tpu.memory_space<vmem>>, vector<16x256xbf16>,
    %c0_51 = arith.constant 0 : index
    %c0_52 = arith.constant 0 : index
    %51 = vector.load %arg9[%c0_51, %c0_52] : memref<32x256xf32, #tpu.memory_space<vmem>>, vector<32x256xf32>
    %c1_53 = arith.constant 1 : index
    %c0_54 = arith.constant 0 : index
    %c0_55 = arith.constant 0 : index
    %52 = vector.load %arg4[%c1_53, %c0_54, %c0_55] : memref<8x32x128xbf16, #tpu.memory_space<vmem>>, vector<1x32x128xbf16>
    %53 = vector.shape_cast %52 : vector<1x32x128xbf16> to vector<32x128xbf16>
    %c0_56 = arith.constant 0 : index
    %c0_57 = arith.constant 0 : index
    %54 = vector.load %arg8[%c0_56, %c0_57] : memref<128x256xbf16, #tpu.memory_space<vmem>>, vector<128x256xbf16>
    %cst_58 = arith.constant dense<0.000000e+00> : vector<32x256xf32>
    %55 = tpu.matmul %53, %54, %cst_58 {dimension_numbers = #tpu.dot_dimension_numbers<[1], [0], [0], [1], [0, 0, 1, 1], [], []>} : vector<32x128xbf16>, vector<128x256xbf16>, vector<32x256xf32> -> vector<32x256xf32>
    %56 = arith.addf %51, %55 : vector<32x256xf32>
    %c0_59 = arith.constant 0 : index
    %c0_60 = arith.constant 0 : index
    %57 = vector.load %arg9[%c0_59, %c0_60] : memref<32x256xf32, #tpu.memory_space<vmem>>, vector<32x256xf32>
    tpu.vector_store %arg9[%c0_59, %c0_60], %56 {strides = array<i32>} : memref<32x256xf32, #tpu.memory_space<vmem>>, vector<32x256xf32>,
    %c0_61 = arith.constant 0 : index
    %c2 = arith.constant 2 : index
    %c0_62 = arith.constant 0 : index
    %c0_63 = arith.constant 0 : index
    %58 = vector.load %arg2[%c0_61, %c2, %c0_62, %c0_63] : memref<1x8x16x256xbf16, #tpu.memory_space<vmem>>, vector<1x1x16x256xbf16>
    %59 = vector.shape_cast %58 : vector<1x1x16x256xbf16> to vector<16x256xbf16>
    %c0_64 = arith.constant 0 : index
    %c2_65 = arith.constant 2 : index
    %c0_66 = arith.constant 0 : index
    %c0_67 = arith.constant 0 : index
    %60 = vector.load %arg3[%c0_64, %c2_65, %c0_66, %c0_67] : memref<1x8x16x128xbf16, #tpu.memory_space<vmem>>, vector<1x1x16x128xbf16>
    %61 = vector.shape_cast %60 : vector<1x1x16x128xbf16> to vector<16x128xbf16>
    %62 = tpu.concatenate %59, %61 in 1 : vector<16x256xbf16>, vector<16x128xbf16> -> vector<16x384xbf16>
    %63 = vector.extract_strided_slice %62 {offsets = [0, 0], sizes = [16, 256], strides = [1, 1]} : vector<16x384xbf16> to vector<16x256xbf16>
    %c0_68 = arith.constant 0 : index
    %c0_69 = arith.constant 0 : index
    %64 = vector.load %arg8[%c0_68, %c0_69] : memref<128x256xbf16, #tpu.memory_space<vmem>>, vector<16x256xbf16>
    tpu.vector_store %arg8[%c0_68, %c0_69], %63 {strides = array<i32>} : memref<128x256xbf16, #tpu.memory_space<vmem>>, vector<16x256xbf16>,
    %65 = vector.extract_strided_slice %62 {offsets = [0, 1], sizes = [16, 256], strides = [1, 1]} : vector<16x384xbf16> to vector<16x256xbf16>
    %c16_70 = arith.constant 16 : index
    %c0_71 = arith.constant 0 : index
    %66 = vector.load %arg8[%c16_70, %c0_71] : memref<128x256xbf16, #tpu.memory_space<vmem>>, vector<16x256xbf16>
    tpu.vector_store %arg8[%c16_70, %c0_71], %65 {strides = array<i32>} : memref<128x256xbf16, #tpu.memory_space<vmem>>, vector<16x256xbf16>,
    %67 = vector.extract_strided_slice %62 {offsets = [0, 9], sizes = [16, 256], strides = [1, 1]} : vector<16x384xbf16> to vector<16x256xbf16>
    %c32_72 = arith.constant 32 : index
    %c0_73 = arith.constant 0 : index
    %68 = vector.load %arg8[%c32_72, %c0_73] : memref<128x256xbf16, #tpu.memory_space<vmem>>, vector<16x256xbf16>
    tpu.vector_store %arg8[%c32_72, %c0_73], %67 {strides = array<i32>} : memref<128x256xbf16, #tpu.memory_space<vmem>>, vector<16x256xbf16>,
    %69 = vector.extract_strided_slice %62 {offsets = [0, 10], sizes = [16, 256], strides = [1, 1]} : vector<16x384xbf16> to vector<16x256xbf16>
    %c48_74 = arith.constant 48 : index
    %c0_75 = arith.constant 0 : index
    %70 = vector.load %arg8[%c48_74, %c0_75] : memref<128x256xbf16, #tpu.memory_space<vmem>>, vector<16x256xbf16>
    tpu.vector_store %arg8[%c48_74, %c0_75], %69 {strides = array<i32>} : memref<128x256xbf16, #tpu.memory_space<vmem>>, vector<16x256xbf16>,
    %71 = vector.extract_strided_slice %62 {offsets = [0, 81], sizes = [16, 256], strides = [1, 1]} : vector<16x384xbf16> to vector<16x256xbf16>
    %c64_76 = arith.constant 64 : index
    %c0_77 = arith.constant 0 : index
    %72 = vector.load %arg8[%c64_76, %c0_77] : memref<128x256xbf16, #tpu.memory_space<vmem>>, vector<16x256xbf16>
    tpu.vector_store %arg8[%c64_76, %c0_77], %71 {strides = array<i32>} : memref<128x256xbf16, #tpu.memory_space<vmem>>, vector<16x256xbf16>,
    %73 = vector.extract_strided_slice %62 {offsets = [0, 82], sizes = [16, 256], strides = [1, 1]} : vector<16x384xbf16> to vector<16x256xbf16>
    %c80_78 = arith.constant 80 : index
    %c0_79 = arith.constant 0 : index
    %74 = vector.load %arg8[%c80_78, %c0_79] : memref<128x256xbf16, #tpu.memory_space<vmem>>, vector<16x256xbf16>
    tpu.vector_store %arg8[%c80_78, %c0_79], %73 {strides = array<i32>} : memref<128x256xbf16, #tpu.memory_space<vmem>>, vector<16x256xbf16>,
    %75 = vector.extract_strided_slice %62 {offsets = [0, 90], sizes = [16, 256], strides = [1, 1]} : vector<16x384xbf16> to vector<16x256xbf16>
    %c96_80 = arith.constant 96 : index
    %c0_81 = arith.constant 0 : index
    %76 = vector.load %arg8[%c96_80, %c0_81] : memref<128x256xbf16, #tpu.memory_space<vmem>>, vector<16x256xbf16>
    tpu.vector_store %arg8[%c96_80, %c0_81], %75 {strides = array<i32>} : memref<128x256xbf16, #tpu.memory_space<vmem>>, vector<16x256xbf16>,
    %77 = vector.extract_strided_slice %62 {offsets = [0, 91], sizes = [16, 256], strides = [1, 1]} : vector<16x384xbf16> to vector<16x256xbf16>
    %c112_82 = arith.constant 112 : index
    %c0_83 = arith.constant 0 : index
    %78 = vector.load %arg8[%c112_82, %c0_83] : memref<128x256xbf16, #tpu.memory_space<vmem>>, vector<16x256xbf16>
    tpu.vector_store %arg8[%c112_82, %c0_83], %77 {strides = array<i32>} : memref<128x256xbf16, #tpu.memory_space<vmem>>, vector<16x256xbf16>,
    %c0_84 = arith.constant 0 : index
    %c0_85 = arith.constant 0 : index
    %79 = vector.load %arg9[%c0_84, %c0_85] : memref<32x256xf32, #tpu.memory_space<vmem>>, vector<32x256xf32>
    %c2_86 = arith.constant 2 : index
    %c0_87 = arith.constant 0 : index
    %c0_88 = arith.constant 0 : index
    %80 = vector.load %arg4[%c2_86, %c0_87, %c0_88] : memref<8x32x128xbf16, #tpu.memory_space<vmem>>, vector<1x32x128xbf16>
    %81 = vector.shape_cast %80 : vector<1x32x128xbf16> to vector<32x128xbf16>
    %c0_89 = arith.constant 0 : index
    %c0_90 = arith.constant 0 : index
    %82 = vector.load %arg8[%c0_89, %c0_90] : memref<128x256xbf16, #tpu.memory_space<vmem>>, vector<128x256xbf16>
    %cst_91 = arith.constant dense<0.000000e+00> : vector<32x256xf32>
    %83 = tpu.matmul %81, %82, %cst_91 {dimension_numbers = #tpu.dot_dimension_numbers<[1], [0], [0], [1], [0, 0, 1, 1], [], []>} : vector<32x128xbf16>, vector<128x256xbf16>, vector<32x256xf32> -> vector<32x256xf32>
    %84 = arith.addf %79, %83 : vector<32x256xf32>
    %c0_92 = arith.constant 0 : index
    %c0_93 = arith.constant 0 : index
    %85 = vector.load %arg9[%c0_92, %c0_93] : memref<32x256xf32, #tpu.memory_space<vmem>>, vector<32x256xf32>
    tpu.vector_store %arg9[%c0_92, %c0_93], %84 {strides = array<i32>} : memref<32x256xf32, #tpu.memory_space<vmem>>, vector<32x256xf32>,
    %c0_94 = arith.constant 0 : index
    %c3 = arith.constant 3 : index
    %c0_95 = arith.constant 0 : index
    %c0_96 = arith.constant 0 : index
    %86 = vector.load %arg2[%c0_94, %c3, %c0_95, %c0_96] : memref<1x8x16x256xbf16, #tpu.memory_space<vmem>>, vector<1x1x16x256xbf16>
    %87 = vector.shape_cast %86 : vector<1x1x16x256xbf16> to vector<16x256xbf16>
    %c0_97 = arith.constant 0 : index
    %c3_98 = arith.constant 3 : index
    %c0_99 = arith.constant 0 : index
    %c0_100 = arith.constant 0 : index
    %88 = vector.load %arg3[%c0_97, %c3_98, %c0_99, %c0_100] : memref<1x8x16x128xbf16, #tpu.memory_space<vmem>>, vector<1x1x16x128xbf16>
    %89 = vector.shape_cast %88 : vector<1x1x16x128xbf16> to vector<16x128xbf16>
    %90 = tpu.concatenate %87, %89 in 1 : vector<16x256xbf16>, vector<16x128xbf16> -> vector<16x384xbf16>
    %91 = vector.extract_strided_slice %90 {offsets = [0, 0], sizes = [16, 256], strides = [1, 1]} : vector<16x384xbf16> to vector<16x256xbf16>
    %c0_101 = arith.constant 0 : index
    %c0_102 = arith.constant 0 : index
    %92 = vector.load %arg8[%c0_101, %c0_102] : memref<128x256xbf16, #tpu.memory_space<vmem>>, vector<16x256xbf16>
    tpu.vector_store %arg8[%c0_101, %c0_102], %91 {strides = array<i32>} : memref<128x256xbf16, #tpu.memory_space<vmem>>, vector<16x256xbf16>,
    %93 = vector.extract_strided_slice %90 {offsets = [0, 1], sizes = [16, 256], strides = [1, 1]} : vector<16x384xbf16> to vector<16x256xbf16>
    %c16_103 = arith.constant 16 : index
    %c0_104 = arith.constant 0 : index
    %94 = vector.load %arg8[%c16_103, %c0_104] : memref<128x256xbf16, #tpu.memory_space<vmem>>, vector<16x256xbf16>
    tpu.vector_store %arg8[%c16_103, %c0_104], %93 {strides = array<i32>} : memref<128x256xbf16, #tpu.memory_space<vmem>>, vector<16x256xbf16>,
    %95 = vector.extract_strided_slice %90 {offsets = [0, 9], sizes = [16, 256], strides = [1, 1]} : vector<16x384xbf16> to vector<16x256xbf16>
    %c32_105 = arith.constant 32 : index
    %c0_106 = arith.constant 0 : index
    %96 = vector.load %arg8[%c32_105, %c0_106] : memref<128x256xbf16, #tpu.memory_space<vmem>>, vector<16x256xbf16>
    tpu.vector_store %arg8[%c32_105, %c0_106], %95 {strides = array<i32>} : memref<128x256xbf16, #tpu.memory_space<vmem>>, vector<16x256xbf16>,
    %97 = vector.extract_strided_slice %90 {offsets = [0, 10], sizes = [16, 256], strides = [1, 1]} : vector<16x384xbf16> to vector<16x256xbf16>
    %c48_107 = arith.constant 48 : index
    %c0_108 = arith.constant 0 : index
    %98 = vector.load %arg8[%c48_107, %c0_108] : memref<128x256xbf16, #tpu.memory_space<vmem>>, vector<16x256xbf16>
    tpu.vector_store %arg8[%c48_107, %c0_108], %97 {strides = array<i32>} : memref<128x256xbf16, #tpu.memory_space<vmem>>, vector<16x256xbf16>,
    %99 = vector.extract_strided_slice %90 {offsets = [0, 81], sizes = [16, 256], strides = [1, 1]} : vector<16x384xbf16> to vector<16x256xbf16>
    %c64_109 = arith.constant 64 : index
    %c0_110 = arith.constant 0 : index
    %100 = vector.load %arg8[%c64_109, %c0_110] : memref<128x256xbf16, #tpu.memory_space<vmem>>, vector<16x256xbf16>
    tpu.vector_store %arg8[%c64_109, %c0_110], %99 {strides = array<i32>} : memref<128x256xbf16, #tpu.memory_space<vmem>>, vector<16x256xbf16>,
    %101 = vector.extract_strided_slice %90 {offsets = [0, 82], sizes = [16, 256], strides = [1, 1]} : vector<16x384xbf16> to vector<16x256xbf16>
    %c80_111 = arith.constant 80 : index
    %c0_112 = arith.constant 0 : index
    %102 = vector.load %arg8[%c80_111, %c0_112] : memref<128x256xbf16, #tpu.memory_space<vmem>>, vector<16x256xbf16>
    tpu.vector_store %arg8[%c80_111, %c0_112], %101 {strides = array<i32>} : memref<128x256xbf16, #tpu.memory_space<vmem>>, vector<16x256xbf16>,
    %103 = vector.extract_strided_slice %90 {offsets = [0, 90], sizes = [16, 256], strides = [1, 1]} : vector<16x384xbf16> to vector<16x256xbf16>
    %c96_113 = arith.constant 96 : index
    %c0_114 = arith.constant 0 : index
    %104 = vector.load %arg8[%c96_113, %c0_114] : memref<128x256xbf16, #tpu.memory_space<vmem>>, vector<16x256xbf16>
    tpu.vector_store %arg8[%c96_113, %c0_114], %103 {strides = array<i32>} : memref<128x256xbf16, #tpu.memory_space<vmem>>, vector<16x256xbf16>,
    %105 = vector.extract_strided_slice %90 {offsets = [0, 91], sizes = [16, 256], strides = [1, 1]} : vector<16x384xbf16> to vector<16x256xbf16>
    %c112_115 = arith.constant 112 : index
    %c0_116 = arith.constant 0 : index
    %106 = vector.load %arg8[%c112_115, %c0_116] : memref<128x256xbf16, #tpu.memory_space<vmem>>, vector<16x256xbf16>
    tpu.vector_store %arg8[%c112_115, %c0_116], %105 {strides = array<i32>} : memref<128x256xbf16, #tpu.memory_space<vmem>>, vector<16x256xbf16>,
    %c0_117 = arith.constant 0 : index
    %c0_118 = arith.constant 0 : index
    %107 = vector.load %arg9[%c0_117, %c0_118] : memref<32x256xf32, #tpu.memory_space<vmem>>, vector<32x256xf32>
    %c3_119 = arith.constant 3 : index
    %c0_120 = arith.constant 0 : index
    %c0_121 = arith.constant 0 : index
    %108 = vector.load %arg4[%c3_119, %c0_120, %c0_121] : memref<8x32x128xbf16, #tpu.memory_space<vmem>>, vector<1x32x128xbf16>
    %109 = vector.shape_cast %108 : vector<1x32x128xbf16> to vector<32x128xbf16>
    %c0_122 = arith.constant 0 : index
    %c0_123 = arith.constant 0 : index
    %110 = vector.load %arg8[%c0_122, %c0_123] : memref<128x256xbf16, #tpu.memory_space<vmem>>, vector<128x256xbf16>
    %cst_124 = arith.constant dense<0.000000e+00> : vector<32x256xf32>
    %111 = tpu.matmul %109, %110, %cst_124 {dimension_numbers = #tpu.dot_dimension_numbers<[1], [0], [0], [1], [0, 0, 1, 1], [], []>} : vector<32x128xbf16>, vector<128x256xbf16>, vector<32x256xf32> -> vector<32x256xf32>
    %112 = arith.addf %107, %111 : vector<32x256xf32>
    %c0_125 = arith.constant 0 : index
    %c0_126 = arith.constant 0 : index
    %113 = vector.load %arg9[%c0_125, %c0_126] : memref<32x256xf32, #tpu.memory_space<vmem>>, vector<32x256xf32>
    tpu.vector_store %arg9[%c0_125, %c0_126], %112 {strides = array<i32>} : memref<32x256xf32, #tpu.memory_space<vmem>>, vector<32x256xf32>,
    %c0_127 = arith.constant 0 : index
    %c4 = arith.constant 4 : index
    %c0_128 = arith.constant 0 : index
    %c0_129 = arith.constant 0 : index
    %114 = vector.load %arg2[%c0_127, %c4, %c0_128, %c0_129] : memref<1x8x16x256xbf16, #tpu.memory_space<vmem>>, vector<1x1x16x256xbf16>
    %115 = vector.shape_cast %114 : vector<1x1x16x256xbf16> to vector<16x256xbf16>
    %c0_130 = arith.constant 0 : index
    %c4_131 = arith.constant 4 : index
    %c0_132 = arith.constant 0 : index
    %c0_133 = arith.constant 0 : index
    %116 = vector.load %arg3[%c0_130, %c4_131, %c0_132, %c0_133] : memref<1x8x16x128xbf16, #tpu.memory_space<vmem>>, vector<1x1x16x128xbf16>
    %117 = vector.shape_cast %116 : vector<1x1x16x128xbf16> to vector<16x128xbf16>
    %118 = tpu.concatenate %115, %117 in 1 : vector<16x256xbf16>, vector<16x128xbf16> -> vector<16x384xbf16>
    %119 = vector.extract_strided_slice %118 {offsets = [0, 0], sizes = [16, 256], strides = [1, 1]} : vector<16x384xbf16> to vector<16x256xbf16>
    %c0_134 = arith.constant 0 : index
    %c0_135 = arith.constant 0 : index
    %120 = vector.load %arg8[%c0_134, %c0_135] : memref<128x256xbf16, #tpu.memory_space<vmem>>, vector<16x256xbf16>
    tpu.vector_store %arg8[%c0_134, %c0_135], %119 {strides = array<i32>} : memref<128x256xbf16, #tpu.memory_space<vmem>>, vector<16x256xbf16>,
    %121 = vector.extract_strided_slice %118 {offsets = [0, 1], sizes = [16, 256], strides = [1, 1]} : vector<16x384xbf16> to vector<16x256xbf16>
    %c16_136 = arith.constant 16 : index
    %c0_137 = arith.constant 0 : index
    %122 = vector.load %arg8[%c16_136, %c0_137] : memref<128x256xbf16, #tpu.memory_space<vmem>>, vector<16x256xbf16>
    tpu.vector_store %arg8[%c16_136, %c0_137], %121 {strides = array<i32>} : memref<128x256xbf16, #tpu.memory_space<vmem>>, vector<16x256xbf16>,
    %123 = vector.extract_strided_slice %118 {offsets = [0, 9], sizes = [16, 256], strides = [1, 1]} : vector<16x384xbf16> to vector<16x256xbf16>
    %c32_138 = arith.constant 32 : index
    %c0_139 = arith.constant 0 : index
    %124 = vector.load %arg8[%c32_138, %c0_139] : memref<128x256xbf16, #tpu.memory_space<vmem>>, vector<16x256xbf16>
    tpu.vector_store %arg8[%c32_138, %c0_139], %123 {strides = array<i32>} : memref<128x256xbf16, #tpu.memory_space<vmem>>, vector<16x256xbf16>,
    %125 = vector.extract_strided_slice %118 {offsets = [0, 10], sizes = [16, 256], strides = [1, 1]} : vector<16x384xbf16> to vector<16x256xbf16>
    %c48_140 = arith.constant 48 : index
    %c0_141 = arith.constant 0 : index
    %126 = vector.load %arg8[%c48_140, %c0_141] : memref<128x256xbf16, #tpu.memory_space<vmem>>, vector<16x256xbf16>
    tpu.vector_store %arg8[%c48_140, %c0_141], %125 {strides = array<i32>} : memref<128x256xbf16, #tpu.memory_space<vmem>>, vector<16x256xbf16>,
    %127 = vector.extract_strided_slice %118 {offsets = [0, 81], sizes = [16, 256], strides = [1, 1]} : vector<16x384xbf16> to vector<16x256xbf16>
    %c64_142 = arith.constant 64 : index
    %c0_143 = arith.constant 0 : index
    %128 = vector.load %arg8[%c64_142, %c0_143] : memref<128x256xbf16, #tpu.memory_space<vmem>>, vector<16x256xbf16>
    tpu.vector_store %arg8[%c64_142, %c0_143], %127 {strides = array<i32>} : memref<128x256xbf16, #tpu.memory_space<vmem>>, vector<16x256xbf16>,
    %129 = vector.extract_strided_slice %118 {offsets = [0, 82], sizes = [16, 256], strides = [1, 1]} : vector<16x384xbf16> to vector<16x256xbf16>
    %c80_144 = arith.constant 80 : index
    %c0_145 = arith.constant 0 : index
    %130 = vector.load %arg8[%c80_144, %c0_145] : memref<128x256xbf16, #tpu.memory_space<vmem>>, vector<16x256xbf16>
    tpu.vector_store %arg8[%c80_144, %c0_145], %129 {strides = array<i32>} : memref<128x256xbf16, #tpu.memory_space<vmem>>, vector<16x256xbf16>,
    %131 = vector.extract_strided_slice %118 {offsets = [0, 90], sizes = [16, 256], strides = [1, 1]} : vector<16x384xbf16> to vector<16x256xbf16>
    %c96_146 = arith.constant 96 : index
    %c0_147 = arith.constant 0 : index
    %132 = vector.load %arg8[%c96_146, %c0_147] : memref<128x256xbf16, #tpu.memory_space<vmem>>, vector<16x256xbf16>
    tpu.vector_store %arg8[%c96_146, %c0_147], %131 {strides = array<i32>} : memref<128x256xbf16, #tpu.memory_space<vmem>>, vector<16x256xbf16>,
    %133 = vector.extract_strided_slice %118 {offsets = [0, 91], sizes = [16, 256], strides = [1, 1]} : vector<16x384xbf16> to vector<16x256xbf16>
    %c112_148 = arith.constant 112 : index
    %c0_149 = arith.constant 0 : index
    %134 = vector.load %arg8[%c112_148, %c0_149] : memref<128x256xbf16, #tpu.memory_space<vmem>>, vector<16x256xbf16>
    tpu.vector_store %arg8[%c112_148, %c0_149], %133 {strides = array<i32>} : memref<128x256xbf16, #tpu.memory_space<vmem>>, vector<16x256xbf16>,
    %c0_150 = arith.constant 0 : index
    %c0_151 = arith.constant 0 : index
    %135 = vector.load %arg9[%c0_150, %c0_151] : memref<32x256xf32, #tpu.memory_space<vmem>>, vector<32x256xf32>
    %c4_152 = arith.constant 4 : index
    %c0_153 = arith.constant 0 : index
    %c0_154 = arith.constant 0 : index
    %136 = vector.load %arg4[%c4_152, %c0_153, %c0_154] : memref<8x32x128xbf16, #tpu.memory_space<vmem>>, vector<1x32x128xbf16>
    %137 = vector.shape_cast %136 : vector<1x32x128xbf16> to vector<32x128xbf16>
    %c0_155 = arith.constant 0 : index
    %c0_156 = arith.constant 0 : index
    %138 = vector.load %arg8[%c0_155, %c0_156] : memref<128x256xbf16, #tpu.memory_space<vmem>>, vector<128x256xbf16>
    %cst_157 = arith.constant dense<0.000000e+00> : vector<32x256xf32>
    %139 = tpu.matmul %137, %138, %cst_157 {dimension_numbers = #tpu.dot_dimension_numbers<[1], [0], [0], [1], [0, 0, 1, 1], [], []>} : vector<32x128xbf16>, vector<128x256xbf16>, vector<32x256xf32> -> vector<32x256xf32>
    %140 = arith.addf %135, %139 : vector<32x256xf32>
    %c0_158 = arith.constant 0 : index
    %c0_159 = arith.constant 0 : index
    %141 = vector.load %arg9[%c0_158, %c0_159] : memref<32x256xf32, #tpu.memory_space<vmem>>, vector<32x256xf32>
    tpu.vector_store %arg9[%c0_158, %c0_159], %140 {strides = array<i32>} : memref<32x256xf32, #tpu.memory_space<vmem>>, vector<32x256xf32>,
    %c0_160 = arith.constant 0 : index
    %c5 = arith.constant 5 : index
    %c0_161 = arith.constant 0 : index
    %c0_162 = arith.constant 0 : index
    %142 = vector.load %arg2[%c0_160, %c5, %c0_161, %c0_162] : memref<1x8x16x256xbf16, #tpu.memory_space<vmem>>, vector<1x1x16x256xbf16>
    %143 = vector.shape_cast %142 : vector<1x1x16x256xbf16> to vector<16x256xbf16>
    %c0_163 = arith.constant 0 : index
    %c5_164 = arith.constant 5 : index
    %c0_165 = arith.constant 0 : index
    %c0_166 = arith.constant 0 : index
    %144 = vector.load %arg3[%c0_163, %c5_164, %c0_165, %c0_166] : memref<1x8x16x128xbf16, #tpu.memory_space<vmem>>, vector<1x1x16x128xbf16>
    %145 = vector.shape_cast %144 : vector<1x1x16x128xbf16> to vector<16x128xbf16>
    %146 = tpu.concatenate %143, %145 in 1 : vector<16x256xbf16>, vector<16x128xbf16> -> vector<16x384xbf16>
    %147 = vector.extract_strided_slice %146 {offsets = [0, 0], sizes = [16, 256], strides = [1, 1]} : vector<16x384xbf16> to vector<16x256xbf16>
    %c0_167 = arith.constant 0 : index
    %c0_168 = arith.constant 0 : index
    %148 = vector.load %arg8[%c0_167, %c0_168] : memref<128x256xbf16, #tpu.memory_space<vmem>>, vector<16x256xbf16>
    tpu.vector_store %arg8[%c0_167, %c0_168], %147 {strides = array<i32>} : memref<128x256xbf16, #tpu.memory_space<vmem>>, vector<16x256xbf16>,
    %149 = vector.extract_strided_slice %146 {offsets = [0, 1], sizes = [16, 256], strides = [1, 1]} : vector<16x384xbf16> to vector<16x256xbf16>
    %c16_169 = arith.constant 16 : index
    %c0_170 = arith.constant 0 : index
    %150 = vector.load %arg8[%c16_169, %c0_170] : memref<128x256xbf16, #tpu.memory_space<vmem>>, vector<16x256xbf16>
    tpu.vector_store %arg8[%c16_169, %c0_170], %149 {strides = array<i32>} : memref<128x256xbf16, #tpu.memory_space<vmem>>, vector<16x256xbf16>,
    %151 = vector.extract_strided_slice %146 {offsets = [0, 9], sizes = [16, 256], strides = [1, 1]} : vector<16x384xbf16> to vector<16x256xbf16>
    %c32_171 = arith.constant 32 : index
    %c0_172 = arith.constant 0 : index
    %152 = vector.load %arg8[%c32_171, %c0_172] : memref<128x256xbf16, #tpu.memory_space<vmem>>, vector<16x256xbf16>
    tpu.vector_store %arg8[%c32_171, %c0_172], %151 {strides = array<i32>} : memref<128x256xbf16, #tpu.memory_space<vmem>>, vector<16x256xbf16>,
    %153 = vector.extract_strided_slice %146 {offsets = [0, 10], sizes = [16, 256], strides = [1, 1]} : vector<16x384xbf16> to vector<16x256xbf16>
    %c48_173 = arith.constant 48 : index
    %c0_174 = arith.constant 0 : index
    %154 = vector.load %arg8[%c48_173, %c0_174] : memref<128x256xbf16, #tpu.memory_space<vmem>>, vector<16x256xbf16>
    tpu.vector_store %arg8[%c48_173, %c0_174], %153 {strides = array<i32>} : memref<128x256xbf16, #tpu.memory_space<vmem>>, vector<16x256xbf16>,
    %155 = vector.extract_strided_slice %146 {offsets = [0, 81], sizes = [16, 256], strides = [1, 1]} : vector<16x384xbf16> to vector<16x256xbf16>
    %c64_175 = arith.constant 64 : index
    %c0_176 = arith.constant 0 : index
    %156 = vector.load %arg8[%c64_175, %c0_176] : memref<128x256xbf16, #tpu.memory_space<vmem>>, vector<16x256xbf16>
    tpu.vector_store %arg8[%c64_175, %c0_176], %155 {strides = array<i32>} : memref<128x256xbf16, #tpu.memory_space<vmem>>, vector<16x256xbf16>,
    %157 = vector.extract_strided_slice %146 {offsets = [0, 82], sizes = [16, 256], strides = [1, 1]} : vector<16x384xbf16> to vector<16x256xbf16>
    %c80_177 = arith.constant 80 : index
    %c0_178 = arith.constant 0 : index
    %158 = vector.load %arg8[%c80_177, %c0_178] : memref<128x256xbf16, #tpu.memory_space<vmem>>, vector<16x256xbf16>
    tpu.vector_store %arg8[%c80_177, %c0_178], %157 {strides = array<i32>} : memref<128x256xbf16, #tpu.memory_space<vmem>>, vector<16x256xbf16>,
    %159 = vector.extract_strided_slice %146 {offsets = [0, 90], sizes = [16, 256], strides = [1, 1]} : vector<16x384xbf16> to vector<16x256xbf16>
    %c96_179 = arith.constant 96 : index
    %c0_180 = arith.constant 0 : index
    %160 = vector.load %arg8[%c96_179, %c0_180] : memref<128x256xbf16, #tpu.memory_space<vmem>>, vector<16x256xbf16>
    tpu.vector_store %arg8[%c96_179, %c0_180], %159 {strides = array<i32>} : memref<128x256xbf16, #tpu.memory_space<vmem>>, vector<16x256xbf16>,
    %161 = vector.extract_strided_slice %146 {offsets = [0, 91], sizes = [16, 256], strides = [1, 1]} : vector<16x384xbf16> to vector<16x256xbf16>
    %c112_181 = arith.constant 112 : index
    %c0_182 = arith.constant 0 : index
    %162 = vector.load %arg8[%c112_181, %c0_182] : memref<128x256xbf16, #tpu.memory_space<vmem>>, vector<16x256xbf16>
    tpu.vector_store %arg8[%c112_181, %c0_182], %161 {strides = array<i32>} : memref<128x256xbf16, #tpu.memory_space<vmem>>, vector<16x256xbf16>,
    %c0_183 = arith.constant 0 : index
    %c0_184 = arith.constant 0 : index
    %163 = vector.load %arg9[%c0_183, %c0_184] : memref<32x256xf32, #tpu.memory_space<vmem>>, vector<32x256xf32>
    %c5_185 = arith.constant 5 : index
    %c0_186 = arith.constant 0 : index
    %c0_187 = arith.constant 0 : index
    %164 = vector.load %arg4[%c5_185, %c0_186, %c0_187] : memref<8x32x128xbf16, #tpu.memory_space<vmem>>, vector<1x32x128xbf16>
    %165 = vector.shape_cast %164 : vector<1x32x128xbf16> to vector<32x128xbf16>
    %c0_188 = arith.constant 0 : index
    %c0_189 = arith.constant 0 : index
    %166 = vector.load %arg8[%c0_188, %c0_189] : memref<128x256xbf16, #tpu.memory_space<vmem>>, vector<128x256xbf16>
    %cst_190 = arith.constant dense<0.000000e+00> : vector<32x256xf32>
    %167 = tpu.matmul %165, %166, %cst_190 {dimension_numbers = #tpu.dot_dimension_numbers<[1], [0], [0], [1], [0, 0, 1, 1], [], []>} : vector<32x128xbf16>, vector<128x256xbf16>, vector<32x256xf32> -> vector<32x256xf32>
    %168 = arith.addf %163, %167 : vector<32x256xf32>
    %c0_191 = arith.constant 0 : index
    %c0_192 = arith.constant 0 : index
    %169 = vector.load %arg9[%c0_191, %c0_192] : memref<32x256xf32, #tpu.memory_space<vmem>>, vector<32x256xf32>
    tpu.vector_store %arg9[%c0_191, %c0_192], %168 {strides = array<i32>} : memref<32x256xf32, #tpu.memory_space<vmem>>, vector<32x256xf32>,
    %c0_193 = arith.constant 0 : index
    %c6 = arith.constant 6 : index
    %c0_194 = arith.constant 0 : index
    %c0_195 = arith.constant 0 : index
    %170 = vector.load %arg2[%c0_193, %c6, %c0_194, %c0_195] : memref<1x8x16x256xbf16, #tpu.memory_space<vmem>>, vector<1x1x16x256xbf16>
    %171 = vector.shape_cast %170 : vector<1x1x16x256xbf16> to vector<16x256xbf16>
    %c0_196 = arith.constant 0 : index
    %c6_197 = arith.constant 6 : index
    %c0_198 = arith.constant 0 : index
    %c0_199 = arith.constant 0 : index
    %172 = vector.load %arg3[%c0_196, %c6_197, %c0_198, %c0_199] : memref<1x8x16x128xbf16, #tpu.memory_space<vmem>>, vector<1x1x16x128xbf16>
    %173 = vector.shape_cast %172 : vector<1x1x16x128xbf16> to vector<16x128xbf16>
    %174 = tpu.concatenate %171, %173 in 1 : vector<16x256xbf16>, vector<16x128xbf16> -> vector<16x384xbf16>
    %175 = vector.extract_strided_slice %174 {offsets = [0, 0], sizes = [16, 256], strides = [1, 1]} : vector<16x384xbf16> to vector<16x256xbf16>
    %c0_200 = arith.constant 0 : index
    %c0_201 = arith.constant 0 : index
    %176 = vector.load %arg8[%c0_200, %c0_201] : memref<128x256xbf16, #tpu.memory_space<vmem>>, vector<16x256xbf16>
    tpu.vector_store %arg8[%c0_200, %c0_201], %175 {strides = array<i32>} : memref<128x256xbf16, #tpu.memory_space<vmem>>, vector<16x256xbf16>,
    %177 = vector.extract_strided_slice %174 {offsets = [0, 1], sizes = [16, 256], strides = [1, 1]} : vector<16x384xbf16> to vector<16x256xbf16>
    %c16_202 = arith.constant 16 : index
    %c0_203 = arith.constant 0 : index
    %178 = vector.load %arg8[%c16_202, %c0_203] : memref<128x256xbf16, #tpu.memory_space<vmem>>, vector<16x256xbf16>
    tpu.vector_store %arg8[%c16_202, %c0_203], %177 {strides = array<i32>} : memref<128x256xbf16, #tpu.memory_space<vmem>>, vector<16x256xbf16>,
    %179 = vector.extract_strided_slice %174 {offsets = [0, 9], sizes = [16, 256], strides = [1, 1]} : vector<16x384xbf16> to vector<16x256xbf16>
    %c32_204 = arith.constant 32 : index
    %c0_205 = arith.constant 0 : index
    %180 = vector.load %arg8[%c32_204, %c0_205] : memref<128x256xbf16, #tpu.memory_space<vmem>>, vector<16x256xbf16>
    tpu.vector_store %arg8[%c32_204, %c0_205], %179 {strides = array<i32>} : memref<128x256xbf16, #tpu.memory_space<vmem>>, vector<16x256xbf16>,
    %181 = vector.extract_strided_slice %174 {offsets = [0, 10], sizes = [16, 256], strides = [1, 1]} : vector<16x384xbf16> to vector<16x256xbf16>
    %c48_206 = arith.constant 48 : index
    %c0_207 = arith.constant 0 : index
    %182 = vector.load %arg8[%c48_206, %c0_207] : memref<128x256xbf16, #tpu.memory_space<vmem>>, vector<16x256xbf16>
    tpu.vector_store %arg8[%c48_206, %c0_207], %181 {strides = array<i32>} : memref<128x256xbf16, #tpu.memory_space<vmem>>, vector<16x256xbf16>,
    %183 = vector.extract_strided_slice %174 {offsets = [0, 81], sizes = [16, 256], strides = [1, 1]} : vector<16x384xbf16> to vector<16x256xbf16>
    %c64_208 = arith.constant 64 : index
    %c0_209 = arith.constant 0 : index
    %184 = vector.load %arg8[%c64_208, %c0_209] : memref<128x256xbf16, #tpu.memory_space<vmem>>, vector<16x256xbf16>
    tpu.vector_store %arg8[%c64_208, %c0_209], %183 {strides = array<i32>} : memref<128x256xbf16, #tpu.memory_space<vmem>>, vector<16x256xbf16>,
    %185 = vector.extract_strided_slice %174 {offsets = [0, 82], sizes = [16, 256], strides = [1, 1]} : vector<16x384xbf16> to vector<16x256xbf16>
    %c80_210 = arith.constant 80 : index
    %c0_211 = arith.constant 0 : index
    %186 = vector.load %arg8[%c80_210, %c0_211] : memref<128x256xbf16, #tpu.memory_space<vmem>>, vector<16x256xbf16>
    tpu.vector_store %arg8[%c80_210, %c0_211], %185 {strides = array<i32>} : memref<128x256xbf16, #tpu.memory_space<vmem>>, vector<16x256xbf16>,
    %187 = vector.extract_strided_slice %174 {offsets = [0, 90], sizes = [16, 256], strides = [1, 1]} : vector<16x384xbf16> to vector<16x256xbf16>
    %c96_212 = arith.constant 96 : index
    %c0_213 = arith.constant 0 : index
    %188 = vector.load %arg8[%c96_212, %c0_213] : memref<128x256xbf16, #tpu.memory_space<vmem>>, vector<16x256xbf16>
    tpu.vector_store %arg8[%c96_212, %c0_213], %187 {strides = array<i32>} : memref<128x256xbf16, #tpu.memory_space<vmem>>, vector<16x256xbf16>,
    %189 = vector.extract_strided_slice %174 {offsets = [0, 91], sizes = [16, 256], strides = [1, 1]} : vector<16x384xbf16> to vector<16x256xbf16>
    %c112_214 = arith.constant 112 : index
    %c0_215 = arith.constant 0 : index
    %190 = vector.load %arg8[%c112_214, %c0_215] : memref<128x256xbf16, #tpu.memory_space<vmem>>, vector<16x256xbf16>
    tpu.vector_store %arg8[%c112_214, %c0_215], %189 {strides = array<i32>} : memref<128x256xbf16, #tpu.memory_space<vmem>>, vector<16x256xbf16>,
    %c0_216 = arith.constant 0 : index
    %c0_217 = arith.constant 0 : index
    %191 = vector.load %arg9[%c0_216, %c0_217] : memref<32x256xf32, #tpu.memory_space<vmem>>, vector<32x256xf32>
    %c6_218 = arith.constant 6 : index
    %c0_219 = arith.constant 0 : index
    %c0_220 = arith.constant 0 : index
    %192 = vector.load %arg4[%c6_218, %c0_219, %c0_220] : memref<8x32x128xbf16, #tpu.memory_space<vmem>>, vector<1x32x128xbf16>
    %193 = vector.shape_cast %192 : vector<1x32x128xbf16> to vector<32x128xbf16>
    %c0_221 = arith.constant 0 : index
    %c0_222 = arith.constant 0 : index
    %194 = vector.load %arg8[%c0_221, %c0_222] : memref<128x256xbf16, #tpu.memory_space<vmem>>, vector<128x256xbf16>
    %cst_223 = arith.constant dense<0.000000e+00> : vector<32x256xf32>
    %195 = tpu.matmul %193, %194, %cst_223 {dimension_numbers = #tpu.dot_dimension_numbers<[1], [0], [0], [1], [0, 0, 1, 1], [], []>} : vector<32x128xbf16>, vector<128x256xbf16>, vector<32x256xf32> -> vector<32x256xf32>
    %196 = arith.addf %191, %195 : vector<32x256xf32>
    %c0_224 = arith.constant 0 : index
    %c0_225 = arith.constant 0 : index
    %197 = vector.load %arg9[%c0_224, %c0_225] : memref<32x256xf32, #tpu.memory_space<vmem>>, vector<32x256xf32>
    tpu.vector_store %arg9[%c0_224, %c0_225], %196 {strides = array<i32>} : memref<32x256xf32, #tpu.memory_space<vmem>>, vector<32x256xf32>,
    %c0_226 = arith.constant 0 : index
    %c7 = arith.constant 7 : index
    %c0_227 = arith.constant 0 : index
    %c0_228 = arith.constant 0 : index
    %198 = vector.load %arg2[%c0_226, %c7, %c0_227, %c0_228] : memref<1x8x16x256xbf16, #tpu.memory_space<vmem>>, vector<1x1x16x256xbf16>
    %199 = vector.shape_cast %198 : vector<1x1x16x256xbf16> to vector<16x256xbf16>
    %c0_229 = arith.constant 0 : index
    %c7_230 = arith.constant 7 : index
    %c0_231 = arith.constant 0 : index
    %c0_232 = arith.constant 0 : index
    %200 = vector.load %arg3[%c0_229, %c7_230, %c0_231, %c0_232] : memref<1x8x16x128xbf16, #tpu.memory_space<vmem>>, vector<1x1x16x128xbf16>
    %201 = vector.shape_cast %200 : vector<1x1x16x128xbf16> to vector<16x128xbf16>
    %202 = tpu.concatenate %199, %201 in 1 : vector<16x256xbf16>, vector<16x128xbf16> -> vector<16x384xbf16>
    %203 = vector.extract_strided_slice %202 {offsets = [0, 0], sizes = [16, 256], strides = [1, 1]} : vector<16x384xbf16> to vector<16x256xbf16>
    %c0_233 = arith.constant 0 : index
    %c0_234 = arith.constant 0 : index
    %204 = vector.load %arg8[%c0_233, %c0_234] : memref<128x256xbf16, #tpu.memory_space<vmem>>, vector<16x256xbf16>
    tpu.vector_store %arg8[%c0_233, %c0_234], %203 {strides = array<i32>} : memref<128x256xbf16, #tpu.memory_space<vmem>>, vector<16x256xbf16>,
    %205 = vector.extract_strided_slice %202 {offsets = [0, 1], sizes = [16, 256], strides = [1, 1]} : vector<16x384xbf16> to vector<16x256xbf16>
    %c16_235 = arith.constant 16 : index
    %c0_236 = arith.constant 0 : index
    %206 = vector.load %arg8[%c16_235, %c0_236] : memref<128x256xbf16, #tpu.memory_space<vmem>>, vector<16x256xbf16>
    tpu.vector_store %arg8[%c16_235, %c0_236], %205 {strides = array<i32>} : memref<128x256xbf16, #tpu.memory_space<vmem>>, vector<16x256xbf16>,
    %207 = vector.extract_strided_slice %202 {offsets = [0, 9], sizes = [16, 256], strides = [1, 1]} : vector<16x384xbf16> to vector<16x256xbf16>
    %c32_237 = arith.constant 32 : index
    %c0_238 = arith.constant 0 : index
    %208 = vector.load %arg8[%c32_237, %c0_238] : memref<128x256xbf16, #tpu.memory_space<vmem>>, vector<16x256xbf16>
    tpu.vector_store %arg8[%c32_237, %c0_238], %207 {strides = array<i32>} : memref<128x256xbf16, #tpu.memory_space<vmem>>, vector<16x256xbf16>,
    %209 = vector.extract_strided_slice %202 {offsets = [0, 10], sizes = [16, 256], strides = [1, 1]} : vector<16x384xbf16> to vector<16x256xbf16>
    %c48_239 = arith.constant 48 : index
    %c0_240 = arith.constant 0 : index
    %210 = vector.load %arg8[%c48_239, %c0_240] : memref<128x256xbf16, #tpu.memory_space<vmem>>, vector<16x256xbf16>
    tpu.vector_store %arg8[%c48_239, %c0_240], %209 {strides = array<i32>} : memref<128x256xbf16, #tpu.memory_space<vmem>>, vector<16x256xbf16>,
    %211 = vector.extract_strided_slice %202 {offsets = [0, 81], sizes = [16, 256], strides = [1, 1]} : vector<16x384xbf16> to vector<16x256xbf16>
    %c64_241 = arith.constant 64 : index
    %c0_242 = arith.constant 0 : index
    %212 = vector.load %arg8[%c64_241, %c0_242] : memref<128x256xbf16, #tpu.memory_space<vmem>>, vector<16x256xbf16>
    tpu.vector_store %arg8[%c64_241, %c0_242], %211 {strides = array<i32>} : memref<128x256xbf16, #tpu.memory_space<vmem>>, vector<16x256xbf16>,
    %213 = vector.extract_strided_slice %202 {offsets = [0, 82], sizes = [16, 256], strides = [1, 1]} : vector<16x384xbf16> to vector<16x256xbf16>
    %c80_243 = arith.constant 80 : index
    %c0_244 = arith.constant 0 : index
    %214 = vector.load %arg8[%c80_243, %c0_244] : memref<128x256xbf16, #tpu.memory_space<vmem>>, vector<16x256xbf16>
    tpu.vector_store %arg8[%c80_243, %c0_244], %213 {strides = array<i32>} : memref<128x256xbf16, #tpu.memory_space<vmem>>, vector<16x256xbf16>,
    %215 = vector.extract_strided_slice %202 {offsets = [0, 90], sizes = [16, 256], strides = [1, 1]} : vector<16x384xbf16> to vector<16x256xbf16>
    %c96_245 = arith.constant 96 : index
    %c0_246 = arith.constant 0 : index
    %216 = vector.load %arg8[%c96_245, %c0_246] : memref<128x256xbf16, #tpu.memory_space<vmem>>, vector<16x256xbf16>
    tpu.vector_store %arg8[%c96_245, %c0_246], %215 {strides = array<i32>} : memref<128x256xbf16, #tpu.memory_space<vmem>>, vector<16x256xbf16>,
    %217 = vector.extract_strided_slice %202 {offsets = [0, 91], sizes = [16, 256], strides = [1, 1]} : vector<16x384xbf16> to vector<16x256xbf16>
    %c112_247 = arith.constant 112 : index
    %c0_248 = arith.constant 0 : index
    %218 = vector.load %arg8[%c112_247, %c0_248] : memref<128x256xbf16, #tpu.memory_space<vmem>>, vector<16x256xbf16>
    tpu.vector_store %arg8[%c112_247, %c0_248], %217 {strides = array<i32>} : memref<128x256xbf16, #tpu.memory_space<vmem>>, vector<16x256xbf16>,
    %c0_249 = arith.constant 0 : index
    %c0_250 = arith.constant 0 : index
    %219 = vector.load %arg9[%c0_249, %c0_250] : memref<32x256xf32, #tpu.memory_space<vmem>>, vector<32x256xf32>
    %c7_251 = arith.constant 7 : index
    %c0_252 = arith.constant 0 : index
    %c0_253 = arith.constant 0 : index
    %220 = vector.load %arg4[%c7_251, %c0_252, %c0_253] : memref<8x32x128xbf16, #tpu.memory_space<vmem>>, vector<1x32x128xbf16>
    %221 = vector.shape_cast %220 : vector<1x32x128xbf16> to vector<32x128xbf16>
    %c0_254 = arith.constant 0 : index
    %c0_255 = arith.constant 0 : index
    %222 = vector.load %arg8[%c0_254, %c0_255] : memref<128x256xbf16, #tpu.memory_space<vmem>>, vector<128x256xbf16>
    %cst_256 = arith.constant dense<0.000000e+00> : vector<32x256xf32>
    %223 = tpu.matmul %221, %222, %cst_256 {dimension_numbers = #tpu.dot_dimension_numbers<[1], [0], [0], [1], [0, 0, 1, 1], [], []>} : vector<32x128xbf16>, vector<128x256xbf16>, vector<32x256xf32> -> vector<32x256xf32>
    %224 = arith.addf %219, %223 : vector<32x256xf32>
    %c0_257 = arith.constant 0 : index
    %c0_258 = arith.constant 0 : index
    %225 = vector.load %arg9[%c0_257, %c0_258] : memref<32x256xf32, #tpu.memory_space<vmem>>, vector<32x256xf32>
    tpu.vector_store %arg9[%c0_257, %c0_258], %224 {strides = array<i32>} : memref<32x256xf32, #tpu.memory_space<vmem>>, vector<32x256xf32>,
    %c0_259 = arith.constant 0 : index
    %c0_260 = arith.constant 0 : index
    %226 = vector.load %arg9[%c0_259, %c0_260] : memref<32x256xf32, #tpu.memory_space<vmem>>, vector<32x256xf32>
    %227 = arith.truncf %226 : vector<32x256xf32> to vector<32x256xbf16>
    %c0_261 = arith.constant 0 : index
    %c0_262 = arith.constant 0 : index
    %c0_263 = arith.constant 0 : index
    %228 = vector.load %arg6[%c0_261, %c0_262, %c0_263] : memref<1x32x256xbf16, #tpu.memory_space<vmem>>, vector<1x32x256xbf16>
    %229 = vector.shape_cast %228 : vector<1x32x256xbf16> to vector<32x256xbf16>
    %230 = vector.shape_cast %227 : vector<32x256xbf16> to vector<1x32x256xbf16>
    tpu.vector_store %arg6[%c0_261, %c0_262, %c0_263], %230 {strides = array<i32>} : memref<1x32x256xbf16, #tpu.memory_space<vmem>>, vector<1x32x256xbf16>,
    %c0_264 = arith.constant 0 : index
    %c0_265 = arith.constant 0 : index
    %231 = vector.load %arg5[%c0_264, %c0_265] : memref<1x256xf32, #tpu.memory_space<vmem>>, vector<1x256xf32>
    %232 = vector.broadcast %231 : vector<1x256xf32> to vector<32x256xf32>
    %233 = arith.mulf %226, %232 : vector<32x256xf32>
    %cst_266 = arith.constant dense<0.000000e+00> : vector<32xf32>
    %234 = vector.multi_reduction <add>, %233, %cst_266 [1] : vector<32x256xf32> to vector<32xf32>
    %235 = vector.shape_cast %234 : vector<32xf32> to vector<32x1xf32>
    %236 = arith.mulf %233, %226 : vector<32x256xf32>
    %cst_267 = arith.constant dense<0.000000e+00> : vector<32xf32>
    %237 = vector.multi_reduction <add>, %236, %cst_267 [1] : vector<32x256xf32> to vector<32xf32>
    %238 = vector.shape_cast %237 : vector<32xf32> to vector<32x1xf32>
    %239 = tpu.concatenate %235, %238 in 1 : vector<32x1xf32>, vector<32x1xf32> -> vector<32x2xf32>
    %c0_268 = arith.constant 0 : index
    %c0_269 = arith.constant 0 : index
    %c0_270 = arith.constant 0 : index
    %c0_271 = arith.constant 0 : index
    %240 = vector.load %arg7[%c0_268, %c0_269, %c0_270, %c0_271] : memref<1x1x32x2xf32, #tpu.memory_space<vmem>>, vector<1x1x32x2xf32>
    %241 = vector.shape_cast %240 : vector<1x1x32x2xf32> to vector<32x2xf32>
    %242 = vector.shape_cast %239 : vector<32x2xf32> to vector<1x1x32x2xf32>
    tpu.vector_store %arg7[%c0_268, %c0_269, %c0_270, %c0_271], %242 {strides = array<i32>} : memref<1x1x32x2xf32, #tpu.memory_space<vmem>>, vector<1x1x32x2xf32>,
    return
  }
  func.func @transform_0(%arg0: i32, %arg1: i32) -> (i32, i32, i32, i32) {
    %c0_i32 = arith.constant 0 : i32
    %c0_i32_0 = arith.constant 0 : i32
    %c0_i32_1 = arith.constant 0 : i32
    return %arg0, %c0_i32, %c0_i32_0, %arg1 : i32, i32, i32, i32
  }
  func.func @transform_1(%arg0: i32, %arg1: i32) -> (i32, i32, i32, i32) {
    %c1_i32 = arith.constant 1 : i32
    %0 = arith.addi %arg1, %c1_i32 : i32
    %c2_i32 = arith.constant 2 : i32
    %1 = arith.muli %0, %c2_i32 : i32
    %c0_i32 = arith.constant 0 : i32
    %c0_i32_0 = arith.constant 0 : i32
    %c0_i32_1 = arith.constant 0 : i32
    return %arg0, %c0_i32, %c0_i32_0, %1 : i32, i32, i32, i32
  }
  func.func @transform_2(%arg0: i32, %arg1: i32) -> (i32, i32, i32) {
    %c0_i32 = arith.constant 0 : i32
    %c0_i32_0 = arith.constant 0 : i32
    %c0_i32_1 = arith.constant 0 : i32
    %c0_i32_2 = arith.constant 0 : i32
    return %c0_i32, %c0_i32_0, %c0_i32_1 : i32, i32, i32
  }
  func.func @transform_3(%arg0: i32, %arg1: i32) -> (i32, i32) {
    %c0_i32 = arith.constant 0 : i32
    %c0_i32_0 = arith.constant 0 : i32
    return %c0_i32, %arg1 : i32, i32
  }
  func.func @transform_4(%arg0: i32, %arg1: i32) -> (i32, i32, i32) {
    %c0_i32 = arith.constant 0 : i32
    %c0_i32_0 = arith.constant 0 : i32
    return %arg0, %c0_i32, %arg1 : i32, i32, i32
  }
  func.func @transform_5(%arg0: i32, %arg1: i32) -> (i32, i32, i32, i32) {
    %c0_i32 = arith.constant 0 : i32
    %c0_i32_0 = arith.constant 0 : i32
    %c0_i32_1 = arith.constant 0 : i32
    return %arg0, %arg1, %c0_i32, %c0_i32_0 : i32, i32, i32, i32
  }
}

module attributes {stable_mosaic.version = 11 : i64} {
  func.func @_norm_act_kernel(%arg0: i32, %arg1: i32, %arg2: memref<1x32x768xbf16, #tpu.memory_space<vmem>>, %arg3: memref<1x3x32x2xf32, #tpu.memory_space<vmem>>, %arg4: memref<1x32x768xf32, #tpu.memory_space<vmem>>) attributes {dimension_semantics = [#tpu.dimension_semantics<parallel>, #tpu.dimension_semantics<parallel>], iteration_bounds = array<i64: 2, 1>, scalar_prefetch = 0 : i64, scratch_operands = 0 : i64, tpu.core_type = #tpu.core_type<tc>, window_params = [{transform_indices = @transform_0, window_bounds = array<i64: 1, 32, 768>}, {transform_indices = @transform_1, window_bounds = array<i64: 1, 3, 32, 2>}, {transform_indices = @transform_2, window_bounds = array<i64: 1, 32, 768>}]} {
    %c0 = arith.constant 0 : index
    %c0_0 = arith.constant 0 : index
    %c0_1 = arith.constant 0 : index
    %c0_2 = arith.constant 0 : index
    %0 = vector.load %arg3[%c0, %c0_0, %c0_1, %c0_2] : memref<1x3x32x2xf32, #tpu.memory_space<vmem>>, vector<1x3x32x2xf32>
    %1 = vector.shape_cast %0 : vector<1x3x32x2xf32> to vector<3x32x2xf32>
    %cst = arith.constant dense<0.000000e+00> : vector<32x2xf32>
    %2 = vector.multi_reduction <add>, %1, %cst [0] : vector<3x32x2xf32> to vector<32x2xf32>
    %3 = vector.extract_strided_slice %2 {offsets = [0, 0], sizes = [32, 1], strides = [1, 1]} : vector<32x2xf32> to vector<32x1xf32>
    %cst_3 = arith.constant 0.001953125 : f32
    %4 = vector.broadcast %cst_3 : f32 to vector<32x1xf32>
    %5 = arith.mulf %3, %4 : vector<32x1xf32>
    %6 = vector.extract_strided_slice %2 {offsets = [0, 1], sizes = [32, 1], strides = [1, 1]} : vector<32x2xf32> to vector<32x1xf32>
    %cst_4 = arith.constant 0.001953125 : f32
    %7 = vector.broadcast %cst_4 : f32 to vector<32x1xf32>
    %8 = arith.mulf %6, %7 : vector<32x1xf32>
    %9 = arith.mulf %5, %5 : vector<32x1xf32>
    %10 = arith.subf %8, %9 : vector<32x1xf32>
    %cst_5 = arith.constant 0.000000e+00 : f32
    %11 = vector.broadcast %cst_5 : f32 to vector<32x1xf32>
    %12 = arith.maximumf %10, %11 : vector<32x1xf32>
    %cst_6 = arith.constant 9.99999974E-6 : f32
    %13 = vector.broadcast %cst_6 : f32 to vector<32x1xf32>
    %14 = arith.addf %12, %13 : vector<32x1xf32>
    %15 = math.rsqrt %14 : vector<32x1xf32>
    %c0_7 = arith.constant 0 : index
    %c0_8 = arith.constant 0 : index
    %c0_9 = arith.constant 0 : index
    %16 = vector.load %arg2[%c0_7, %c0_8, %c0_9] : memref<1x32x768xbf16, #tpu.memory_space<vmem>>, vector<1x32x768xbf16>
    %17 = vector.shape_cast %16 : vector<1x32x768xbf16> to vector<32x768xbf16>
    %18 = arith.extf %17 : vector<32x768xbf16> to vector<32x768xf32>
    %19 = vector.broadcast %5 : vector<32x1xf32> to vector<32x768xf32>
    %20 = arith.subf %18, %19 : vector<32x768xf32>
    %21 = vector.broadcast %15 : vector<32x1xf32> to vector<32x768xf32>
    %22 = arith.mulf %20, %21 : vector<32x768xf32>
    %cst_10 = arith.constant 0.000000e+00 : f32
    %23 = vector.broadcast %cst_10 : f32 to vector<32x768xf32>
    %24 = arith.cmpf ogt, %22, %23 : vector<32x768xf32>
    %cst_11 = arith.constant 2.000000e-01 : f32
    %25 = vector.broadcast %cst_11 : f32 to vector<32x768xf32>
    %26 = arith.mulf %25, %22 : vector<32x768xf32>
    %27 = arith.select %24, %22, %26 : vector<32x768xi1>, vector<32x768xf32>
    %c0_12 = arith.constant 0 : index
    %c0_13 = arith.constant 0 : index
    %c0_14 = arith.constant 0 : index
    %28 = vector.load %arg4[%c0_12, %c0_13, %c0_14] : memref<1x32x768xf32, #tpu.memory_space<vmem>>, vector<1x32x768xf32>
    %29 = vector.shape_cast %28 : vector<1x32x768xf32> to vector<32x768xf32>
    %30 = vector.shape_cast %27 : vector<32x768xf32> to vector<1x32x768xf32>
    tpu.vector_store %arg4[%c0_12, %c0_13, %c0_14], %30 {strides = array<i32>} : memref<1x32x768xf32, #tpu.memory_space<vmem>>, vector<1x32x768xf32>,
    return
  }
  func.func @transform_0(%arg0: i32, %arg1: i32) -> (i32, i32, i32) {
    %c0_i32 = arith.constant 0 : i32
    %c0_i32_0 = arith.constant 0 : i32
    return %arg0, %c0_i32, %arg1 : i32, i32, i32
  }
  func.func @transform_1(%arg0: i32, %arg1: i32) -> (i32, i32, i32, i32) {
    %c0_i32 = arith.constant 0 : i32
    %c0_i32_0 = arith.constant 0 : i32
    %c0_i32_1 = arith.constant 0 : i32
    %c0_i32_2 = arith.constant 0 : i32
    return %arg0, %c0_i32, %c0_i32_0, %c0_i32_1 : i32, i32, i32, i32
  }
  func.func @transform_2(%arg0: i32, %arg1: i32) -> (i32, i32, i32) {
    %c0_i32 = arith.constant 0 : i32
    %c0_i32_0 = arith.constant 0 : i32
    return %arg0, %c0_i32, %arg1 : i32, i32, i32
  }
}

</mosaic_0001>

<bundles_post_ra>
// kernel: block_down_forward.3
= control target key start
LH: loop header
LB: loop body
LE: loop exit
PB: predicated region body
PF: predicated region fallthrough
CT: control target
= control target key end

     0   :  { %s726_s9 = smov 0   ;;  %s728_s10 = smov 0   ;;  %s831_s0 = inlined_call_operand.vmem [shape: bf16[2,32,768], index: 0, kind: input, shape index: {}]   ;;  %s832_s1 = inlined_call_operand.vmem [shape: f32[2,3,32,2], index: 1, kind: input, shape index: {}]   ;;  %s833_s2 = inlined_call_operand.vmem [shape: f32[2,32,768], index: 2, kind: output, shape index: {}]  }
   0x1   :  { %s730_s11 = smov 0  }
   0x2 LB: > { %s24_s12 = sadd.s32 1, %s702_s10  ;;  %p635_p0 = scmp.ge.s32.totalorder %s706_s11, 1  ;;  %s706_s11 = sphi %s730_s11, %s12_s11   ;;  %s702_s10 = sphi %s728_s10, %s835_s10   ;;  %s698_s9 = sphi %s726_s9, %s834_s9  }
   0x3   : > { %p26_p1 = scmp.ge.s32.totalorder %s24_s12, 2  ;;  %p143_p2 = scmp.lt.s32.totalorder %s706_s11, 3 }
   0x5   : > { %s837_s12 = smov (%p26_p1, %s24_s12), 0  ;;  %p144_p3 = pnand %p635_p0, %p143_p2 }
   0x6   : > { %p179_p4 = scmp.lt.s32.totalorder (!%p144_p3), %s698_s9, 1  ;;  %s708_s17 = smov (!%p144_p3), 1  }
   0x7   : > { %147 = sbr.rel (%p144_p3) target bundleno = 308 (0x134), region = 28 }
   0xc   : > { %s839_s9 = smov (!%p179_p4, %s698_s9), 1  ;;  %vm215_vm0 = vcmask 15360   ;;  %v709_v40 = vmov 0   ;;  %v710_v41 = vmov 1  }
   0xd   : > { %s641_s13 = smul.u32 96, %s839_s9  ;;  %671 = vset.pattern.permute.xlu0 %v709_v40  ;;  %670 = vset.pattern.permute.xlu2 %v709_v40 }
   0xe   : > { %672 = vset.pattern.permute.xlu1 %v709_v40  ;;  %s642_s21 = smul.u32 192, %s839_s9 }
   0xf   : > { %s192_s16 = scalar_lea.vmem %s832_s1, %s641_s13  ;;  %s769_s20 = scalar_lea.vmem %s831_s0, %s641_s13 }
  0x10   : > { %v205_v0 = vld [vmem:[%s192_s16 + $0x10] sm:$0xff]  ;;  %v203_v6 = vld [vmem:[%s192_s16] sm:$0xff]  ;;  %v206_v13 = vld [vmem:[%s192_s16 + $0x18] sm:$0xff]  ;;  %s783_s24 = scalar_lea.vmem %s833_s2, %s642_s21 }
  0x11   : > { %v209_v1 = vld [vmem:[%s192_s16 + $0x30] sm:$0xff]  ;;  %v226_v3 = vsel %vm215_vm0, %v205_v0, 0.0  ;;  %v207_v7 = vld [vmem:[%s192_s16 + $0x20] sm:$0xff]  ;;  %v216_v10 = vsel %vm215_vm0, %v203_v6, 0.0  ;;  %v210_v14 = vld [vmem:[%s192_s16 + $0x38] sm:$0xff]  ;;  %v231_v17 = vsel %vm215_vm0, %v206_v13, 0.0 }
  0x12   : > { %v213_v2 = vld [vmem:[%s192_s16 + $0x50] sm:$0xff]  ;;  %v227_v4 = vsel %vm215_vm0, %v209_v1, 0.0  ;;  %v211_v8 = vld [vmem:[%s192_s16 + $0x40] sm:$0xff]  ;;  %v217_v11 = vsel %vm215_vm0, %v207_v7, 0.0  ;;  %v214_v15 = vld [vmem:[%s192_s16 + $0x58] sm:$0xff]  ;;  %v232_v18 = vsel %vm215_vm0, %v210_v14, 0.0 }
  0x13   : > { %v229_v5 = vsel %vm215_vm0, %v213_v2, 0.0  ;;  %v228_v9 = vadd.f32 %v227_v4, %v226_v3  ;;  %v219_v12 = vsel %vm215_vm0, %v211_v8, 0.0  ;;  %v218_v16 = vadd.f32 %v217_v11, %v216_v10  ;;  %v204_v20 = vld [vmem:[%s192_s16 + $0x8] sm:$0xff] }
  0x14   : > { %v234_v19 = vsel %vm215_vm0, %v214_v15, 0.0  ;;  %v208_v21 = vld [vmem:[%s192_s16 + $0x28] sm:$0xff]  ;;  %v233_v24 = vadd.f32 %v232_v18, %v231_v17  ;;  %v221_v25 = vsel %vm215_vm0, %v204_v20, 0.0 }
  0x15   : > { %v212_v22 = vld [vmem:[%s192_s16 + $0x48] sm:$0xff]  ;;  %v230_v23 = vadd.f32 %v229_v5, %v228_v9  ;;  %v222_v26 = vsel %vm215_vm0, %v208_v21, 0.0  ;;  %v220_v27 = vadd.f32 %v219_v12, %v218_v16 }
  0x16   : > { %v223_v28 = vadd.f32 %v222_v26, %v221_v25  ;;  %v224_v29 = vsel %vm215_vm0, %v212_v22, 0.0  ;;  %v235_v31 = vadd.f32 %v234_v19, %v233_v24  ;;  %v313_v24 = vld [vmem:[%s769_s20 + $0x8] sm:$0xff]  ;;  %v314_v26 = vld [vmem:[%s769_s20 + $0x10] sm:$0xff] }
  0x17   : > { %v238_v30 = vmul.f32 0.001953125, %v230_v23  ;;  %v236_v32 = vmul.f32 0.001953125, %v220_v27  ;;  %v312_v23 = vld [vmem:[%s769_s20] sm:$0xff] }
  0x18   : > { %v225_v33 = vadd.f32 %v224_v29, %v223_v28  ;;  %v239_v36 = vmul.f32 0.001953125, %v235_v31  ;;  %v324_v27 = vunpack.c.l.bf16 %v312_v23  ;;  %v325_v28 = vunpack.c.h.bf16 %v312_v23  ;;  %v318_v31 = vld [vmem:[%s769_s20 + $0x30] sm:$0xff] }
  0x19   : > { %v242_v34 = vmul.f32 %v238_v30, %v238_v30  ;;  %v240_v35 = vmul.f32 %v236_v32, %v236_v32  ;;  %350 = vperm.xlu2 %670, %v236_v32   ;;  %v326_v29 = vunpack.c.l.bf16 %v313_v24 }
  0x1a   : > { %v237_v37 = vmul.f32 0.001953125, %v225_v33  ;;  %v243_v38 = vmul.f32 %v239_v36, %v239_v36  ;;  %v329_v33 = vunpack.c.h.bf16 %v314_v26 }
  0x1b   : > { %252 = vrot.lane.b32.xlu1 %v242_v34, %s708_s17  ;;  %248 = vrot.lane.b32.xlu0 %v240_v35, %s708_s17  ;;  %v319_v34 = vld [vmem:[%s769_s20 + $0x38] sm:$0xff]  ;;  %v336_v35 = vunpack.c.l.bf16 %v318_v31 }
  0x1c   : > { %v241_v39 = vmul.f32 %v237_v37, %v237_v37 }
  0x21   : > { %355 = vperm.xlu2 %670, %v237_v37  }
  0x23   : > { %254 = vrot.lane.b32.xlu1 %v243_v38, %s708_s17  ;;  %250 = vrot.lane.b32.xlu0 %v241_v39, %s708_s17 }
  0x29   : > { %673 = vset.pattern.permute.xlu2 %v710_v41 }
  0x2b   : > { %360 = vperm.xlu0 %671, %v238_v30   ;;  %365 = vperm.xlu1 %672, %v239_v36  }
  0x33   : > { %674 = vset.pattern.permute.xlu1 %v710_v41  ;;  %675 = vset.pattern.permute.xlu0 %v710_v41 }
  0x73   : > { %v351_v22 = vpop.permute.xlu2 %350 }
  0x74   : > { %v369_v38 = vsub.f32 %v325_v28, %v351_v22  ;;  %v370_v39 = vsub.f32 %v326_v29, %v351_v22 }
  0x7b   : > { %v773_v25 = vpop.permute.xlu2 %355 }
  0x8d   : > { %v253_v42 = vpop.permute.xlu1 %252  ;;  %v249_v44 = vpop.permute.xlu0 %248 }
  0x8e   : > { %v262_v43 = vsub.f32 %v238_v30, %v253_v42  ;;  %v260_v45 = vsub.f32 %v236_v32, %v249_v44  ;;  %v327_v30 = vunpack.c.h.bf16 %v313_v24  ;;  %v328_v32 = vunpack.c.l.bf16 %v314_v26  ;;  %v320_v42 = vld [vmem:[%s769_s20 + $0x40] sm:$0xff] }
  0x8f   : > { %v373_v44 = vsub.f32 %v329_v33, %v351_v22  ;;  %v321_v33 = vld [vmem:[%s769_s20 + $0x48] sm:$0xff] }
  0x90   : > { %v266_v46 = vmax.f32 %v262_v43, 0.0  ;;  %v264_v47 = vmax.f32 %v260_v45, 0.0  ;;  %v371_v40 = vsub.f32 %v327_v30, %v351_v22  ;;  %v372_v43 = vsub.f32 %v328_v32, %v351_v22  ;;  %v316_v32 = vld [vmem:[%s769_s20 + $0x20] sm:$0xff] }
  0x91   : > { %v338_v45 = vunpack.c.l.bf16 %v319_v34 }
  0x92   : > { %v270_v48 = vadd.f32 1e-05, %v266_v46  ;;  %v268_v49 = vadd.f32 1e-05, %v264_v47  ;;  %v339_v46 = vunpack.c.h.bf16 %v319_v34  ;;  %v317_v34 = vld [vmem:[%s769_s20 + $0x28] sm:$0xff] }
  0x94   : > { %676 = vrsqrt.f32 %v270_v48  ;;  %vm278_vm2 = vweird.f32 %v268_v49  ;;  %vm298_vm6 = vweird.f32 %v270_v48 }
  0x95   : > { %678 = vrsqrt.f32 %v268_v49  ;;  %v255_v50 = vpop.permute.xlu1 %254  ;;  %v251_v52 = vpop.permute.xlu0 %250 }
  0x96   : > { %v263_v51 = vsub.f32 %v239_v36, %v255_v50  ;;  %v261_v53 = vsub.f32 %v237_v37, %v251_v52  ;;  %v337_v36 = vunpack.c.h.bf16 %v318_v31  ;;  %v368_v37 = vsub.f32 %v324_v27, %v351_v22  ;;  %v315_v31 = vld [vmem:[%s769_s20 + $0x18] sm:$0xff] }
  0x98   : > { %v267_v54 = vmax.f32 %v263_v51, 0.0  ;;  %v265_v55 = vmax.f32 %v261_v53, 0.0 }
  0x9a   : > { %v677_v56 = vpop.eup %676  ;;  %v271_v57 = vadd.f32 1e-05, %v267_v54  ;;  %v269_v60 = vadd.f32 1e-05, %v265_v55 }
  0x9b   : > { %v679_v58 = vpop.eup %678  ;;  %v293_v59 = vmul.f32 %v677_v56, %v270_v48  ;;  %vm299_vm4 = vweird.f32 %v677_v56  ;;  %v340_v48 = vunpack.c.l.bf16 %v320_v42 }
  0x9c   : > { %v273_v61 = vmul.f32 %v679_v58, %v268_v49  ;;  %680 = vrsqrt.f32 %v271_v57  ;;  %vm279_vm1 = vweird.f32 %v679_v58  ;;  %vm308_vm8 = vweird.f32 %v271_v57  ;;  %vm300_vm9 = vmor %vm298_vm6, %vm299_vm4 }
  0x9d   : > { %682 = vrsqrt.f32 %v269_v60  ;;  %v294_v62 = vmul.f32 %v677_v56, %v293_v59  ;;  %vm280_vm3 = vmor %vm278_vm2, %vm279_vm1  ;;  %vm288_vm11 = vweird.f32 %v269_v60  ;;  %v361_v41 = vpop.permute.xlu0 %360  ;;  %v341_v49 = vunpack.c.h.bf16 %v320_v42  ;;  %v366_v30 = vpop.permute.xlu1 %365 }
  0x9e   : > { %v274_v63 = vmul.f32 %v679_v58, %v273_v61  ;;  %v380_v50 = vsub.f32 %v336_v35, %v361_v41  ;;  %v381_v51 = vsub.f32 %v337_v36, %v361_v41  ;;  %v383_v59 = vsub.f32 %v339_v46, %v361_v41  ;;  %v322_v35 = vld [vmem:[%s769_s20 + $0x50] sm:$0xff] }
  0x9f   : > { %v295_v2 = vmul.f32 0.5, %v294_v62  ;;  %v330_v36 = vunpack.c.l.bf16 %v315_v31  ;;  %v334_v42 = vunpack.c.l.bf16 %v317_v34  ;;  %v345_v46 = vunpack.c.h.bf16 %v322_v35 }
  0xa0   : > { %v275_v0 = vmul.f32 0.5, %v274_v63 }
  0xa1   : > { %v296_v11 = vsub.f32 1.5, %v295_v2 }
  0xa2   : > { %v681_v1 = vpop.eup %680  ;;  %v276_v3 = vsub.f32 1.5, %v275_v0 }
  0xa3   : > { %v683_v4 = vpop.eup %682  ;;  %v303_v5 = vmul.f32 %v681_v1, %v271_v57  ;;  %vm309_vm5 = vweird.f32 %v681_v1  ;;  %v297_v15 = vmul.f32 %v677_v56, %v296_v11 }
  0xa4   : > { %v283_v6 = vmul.f32 %v683_v4, %v269_v60  ;;  %v277_v7 = vmul.f32 %v679_v58, %v276_v3  ;;  %vm289_vm7 = vweird.f32 %v683_v4  ;;  %vm310_vm10 = vmor %vm308_vm8, %vm309_vm5 }
  0xa5   : > { %v304_v8 = vmul.f32 %v681_v1, %v303_v5  ;;  %vm290_vm12 = vmor %vm288_vm11, %vm289_vm7  ;;  %v301_v20 = vsel %vm300_vm9, %v677_v56, %v297_v15  ;;  %v385_v5 = vsub.f32 %v341_v49, %v361_v41  ;;  %v374_v49 = vsub.f32 %v330_v36, %v773_v25 }
  0xa6   : > { %v284_v9 = vmul.f32 %v683_v4, %v283_v6  ;;  %v281_v10 = vsel %vm280_vm3, %v679_v58, %v277_v7  ;;  %v382_v58 = vsub.f32 %v338_v45, %v361_v41  ;;  %v344_v45 = vunpack.c.l.bf16 %v322_v35 }
  0xa7   : > { %v305_v12 = vmul.f32 0.5, %v304_v8  ;;  %394 = vperm.xlu2 %673, %v281_v10  }
  0xa8   : > { %v285_v13 = vmul.f32 0.5, %v284_v9 }
  0xa9   : > { %v306_v14 = vsub.f32 1.5, %v305_v12 }
  0xaa   : > { %v286_v16 = vsub.f32 1.5, %v285_v13 }
  0xab   : > { %v307_v17 = vmul.f32 %v681_v1, %v306_v14 }
  0xac   : > { %v287_v18 = vmul.f32 %v683_v4, %v286_v16 }
  0xad   : > { %v311_v19 = vsel %vm310_vm10, %v681_v1, %v307_v17  ;;  %v384_v1 = vsub.f32 %v340_v48, %v361_v41  ;;  %v342_v41 = vunpack.c.l.bf16 %v321_v33 }
  0xae   : > { %409 = vperm.xlu0 %675, %v311_v19   ;;  %v291_v21 = vsel %vm290_vm12, %v683_v4, %v287_v18 }
  0xaf   : > { %404 = vperm.xlu2 %673, %v301_v20   ;;  %399 = vperm.xlu1 %674, %v291_v21  }
 0x101   : > { %v395_v47 = vpop.permute.xlu2 %394 }
 0x102   : > { %v412_v52 = vmul.f32 %v395_v47, %v368_v37  ;;  %v413_v53 = vmul.f32 %v395_v47, %v369_v38  ;;  %v414_v54 = vmul.f32 %v395_v47, %v370_v39  ;;  %v415_v55 = vmul.f32 %v395_v47, %v371_v40  ;;  %v323_v37 = vld [vmem:[%s769_s20 + $0x58] sm:$0xff] }
 0x103   : > { %v416_v56 = vmul.f32 %v395_v47, %v372_v43  ;;  %v417_v57 = vmul.f32 %v395_v47, %v373_v44  ;;  %v331_v38 = vunpack.c.h.bf16 %v315_v31  ;;  %v332_v39 = vunpack.c.l.bf16 %v316_v32 }
 0x104   : > { %vm436_vm13 = vcmp.gt.f32.partialorder %v412_v52, 0.0  ;;  %vm437_vm14 = vcmp.gt.f32.partialorder %v413_v53, 0.0  ;;  %vm438_vm15 = vcmp.gt.f32.partialorder %v414_v54, 0.0  ;;  %vm439_vm0 = vcmp.gt.f32.partialorder %v415_v55, 0.0 }
 0x105   : > { %vm440_vm1 = vcmp.gt.f32.partialorder %v416_v56, 0.0  ;;  %vm441_vm2 = vcmp.gt.f32.partialorder %v417_v57, 0.0  ;;  %v460_v60 = vmul.f32 0.2, %v412_v52  ;;  %v461_v61 = vmul.f32 0.2, %v413_v53 }
 0x106   : > { %v462_v62 = vmul.f32 0.2, %v414_v54  ;;  %v463_v63 = vmul.f32 0.2, %v415_v55  ;;  %v464_v0 = vmul.f32 0.2, %v416_v56  ;;  %v333_v40 = vunpack.c.h.bf16 %v316_v32 }
 0x107   : > { %v465_v2 = vmul.f32 0.2, %v417_v57  ;;  %v484_v3 = vsel %vm436_vm13, %v412_v52, %v460_v60  ;;  %v485_v4 = vsel %vm437_vm14, %v413_v53, %v461_v61  ;;  %v335_v43 = vunpack.c.h.bf16 %v317_v34 }
 0x108   : > { %v486_v6 = vsel %vm438_vm15, %v414_v54, %v462_v62  ;;  %v487_v7 = vsel %vm439_vm0, %v415_v55, %v463_v63  ;;  %508 = vst [vmem:[%s783_s24] sm:$0xff] %v484_v3  ;;  %v488_v8 = vsel %vm440_vm1, %v416_v56, %v464_v0  ;;  %v343_v44 = vunpack.c.h.bf16 %v321_v33 }
 0x109   : > { %v489_v9 = vsel %vm441_vm2, %v417_v57, %v465_v2  ;;  %509 = vst [vmem:[%s783_s24 + $0x8] sm:$0xff] %v485_v4  ;;  %v405_v10 = vpop.permute.xlu2 %404  ;;  %v346_v47 = vunpack.c.l.bf16 %v323_v37  ;;  %v347_v48 = vunpack.c.h.bf16 %v323_v37  ;;  %v377_v52 = vsub.f32 %v333_v40, %v773_v25 }
 0x10a   : > { %510 = vst [vmem:[%s783_s24 + $0x10] sm:$0xff] %v486_v6  ;;  %v424_v11 = vmul.f32 %v405_v10, %v380_v50  ;;  %v425_v12 = vmul.f32 %v405_v10, %v381_v51  ;;  %v426_v13 = vmul.f32 %v405_v10, %v382_v58  ;;  %v427_v14 = vmul.f32 %v405_v10, %v383_v59 }
 0x10b   : > { %511 = vst [vmem:[%s783_s24 + $0x18] sm:$0xff] %v487_v7  ;;  %v428_v15 = vmul.f32 %v405_v10, %v384_v1  ;;  %v429_v16 = vmul.f32 %v405_v10, %v385_v5  ;;  %v375_v50 = vsub.f32 %v331_v38, %v773_v25  ;;  %v376_v51 = vsub.f32 %v332_v39, %v773_v25 }
 0x10c   : > { %512 = vst [vmem:[%s783_s24 + $0x20] sm:$0xff] %v488_v8  ;;  %vm448_vm3 = vcmp.gt.f32.partialorder %v424_v11, 0.0  ;;  %vm449_vm4 = vcmp.gt.f32.partialorder %v425_v12, 0.0  ;;  %vm450_vm5 = vcmp.gt.f32.partialorder %v426_v13, 0.0  ;;  %vm451_vm6 = vcmp.gt.f32.partialorder %v427_v14, 0.0 }
 0x10d   : > { %513 = vst [vmem:[%s783_s24 + $0x28] sm:$0xff] %v489_v9  ;;  %vm452_vm7 = vcmp.gt.f32.partialorder %v428_v15, 0.0  ;;  %v472_v17 = vmul.f32 0.2, %v424_v11  ;;  %v473_v18 = vmul.f32 0.2, %v425_v12  ;;  %v386_v53 = vsub.f32 %v342_v41, %v366_v30 }
 0x10e   : > { %v474_v19 = vmul.f32 0.2, %v426_v13  ;;  %v475_v20 = vmul.f32 0.2, %v427_v14  ;;  %vm453_vm8 = vcmp.gt.f32.partialorder %v429_v16, 0.0  ;;  %v378_v54 = vsub.f32 %v334_v42, %v773_v25 }
 0x10f   : > { %v476_v21 = vmul.f32 0.2, %v428_v15  ;;  %v477_v22 = vmul.f32 0.2, %v429_v16  ;;  %v496_v23 = vsel %vm448_vm3, %v424_v11, %v472_v17  ;;  %v497_v24 = vsel %vm449_vm4, %v425_v12, %v473_v18 }
 0x110   : > { %v498_v26 = vsel %vm450_vm5, %v426_v13, %v474_v19  ;;  %v499_v27 = vsel %vm451_vm6, %v427_v14, %v475_v20  ;;  %520 = vst [vmem:[%s783_s24 + $0x60] sm:$0xff] %v496_v23  ;;  %v379_v55 = vsub.f32 %v335_v43, %v773_v25  ;;  %v387_v57 = vsub.f32 %v343_v44, %v366_v30 }
 0x111   : > { %v500_v28 = vsel %vm452_vm7, %v428_v15, %v476_v21  ;;  %521 = vst [vmem:[%s783_s24 + $0x68] sm:$0xff] %v497_v24  ;;  %v501_v29 = vsel %vm453_vm8, %v429_v16, %v477_v22  ;;  %v388_v58 = vsub.f32 %v344_v45, %v366_v30  ;;  %v389_v60 = vsub.f32 %v345_v46, %v366_v30 }
 0x112   : > { %522 = vst [vmem:[%s783_s24 + $0x70] sm:$0xff] %v498_v26  ;;  %v390_v61 = vsub.f32 %v346_v47, %v366_v30  ;;  %v391_v62 = vsub.f32 %v347_v48, %v366_v30 }
 0x113   : > { %523 = vst [vmem:[%s783_s24 + $0x78] sm:$0xff] %v499_v27 }
 0x114   : > { %524 = vst [vmem:[%s783_s24 + $0x80] sm:$0xff] %v500_v28 }
 0x115   : > { %525 = vst [vmem:[%s783_s24 + $0x88] sm:$0xff] %v501_v29 }
 0x120   : > { %v410_v56 = vpop.permute.xlu0 %409 }
 0x121   : > { %v400_v59 = vpop.permute.xlu1 %399  ;;  %v430_v63 = vmul.f32 %v410_v56, %v386_v53  ;;  %v431_v6 = vmul.f32 %v410_v56, %v387_v57  ;;  %v432_v7 = vmul.f32 %v410_v56, %v388_v58  ;;  %v433_v25 = vmul.f32 %v410_v56, %v389_v60 }
 0x122   : > { %v418_v0 = vmul.f32 %v400_v59, %v374_v49  ;;  %v419_v1 = vmul.f32 %v400_v59, %v375_v50  ;;  %v420_v2 = vmul.f32 %v400_v59, %v376_v51  ;;  %v421_v3 = vmul.f32 %v400_v59, %v377_v52 }
 0x123   : > { %v422_v4 = vmul.f32 %v400_v59, %v378_v54  ;;  %v423_v5 = vmul.f32 %v400_v59, %v379_v55  ;;  %v434_v13 = vmul.f32 %v410_v56, %v390_v61  ;;  %v435_v19 = vmul.f32 %v410_v56, %v391_v62 }
 0x124   : > { %vm442_vm9 = vcmp.gt.f32.partialorder %v418_v0, 0.0  ;;  %vm443_vm10 = vcmp.gt.f32.partialorder %v419_v1, 0.0  ;;  %vm444_vm11 = vcmp.gt.f32.partialorder %v420_v2, 0.0  ;;  %vm445_vm12 = vcmp.gt.f32.partialorder %v421_v3, 0.0 }
 0x125   : > { %vm446_vm13 = vcmp.gt.f32.partialorder %v422_v4, 0.0  ;;  %v466_v8 = vmul.f32 0.2, %v418_v0  ;;  %v467_v9 = vmul.f32 0.2, %v419_v1  ;;  %vm447_vm14 = vcmp.gt.f32.partialorder %v423_v5, 0.0 }
 0x126   : > { %v468_v10 = vmul.f32 0.2, %v420_v2  ;;  %v469_v11 = vmul.f32 0.2, %v421_v3  ;;  %v470_v12 = vmul.f32 0.2, %v422_v4 }
 0x127   : > { %v471_v14 = vmul.f32 0.2, %v423_v5  ;;  %v490_v15 = vsel %vm442_vm9, %v418_v0, %v466_v8  ;;  %v491_v16 = vsel %vm443_vm10, %v419_v1, %v467_v9  ;;  %vm454_vm15 = vcmp.gt.f32.partialorder %v430_v63, 0.0 }
 0x128   : > { %v492_v17 = vsel %vm444_vm11, %v420_v2, %v468_v10  ;;  %v493_v18 = vsel %vm445_vm12, %v421_v3, %v469_v11  ;;  %514 = vst [vmem:[%s783_s24 + $0x30] sm:$0xff] %v490_v15  ;;  %v494_v20 = vsel %vm446_vm13, %v422_v4, %v470_v12  ;;  %vm455_vm0 = vcmp.gt.f32.partialorder %v431_v6, 0.0 }
 0x129   : > { %515 = vst [vmem:[%s783_s24 + $0x38] sm:$0xff] %v491_v16  ;;  %vm456_vm1 = vcmp.gt.f32.partialorder %v432_v7, 0.0  ;;  %v495_v21 = vsel %vm447_vm14, %v423_v5, %v471_v14  ;;  %vm457_vm2 = vcmp.gt.f32.partialorder %v433_v25, 0.0  ;;  %v478_v22 = vmul.f32 0.2, %v430_v63 }
 0x12a   : > { %516 = vst [vmem:[%s783_s24 + $0x40] sm:$0xff] %v492_v17  ;;  %v479_v23 = vmul.f32 0.2, %v431_v6  ;;  %vm458_vm3 = vcmp.gt.f32.partialorder %v434_v13, 0.0  ;;  %v480_v24 = vmul.f32 0.2, %v432_v7 }
 0x12b   : > { %517 = vst [vmem:[%s783_s24 + $0x48] sm:$0xff] %v493_v18  ;;  %v481_v26 = vmul.f32 0.2, %v433_v25  ;;  %v482_v27 = vmul.f32 0.2, %v434_v13  ;;  %v502_v29 = vsel %vm454_vm15, %v430_v63, %v478_v22  ;;  %vm459_vm4 = vcmp.gt.f32.partialorder %v435_v19, 0.0 }
 0x12c   : > { %518 = vst [vmem:[%s783_s24 + $0x50] sm:$0xff] %v494_v20  ;;  %v483_v28 = vmul.f32 0.2, %v435_v19  ;;  %v503_v30 = vsel %vm455_vm0, %v431_v6, %v479_v23  ;;  %v504_v31 = vsel %vm456_vm1, %v432_v7, %v480_v24 }
 0x12d   : > { %519 = vst [vmem:[%s783_s24 + $0x58] sm:$0xff] %v495_v21  ;;  %v505_v32 = vsel %vm457_vm2, %v433_v25, %v481_v26  ;;  %v506_v33 = vsel %vm458_vm3, %v434_v13, %v482_v27 }
 0x12e   : > { %526 = vst [vmem:[%s783_s24 + $0x90] sm:$0xff] %v502_v29  ;;  %v507_v34 = vsel %vm459_vm4, %v435_v19, %v483_v28 }
 0x12f   : > { %527 = vst [vmem:[%s783_s24 + $0x98] sm:$0xff] %v503_v30 }
 0x130   : > { %528 = vst [vmem:[%s783_s24 + $0xa0] sm:$0xff] %v504_v31 }
 0x131   : > { %529 = vst [vmem:[%s783_s24 + $0xa8] sm:$0xff] %v505_v32 }
 0x132   : > { %530 = vst [vmem:[%s783_s24 + $0xb0] sm:$0xff] %v506_v33 }
 0x133   : > { %531 = vst [vmem:[%s783_s24 + $0xb8] sm:$0xff] %v507_v34 }
 0x134 PF: > { %s12_s11 = sadd.s32 1, %s706_s11   ;;  %s834_s9 = smov %s702_s10 }
 0x135   : > { %p9_p5 = scmp.ge.s32.totalorder %s12_s11, 4   ;;  %s835_s10 = smov %s837_s12 }
 0x137   :  { %11 = sbr.rel (!%p9_p5) target bundleno = 2 (0x2), region = 61 }

// kernel: block_down_forward.2
= control target key start
LH: loop header
LB: loop body
LE: loop exit
PB: predicated region body
PF: predicated region fallthrough
CT: control target
= control target key end

     0   :  { %s5909_s0 = inlined_call_operand.vmem [shape: bf16[2,8,16,1024], index: 0, kind: input, shape index: {}, may-alias: {0,1}]   ;;  %s5910_s1 = inlined_call_operand.vmem [shape: bf16[2,8,16,1024], index: 1, kind: input, shape index: {}, may-alias: {0,1}]   ;;  %s5911_s2 = inlined_call_operand.vmem [shape: bf16[8,32,128], index: 2, kind: input, shape index: {}]   ;;  %s5912_s3 = inlined_call_operand.vmem [shape: f32[1,768], index: 3, kind: input, shape index: {}]   ;;  %s5913_s4 = inlined_call_operand.vmem [shape: bf16[2,32,768], index: 4, kind: output, shape index: {0}]   ;;  %s5914_s5 = inlined_call_operand.vmem [shape: f32[2,3,32,2], index: 5, kind: output, shape index: {1}]  }
   0x1   :  { %5917 = sst [smem:[#allocation9_spill]] %s5913_s4 }
   0x2   :  { %s4575_s18 = smov 0   ;;  %s4577_s19 = smov 0  }
   0x3   :  { %s4579_s20 = smov 0   ;;  %s4581_s21 = smov 0  }
   0x4   :  { %s4583_s22 = smov 0   ;;  %s4585_s23 = smov 0  }
   0x5   :  { %s4587_s24 = smov 0   ;;  %s4589_s25 = smov 0  }
   0x6   :  { %s4591_s26 = smov 0  }
   0x7 LB: > { %5918 = sst [smem:[#allocation7_spill]] %s4528_s24  ;;  %s3524_s27 = sadd.s32 4294967295, %s4536_s26   ;;  %s4536_s26 = sphi %s4591_s26, %s16_s26   ;;  %s4532_s25 = sphi %s4589_s25, %s5932_s25   ;;  %s4528_s24 = sphi %s4587_s24, %s5931_s24   ;;  %s4524_s23 = sphi %s4585_s23, %s5930_s23   ;;  %s4520_s22 = sphi %s4583_s22, %s5924_s22   ;;  %s4516_s21 = sphi %s4581_s21, %s5929_s21   ;;  %s4512_s20 = sphi %s4579_s20, %s5928_s20   ;;  %s4508_s19 = sphi %s4577_s19, %s5927_s19   ;;  %s4504_s18 = sphi %s4575_s18, %s5926_s18  }
   0x8   : > { %s25_s28 = sadd.s32 1, %s4528_s24  ;;  %s28_s29 = sadd.s32 1, %s4532_s25 }
   0x9   : > { %p26_p0 = scmp.ge.s32.totalorder %s25_s28, 3  ;;  %s37_s30 = sadd.s32 1, %s4516_s21 }
   0xa   : > { %p44_p1 = scmp.ne.s32.totalorder %s4516_s21, %s4512_s20  ;;  %p45_p2 = scmp.eq.s32.totalorder %s4536_s26, 0 }
   0xb   : > { %s5934_s28 = smov (%p26_p0, %s25_s28), 0  ;;  %s5936_s29 = smov (!%p26_p0, %s28_s29), %s4532_s25 }
   0xc   : > { %s33_s6 = ssub.s32 %s4528_s24, %s5934_s28  ;;  %p30_p3 = scmp.ge.s32.totalorder %s5936_s29, 2 }
   0xd   : > { %s4633_s7 = sshll.u32 %s4528_s24, 1  ;;  %p4640_p4 = por %p45_p2, %p44_p1 }
   0xe   : > { %s4199_s9 = sadd.s32 2, %s4633_s7  ;;  %s5938_s29 = smov (%p30_p3, %s5936_s29), 0 }
   0xf   : > { %5920 = sst [smem:[#allocation8_spill]] %s5938_s29  ;;  %s4200_s10 = sshll.u32 %s5934_s28, 1 }
  0x10   : > { %s69_s11 = sadd.s32 1, %s4508_s19  ;;  %s32_s12 = ssub.s32 %s4532_s25, %s5938_s29 }
  0x11   : > { %s4201_s13 = sadd.s32 2, %s4200_s10  ;;  %s34_s14 = sor.u32 %s33_s6, %s32_s12 }
  0x12   : > { %s65_s15 = ssub.s32 %s4199_s9, %s4201_s13  ;;  %p35_p5 = scmp.eq.s32.totalorder %s34_s14, 0 }
  0x13   : > { %s66_s16 = sor.u32 %s65_s15, %s32_s12  ;;  %p76_p7 = scmp.ne.s32.totalorder %s4508_s19, %s4504_s18 }
  0x14   : > { %p67_p6 = scmp.eq.s32.totalorder %s66_s16, 0  ;;  %p155_p9 = scmp.eq.s32.totalorder %s3524_s27, 5 }
  0x15   : > { %s4654_s17 = scalar_select %p35_p5, %s4516_s21, %s37_s30  }
  0x16   : > { %s4657_s24 = scalar_select %p67_p6, %s4508_s19, %s69_s11  }
  0x17   : > { %p4661_p8 = por %p76_p7, %p45_p2  ;;  %p4668_p10 = por %p155_p9, %p44_p1 }
  0x18   : > { %p3529_p11 = scmp.ge.s32.totalorder %s4536_s26, 6 }
  0x1a   : > { %208 = sbr.rel (%p3529_p11) target bundleno = 75 (0x4b), region = 20 }
  0x1f   : > { %211 = sbr.rel (!%p4640_p4) target bundleno = 53 (0x35), region = 24  ;;  %s213_s30 = sand.u32 (%p4640_p4), 1, %s4516_s21  }
  0x20   : > { %s3532_s6 = sshll.u32 (%p4640_p4), %s4532_s25, 7  ;;  %s3530_s9 = sshll.u32 (%p4640_p4), %s213_s30, 7 }
  0x21   : > { %s218_s10 = sadd.s32 (%p4640_p4), %s4633_s7, %s3532_s6  ;;  %s215_s8 = scalar_lea.vmem (%p4640_p4), [#allocation4], %s3530_s9 }
  0x22   : > { %s3533_s11 = sshll.u32 (%p4640_p4), %s218_s10, 2 }
  0x23   : > { %s4681_s13 = scalar_lea.vmem (%p4640_p4), %s5909_s0, %s3533_s11 }
  0x24   : > { %v279_v0 = vld [vmem:[%s4681_s13] sm:$0xff] }
  0x25   : > { %v281_v1 = vld [vmem:[%s4681_s13 + $0x20] sm:$0xff]  ;;  %280 = vst [vmem:[%s215_s8] sm:$0xff] %v279_v0 }
  0x26   : > { %v283_v2 = vld [vmem:[%s4681_s13 + $0x40] sm:$0xff]  ;;  %282 = vst [vmem:[%s215_s8 + $0x8] sm:$0xff] %v281_v1 }
  0x27   : > { %v285_v3 = vld [vmem:[%s4681_s13 + $0x60] sm:$0xff]  ;;  %284 = vst [vmem:[%s215_s8 + $0x10] sm:$0xff] %v283_v2 }
  0x28   : > { %v287_v4 = vld [vmem:[%s4681_s13 + $0x80] sm:$0xff]  ;;  %286 = vst [vmem:[%s215_s8 + $0x18] sm:$0xff] %v285_v3 }
  0x29   : > { %v289_v5 = vld [vmem:[%s4681_s13 + $0xa0] sm:$0xff]  ;;  %288 = vst [vmem:[%s215_s8 + $0x20] sm:$0xff] %v287_v4 }
  0x2a   : > { %v291_v6 = vld [vmem:[%s4681_s13 + $0xc0] sm:$0xff]  ;;  %290 = vst [vmem:[%s215_s8 + $0x28] sm:$0xff] %v289_v5 }
  0x2b   : > { %v293_v7 = vld [vmem:[%s4681_s13 + $0xe0] sm:$0xff]  ;;  %292 = vst [vmem:[%s215_s8 + $0x30] sm:$0xff] %v291_v6 }
  0x2c   : > { %v295_v8 = vld [vmem:[%s4681_s13 + $0x100] sm:$0xff]  ;;  %294 = vst [vmem:[%s215_s8 + $0x38] sm:$0xff] %v293_v7 }
  0x2d   : > { %v297_v9 = vld [vmem:[%s4681_s13 + $0x120] sm:$0xff]  ;;  %296 = vst [vmem:[%s215_s8 + $0x40] sm:$0xff] %v295_v8 }
  0x2e   : > { %v299_v10 = vld [vmem:[%s4681_s13 + $0x140] sm:$0xff]  ;;  %298 = vst [vmem:[%s215_s8 + $0x48] sm:$0xff] %v297_v9 }
  0x2f   : > { %v301_v11 = vld [vmem:[%s4681_s13 + $0x160] sm:$0xff]  ;;  %300 = vst [vmem:[%s215_s8 + $0x50] sm:$0xff] %v299_v10 }
  0x30   : > { %v303_v12 = vld [vmem:[%s4681_s13 + $0x180] sm:$0xff]  ;;  %302 = vst [vmem:[%s215_s8 + $0x58] sm:$0xff] %v301_v11 }
  0x31   : > { %v305_v13 = vld [vmem:[%s4681_s13 + $0x1a0] sm:$0xff]  ;;  %304 = vst [vmem:[%s215_s8 + $0x60] sm:$0xff] %v303_v12 }
  0x32   : > { %v307_v14 = vld [vmem:[%s4681_s13 + $0x1c0] sm:$0xff]  ;;  %306 = vst [vmem:[%s215_s8 + $0x68] sm:$0xff] %v305_v13 }
  0x33   : > { %v309_v15 = vld [vmem:[%s4681_s13 + $0x1e0] sm:$0xff]  ;;  %308 = vst [vmem:[%s215_s8 + $0x70] sm:$0xff] %v307_v14 }
  0x34   : > { %310 = vst [vmem:[%s215_s8 + $0x78] sm:$0xff] %v309_v15 }
  0x35 PF: > { %316 = sbr.rel (!%p4661_p8) target bundleno = 75 (0x4b), region = 62  ;;  %s318_s14 = sand.u32 (%p4661_p8), 1, %s4508_s19  }
  0x36   : > { %s3536_s15 = sshll.u32 (%p4661_p8), %s4532_s25, 7  ;;  %s3534_s16 = sshll.u32 (%p4661_p8), %s318_s14, 6 }
  0x37   : > { %s3413_s30 = sadd.s32 (%p4661_p8), %s4633_s7, %s3536_s15  ;;  %s320_s4 = scalar_lea.vmem (%p4661_p8), [#allocation5], %s3534_s16 }
  0x38   : > { %s3537_s6 = sshll.u32 (%p4661_p8), %s3413_s30, 2 }
  0x39   : > { %s4707_s11 = scalar_lea.vmem (%p4661_p8), %s5910_s1, %s3537_s6 }
  0x3a   : > { %v3538_v16 = vld [vmem:[%s4707_s11 + $0x8] sm:$0xf] }
  0x3b   : > { %v3539_v17 = vld [vmem:[%s4707_s11 + $0x28] sm:$0xf]  ;;  %344 = vst [vmem:[%s320_s4] sm:$0xf] %v3538_v16 }
  0x3c   : > { %v3540_v18 = vld [vmem:[%s4707_s11 + $0x48] sm:$0xf]  ;;  %346 = vst [vmem:[%s320_s4 + $0x4] sm:$0xf] %v3539_v17 }
  0x3d   : > { %v3541_v19 = vld [vmem:[%s4707_s11 + $0x68] sm:$0xf]  ;;  %348 = vst [vmem:[%s320_s4 + $0x8] sm:$0xf] %v3540_v18 }
  0x3e   : > { %v3542_v20 = vld [vmem:[%s4707_s11 + $0x88] sm:$0xf]  ;;  %350 = vst [vmem:[%s320_s4 + $0xc] sm:$0xf] %v3541_v19 }
  0x3f   : > { %v3543_v21 = vld [vmem:[%s4707_s11 + $0xa8] sm:$0xf]  ;;  %352 = vst [vmem:[%s320_s4 + $0x10] sm:$0xf] %v3542_v20 }
  0x40   : > { %v3544_v22 = vld [vmem:[%s4707_s11 + $0xc8] sm:$0xf]  ;;  %354 = vst [vmem:[%s320_s4 + $0x14] sm:$0xf] %v3543_v21 }
  0x41   : > { %v3545_v23 = vld [vmem:[%s4707_s11 + $0xe8] sm:$0xf]  ;;  %356 = vst [vmem:[%s320_s4 + $0x18] sm:$0xf] %v3544_v22 }
  0x42   : > { %v3546_v24 = vld [vmem:[%s4707_s11 + $0x108] sm:$0xf]  ;;  %358 = vst [vmem:[%s320_s4 + $0x1c] sm:$0xf] %v3545_v23 }
  0x43   : > { %v3547_v25 = vld [vmem:[%s4707_s11 + $0x128] sm:$0xf]  ;;  %360 = vst [vmem:[%s320_s4 + $0x20] sm:$0xf] %v3546_v24 }
  0x44   : > { %v3548_v26 = vld [vmem:[%s4707_s11 + $0x148] sm:$0xf]  ;;  %362 = vst [vmem:[%s320_s4 + $0x24] sm:$0xf] %v3547_v25 }
  0x45   : > { %v3549_v27 = vld [vmem:[%s4707_s11 + $0x168] sm:$0xf]  ;;  %364 = vst [vmem:[%s320_s4 + $0x28] sm:$0xf] %v3548_v26 }
  0x46   : > { %v3550_v28 = vld [vmem:[%s4707_s11 + $0x188] sm:$0xf]  ;;  %366 = vst [vmem:[%s320_s4 + $0x2c] sm:$0xf] %v3549_v27 }
  0x47   : > { %v3551_v29 = vld [vmem:[%s4707_s11 + $0x1a8] sm:$0xf]  ;;  %368 = vst [vmem:[%s320_s4 + $0x30] sm:$0xf] %v3550_v28 }
  0x48   : > { %v3552_v30 = vld [vmem:[%s4707_s11 + $0x1c8] sm:$0xf]  ;;  %370 = vst [vmem:[%s320_s4 + $0x34] sm:$0xf] %v3551_v29 }
  0x49   : > { %v3553_v31 = vld [vmem:[%s4707_s11 + $0x1e8] sm:$0xf]  ;;  %372 = vst [vmem:[%s320_s4 + $0x38] sm:$0xf] %v3552_v30 }
  0x4a   : > { %374 = vst [vmem:[%s320_s4 + $0x3c] sm:$0xf] %v3553_v31 }
  0x4b PF: > { %p3554_p12 = scmp.ge.s32.totalorder %s4536_s26, 1  ;;  %p437_p13 = scmp.lt.s32.totalorder %s4536_s26, 7 }
  0x4d   : > { %p438_p0 = pnand %p3554_p12, %p437_p13 }
  0x4e   : > { %s444_s7 = sand.u32 (!%p438_p0), 1, %s4512_s20   ;;  %s451_s12 = sand.u32 (!%p438_p0), 1, %s4504_s18  }
  0x4f   : > { %441 = sbr.rel (%p438_p0) target bundleno = 1109 (0x455), region = 107  ;;  %s3555_s27 = sshll.u32 (!%p438_p0), %s444_s7, 7 }
  0x50   : > { %s3556_s13 = sshll.u32 (!%p438_p0), %s451_s12, 6  ;;  %s4731_s8 = scalar_lea.vmem (!%p438_p0), [#allocation4], %s3555_s27 }
  0x51   : > { %s4538_s14 = smov (!%p438_p0), 127   ;;  %s4737_s15 = scalar_lea.vmem (!%p438_p0), [#allocation5], %s3556_s13 }
  0x52   : > { %s4539_s18 = smov (!%p438_p0), 119   ;;  %s4540_s16 = smov (!%p438_p0), 118  }
  0x53   : > { %s4541_s30 = smov (!%p438_p0), 47   ;;  %s4542_s6 = smov (!%p438_p0), 46  }
  0x54   : > { %v521_v32 = vld [vmem:[%s4731_s8 + $0x8] sm:$0xff]  ;;  %v520_v33 = vld [vmem:[%s4731_s8] sm:$0xff]  ;;  %s4543_s9 = smov 38   ;;  %s4544_s10 = smov 37   ;;  %v4767_v41 = vld [vmem:[%s4731_s8 + $0x10] sm:$0xff]  ;;  %vm554_vm0 = vcmask 1043456  }
  0x55   : > { %546 = vrot.lane.b32.xlu1 %v521_v32, %s4538_s14  ;;  %539 = vst [vmem:[#allocation2 + $0x8] sm:$0xff] %v521_v32  ;;  %542 = vrot.lane.b32.xlu0 %v520_v33, %s4538_s14  ;;  %v4347_v34 = vld [vmem:[%s4737_s15] sm:$0xff]   ;;  %v4378_v39 = vld [vmem:[%s4737_s15 + $0x8] sm:$0xff]   ;;  %vm577_vm1 = vcmask 973824   ;;  %vm556_vm2 = vcmask 1039360   ;;  %vm598_vm3 = vcmask 965632  }
  0x56   : > { %538 = vst [vmem:[#allocation2] sm:$0xff] %v520_v33  ;;  %v4349_v35 = vunpack.c.h.b16 %v4347_v34  ;;  %v4348_v36 = vunpack.c.l.b16 %v4347_v34  ;;  %564 = vrot.lane.b32.xlu2 %v520_v33, %s4539_s18  ;;  %v4352_v40 = vunpack.c.l.b16 %v4378_v39  ;;  %v4353_v43 = vunpack.c.h.b16 %v4378_v39  ;;  %v4779_v45 = vld [vmem:[%s4731_s8 + $0x18] sm:$0xff]  ;;  %v4379_v19 = vld [vmem:[%s4737_s15 + $0x10] sm:$0xff]   ;;  %v4851_v23 = vld [vmem:[%s4731_s8 + $0x20] sm:$0xff]  ;;  %p503_p2 = scmp.lt.s32.totalorder %s4524_s23, 1  ;;  %p505_p3 = scmp.lt.s32.totalorder %s4520_s22, 2 }
  0x57   : > { %v4356_v22 = vunpack.c.l.b16 %v4379_v19  ;;  %vm619_vm4 = vcmask 384000   ;;  %v4357_v28 = vunpack.c.h.b16 %v4379_v19  ;;  %vm640_vm5 = vcmask 375808  }
  0x58   : > { %v541_v37 = vpack.c.b16 %v4349_v35, %v4349_v35  ;;  %v540_v38 = vpack.c.b16 %v4348_v36, %v4348_v36  ;;  %v4769_v42 = vpack.c.b16 %v4352_v40, %v4352_v40  ;;  %v4776_v44 = vpack.c.b16 %v4353_v43, %v4353_v43 }
  0x59   : > { %v4855_v30 = vpack.c.b16 %v4356_v22, %v4356_v22  ;;  %v4862_v34 = vpack.c.b16 %v4357_v28, %v4357_v28  ;;  %vm661_vm6 = vcmask 310272   ;;  %vm682_vm7 = vcmask 302080  }
  0x5a   : > { %vm3299_vm8 = vcmask 7168   ;;  %vm3304_vm9 = vcmask 15360  }
  0x5d   : > { %548 = vrot.lane.b32.xlu1 %v541_v37, %s4538_s14  ;;  %544 = vrot.lane.b32.xlu0 %v540_v38, %s4538_s14 }
  0x5e   : > { %566 = vrot.lane.b32.xlu2 %v540_v38, %s4539_s18 }
  0x65   : > { %570 = vrot.lane.b32.xlu1 %v541_v37, %s4539_s18  ;;  %568 = vrot.lane.b32.xlu0 %v521_v32, %s4539_s18 }
  0x66   : > { %585 = vrot.lane.b32.xlu2 %v520_v33, %s4540_s16 }
  0x6d   : > { %589 = vrot.lane.b32.xlu1 %v521_v32, %s4540_s16  ;;  %587 = vrot.lane.b32.xlu0 %v540_v38, %s4540_s16 }
  0x6e   : > { %591 = vrot.lane.b32.xlu2 %v541_v37, %s4540_s16 }
  0x75   : > { %608 = vrot.lane.b32.xlu1 %v540_v38, %s4541_s30  ;;  %606 = vrot.lane.b32.xlu0 %v520_v33, %s4541_s30 }
  0x76   : > { %610 = vrot.lane.b32.xlu2 %v521_v32, %s4541_s30 }
  0x7d   : > { %627 = vrot.lane.b32.xlu1 %v520_v33, %s4542_s6  ;;  %612 = vrot.lane.b32.xlu0 %v541_v37, %s4541_s30 }
  0x7e   : > { %629 = vrot.lane.b32.xlu2 %v540_v38, %s4542_s6 }
  0x85   : > { %633 = vrot.lane.b32.xlu1 %v541_v37, %s4542_s6  ;;  %631 = vrot.lane.b32.xlu0 %v521_v32, %s4542_s6 }
  0x86   : > { %648 = vrot.lane.b32.xlu2 %v520_v33, %s4543_s9 }
  0x8d   : > { %652 = vrot.lane.b32.xlu1 %v521_v32, %s4543_s9  ;;  %650 = vrot.lane.b32.xlu0 %v540_v38, %s4543_s9 }
  0x8e   : > { %654 = vrot.lane.b32.xlu2 %v541_v37, %s4543_s9 }
  0x95   : > { %671 = vrot.lane.b32.xlu1 %v540_v38, %s4544_s10  ;;  %669 = vrot.lane.b32.xlu0 %v520_v33, %s4544_s10 }
  0x96   : > { %673 = vrot.lane.b32.xlu2 %v521_v32, %s4544_s10  ;;  %v4859_v32 = vld [vmem:[%s4731_s8 + $0x28] sm:$0xff] }
  0x9d   : > { %888 = vrot.lane.b32.xlu1 %v4767_v41, %s4538_s14  ;;  %675 = vrot.lane.b32.xlu0 %v541_v37, %s4544_s10 }
  0x9e   : > { %890 = vrot.lane.b32.xlu2 %v4769_v42, %s4538_s14 }
  0xa5   : > { %894 = vrot.lane.b32.xlu1 %v4776_v44, %s4538_s14  ;;  %892 = vrot.lane.b32.xlu0 %v4779_v45, %s4538_s14 }
  0xa6   : > { %908 = vrot.lane.b32.xlu2 %v4767_v41, %s4539_s18 }
  0xad   : > { %912 = vrot.lane.b32.xlu1 %v4779_v45, %s4539_s18  ;;  %910 = vrot.lane.b32.xlu0 %v4769_v42, %s4539_s18 }
  0xae   : > { %914 = vrot.lane.b32.xlu2 %v4776_v44, %s4539_s18 }
  0xb0   : > { %v565_v46 = vpop.permute.xlu2 %564 }
  0xb1   : > { %v572_v47 = vrot.slane %v565_v46, 4 }
  0xb5   : > { %930 = vrot.lane.b32.xlu1 %v4769_v42, %s4540_s16  ;;  %928 = vrot.lane.b32.xlu0 %v4767_v41, %s4540_s16 }
  0xb6   : > { %932 = vrot.lane.b32.xlu2 %v4779_v45, %s4540_s16 }
  0xb8   : > { %v567_v48 = vpop.permute.xlu2 %566 }
  0xb9   : > { %v573_v49 = vrot.slane %v567_v48, 4 }
  0xbb   : > { %v576_v50 = vsel %vm554_vm0, %v572_v47, %v573_v49 }
  0xbc   : > { %v578_v51 = vsel %vm577_vm1, %v565_v46, %v576_v50 }
  0xbd   : > { %948 = vrot.lane.b32.xlu1 %v4767_v41, %s4541_s30  ;;  %934 = vrot.lane.b32.xlu0 %v4776_v44, %s4540_s16  ;;  %583 = vst [vmem:[#allocation2 + $0x20] sm:$0xff] %v578_v51 }
  0xbe   : > { %950 = vrot.lane.b32.xlu2 %v4769_v42, %s4541_s30 }
  0xc0   : > { %v586_v52 = vpop.permute.xlu2 %585 }
  0xc1   : > { %v593_v10 = vrot.slane %v586_v52, 4 }
  0xc5   : > { %954 = vrot.lane.b32.xlu1 %v4776_v44, %s4541_s30  ;;  %952 = vrot.lane.b32.xlu0 %v4779_v45, %s4541_s30 }
  0xc6   : > { %968 = vrot.lane.b32.xlu2 %v4767_v41, %s4542_s6 }
  0xc7   : > { %v547_v53 = vpop.permute.xlu1 %546  ;;  %v543_v54 = vpop.permute.xlu0 %542 }
  0xc8   : > { %v592_v55 = vpop.permute.xlu2 %591  ;;  %v552_v58 = vrot.slane %v547_v53, 4  ;;  %v550_v59 = vrot.slane %v543_v54, 4 }
  0xc9   : > { %v596_v11 = vrot.slane %v592_v55, 4 }
  0xcd   : > { %972 = vrot.lane.b32.xlu1 %v4779_v45, %s4542_s6  ;;  %970 = vrot.lane.b32.xlu0 %v4769_v42, %s4542_s6 }
  0xce   : > { %974 = vrot.lane.b32.xlu2 %v4776_v44, %s4542_s6 }
  0xcf   : > { %v549_v56 = vpop.permute.xlu1 %548  ;;  %v545_v57 = vpop.permute.xlu0 %544 }
  0xd0   : > { %v553_v60 = vrot.slane %v549_v56, 4  ;;  %v551_v61 = vrot.slane %v545_v57, 4  ;;  %v4819_v62 = vpop.permute.xlu2 %610 }
  0xd1   : > { %v616_v35 = vrot.slane %v4819_v62, 4 }
  0xd2   : > { %v558_v63 = vsel %vm554_vm0, %v552_v58, %v553_v60  ;;  %v555_v0 = vsel %vm554_vm0, %v550_v59, %v551_v61 }
  0xd3   : > { %v559_v1 = vsel %vm556_vm2, %v547_v53, %v558_v63  ;;  %v557_v2 = vsel %vm556_vm2, %v543_v54, %v555_v0 }
  0xd4   : > { %563 = vst [vmem:[#allocation2 + $0x18] sm:$0xff] %v559_v1 }
  0xd5   : > { %562 = vst [vmem:[#allocation2 + $0x10] sm:$0xff] %v557_v2  ;;  %990 = vrot.lane.b32.xlu1 %v4769_v42, %s4543_s9  ;;  %988 = vrot.lane.b32.xlu0 %v4767_v41, %s4543_s9 }
  0xd6   : > { %992 = vrot.lane.b32.xlu2 %v4779_v45, %s4543_s9 }
  0xd7   : > { %v571_v3 = vpop.permute.xlu1 %570  ;;  %v569_v4 = vpop.permute.xlu0 %568 }
  0xd8   : > { %v575_v5 = vrot.slane %v571_v3, 4  ;;  %v574_v6 = vrot.slane %v569_v4, 4  ;;  %v630_v7 = vpop.permute.xlu2 %629 }
  0xd9   : > { %v636_v36 = vrot.slane %v630_v7, 4 }
  0xda   : > { %v579_v8 = vsel %vm554_vm0, %v574_v6, %v575_v5 }
  0xdb   : > { %v580_v9 = vsel %vm577_vm1, %v569_v4, %v579_v8 }
  0xdc   : > { %584 = vst [vmem:[#allocation2 + $0x28] sm:$0xff] %v580_v9 }
  0xdd   : > { %1008 = vrot.lane.b32.xlu1 %v4767_v41, %s4544_s10  ;;  %994 = vrot.lane.b32.xlu0 %v4776_v44, %s4543_s9 }
  0xde   : > { %1010 = vrot.lane.b32.xlu2 %v4769_v42, %s4544_s10 }
  0xdf   : > { %v590_v12 = vpop.permute.xlu1 %589  ;;  %v588_v13 = vpop.permute.xlu0 %587 }
  0xe0   : > { %v595_v14 = vrot.slane %v590_v12, 4  ;;  %v594_v15 = vrot.slane %v588_v13, 4  ;;  %v4839_v16 = vpop.permute.xlu2 %648 }
  0xe1   : > { %v656_v55 = vrot.slane %v4839_v16, 4 }
  0xe2   : > { %v600_v17 = vsel %vm554_vm0, %v595_v14, %v596_v11  ;;  %v597_v18 = vsel %vm554_vm0, %v593_v10, %v594_v15 }
  0xe3   : > { %v601_v20 = vsel %vm598_vm3, %v590_v12, %v600_v17  ;;  %v599_v21 = vsel %vm598_vm3, %v586_v52, %v597_v18 }
  0xe4   : > { %605 = vst [vmem:[#allocation2 + $0x38] sm:$0xff] %v601_v20  ;;  %v4920_v20 = vld [vmem:[#allocation2 + $0x14] sm:$0xf] }
  0xe5   : > { %604 = vst [vmem:[#allocation2 + $0x30] sm:$0xff] %v599_v21  ;;  %1014 = vrot.lane.b32.xlu1 %v4776_v44, %s4544_s10  ;;  %1012 = vrot.lane.b32.xlu0 %v4779_v45, %s4544_s10  ;;  %v4922_v21 = vld [vmem:[#allocation2 + $0x10] sm:$0xf] }
  0xe6   : > { %1227 = vrot.lane.b32.xlu2 %v4851_v23, %s4538_s14 }
  0xe7   : > { %v609_v24 = vpop.permute.xlu1 %608  ;;  %v607_v25 = vpop.permute.xlu0 %606 }
  0xe8   : > { %v615_v26 = vrot.slane %v609_v24, 4  ;;  %v614_v27 = vrot.slane %v607_v25, 4  ;;  %v655_v29 = vpop.permute.xlu2 %654 }
  0xe9   : > { %v659_v56 = vrot.slane %v655_v29, 4 }
  0xea   : > { %v618_v31 = vsel %vm554_vm0, %v614_v27, %v615_v26 }
  0xeb   : > { %v620_v33 = vsel %vm619_vm4, %v607_v25, %v618_v31  ;;  %v4933_v31 = vld [vmem:[#allocation2 + $0x18] sm:$0xf0] }
  0xec   : > { %625 = vst [vmem:[#allocation2 + $0x40] sm:$0xff] %v620_v33  ;;  %v4935_v33 = vld [vmem:[#allocation2 + $0x14] sm:$0xf0] }
  0xed   : > { %1231 = vrot.lane.b32.xlu1 %v4859_v32, %s4538_s14  ;;  %1229 = vrot.lane.b32.xlu0 %v4855_v30, %s4538_s14 }
  0xee   : > { %1233 = vrot.lane.b32.xlu2 %v4862_v34, %s4538_s14 }
  0xef   : > { %v628_v37 = vpop.permute.xlu1 %627  ;;  %v613_v38 = vpop.permute.xlu0 %612 }
  0xf0   : > { %v635_v39 = vrot.slane %v628_v37, 4  ;;  %v617_v40 = vrot.slane %v613_v38, 4  ;;  %v674_v42 = vpop.permute.xlu2 %673 }
  0xf1   : > { %v679_v9 = vrot.slane %v674_v42, 4 }
  0xf2   : > { %v639_v43 = vsel %vm554_vm0, %v635_v39, %v636_v36  ;;  %v621_v44 = vsel %vm554_vm0, %v616_v35, %v617_v40 }
  0xf3   : > { %v641_v46 = vsel %vm640_vm5, %v628_v37, %v639_v43  ;;  %v622_v47 = vsel %vm619_vm4, %v4819_v62, %v621_v44 }
  0xf4   : > { %646 = vst [vmem:[#allocation2 + $0x50] sm:$0xff] %v641_v46 }
  0xf5   : > { %626 = vst [vmem:[#allocation2 + $0x48] sm:$0xff] %v622_v47  ;;  %1249 = vrot.lane.b32.xlu1 %v4855_v30, %s4539_s18  ;;  %1247 = vrot.lane.b32.xlu0 %v4851_v23, %s4539_s18 }
  0xf6   : > { %1251 = vrot.lane.b32.xlu2 %v4859_v32, %s4539_s18 }
  0xf7   : > { %v634_v48 = vpop.permute.xlu1 %633  ;;  %v632_v49 = vpop.permute.xlu0 %631 }
  0xf8   : > { %v638_v50 = vrot.slane %v634_v48, 4  ;;  %v637_v51 = vrot.slane %v632_v49, 4  ;;  %v891_v52 = vpop.permute.xlu2 %890 }
  0xf9   : > { %v897_v10 = vrot.slane %v891_v52, 4 }
  0xfa   : > { %v642_v53 = vsel %vm554_vm0, %v637_v51, %v638_v50 }
  0xfb   : > { %v643_v54 = vsel %vm640_vm5, %v632_v49, %v642_v53 }
  0xfc   : > { %647 = vst [vmem:[#allocation2 + $0x58] sm:$0xff] %v643_v54 }
  0xfd   : > { %1267 = vrot.lane.b32.xlu1 %v4851_v23, %s4540_s16  ;;  %1253 = vrot.lane.b32.xlu0 %v4862_v34, %s4539_s18 }
  0xfe   : > { %1269 = vrot.lane.b32.xlu2 %v4855_v30, %s4540_s16 }
  0xff   : > { %v653_v57 = vpop.permute.xlu1 %652  ;;  %v651_v58 = vpop.permute.xlu0 %650 }
 0x100   : > { %v658_v59 = vrot.slane %v653_v57, 4  ;;  %v657_v60 = vrot.slane %v651_v58, 4  ;;  %v4891_v61 = vpop.permute.xlu2 %908 }
 0x101   : > { %v916_v47 = vrot.slane %v4891_v61, 4 }
 0x102   : > { %v663_v62 = vsel %vm554_vm0, %v658_v59, %v659_v56  ;;  %v660_v63 = vsel %vm554_vm0, %v656_v55, %v657_v60  ;;  %v4208_v60 = vld [vmem:[#allocation2 + $0x24] sm:$0xf] }
 0x103   : > { %v664_v0 = vsel %vm661_vm6, %v653_v57, %v663_v62  ;;  %v662_v1 = vsel %vm661_vm6, %v4839_v16, %v660_v63  ;;  %v4215_v56 = vld [vmem:[#allocation2 + $0x54] sm:$0xf0]  ;;  %v3613_v57 = vld [vmem:[#allocation2 + $0x58] sm:$0xf0] }
 0x104   : > { %668 = vst [vmem:[#allocation2 + $0x68] sm:$0xff] %v664_v0  ;;  %v3611_v0 = vld [vmem:[#allocation2 + $0x50] sm:$0xf] }
 0x105   : > { %667 = vst [vmem:[#allocation2 + $0x60] sm:$0xff] %v662_v1  ;;  %1273 = vrot.lane.b32.xlu1 %v4862_v34, %s4540_s16  ;;  %1271 = vrot.lane.b32.xlu0 %v4859_v32, %s4540_s16  ;;  %v4214_v1 = vld [vmem:[#allocation2 + $0x54] sm:$0xf] }
 0x106   : > { %1287 = vrot.lane.b32.xlu2 %v4851_v23, %s4541_s30 }
 0x107   : > { %v672_v2 = vpop.permute.xlu1 %671  ;;  %v670_v3 = vpop.permute.xlu0 %669 }
 0x108   : > { %v678_v4 = vrot.slane %v672_v2, 4  ;;  %v677_v5 = vrot.slane %v670_v3, 4  ;;  %v4904_v6 = vpop.permute.xlu2 %914  ;;  %v3587_v2 = vld [vmem:[#allocation2 + $0x20] sm:$0xf] }
 0x109   : > { %v919_v48 = vrot.slane %v4904_v6, 4  ;;  %v4209_v6 = vld [vmem:[#allocation2 + $0x24] sm:$0xf0] }
 0x10a   : > { %v681_v7 = vsel %vm554_vm0, %v677_v5, %v678_v4  ;;  %v3616_v4 = vor.u32 %v4214_v1, %v3613_v57  ;;  %v3589_v5 = vld [vmem:[#allocation2 + $0x28] sm:$0xf0] }
 0x10b   : > { %v683_v8 = vsel %vm682_vm7, %v670_v3, %v681_v7  ;;  %v3621_v46 = vld [vmem:[#allocation2 + $0x68] sm:$0xf0]  ;;  %v3612_v3 = vor.u32 %v4215_v56, %v3611_v0  ;;  %v4213_v7 = vld [vmem:[#allocation2 + $0x44] sm:$0xf0] }
 0x10c   : > { %688 = vst [vmem:[#allocation2 + $0x70] sm:$0xff] %v683_v8  ;;  %v3619_v43 = vld [vmem:[#allocation2 + $0x60] sm:$0xf]  ;;  %v4216_v44 = vld [vmem:[#allocation2 + $0x64] sm:$0xf] }
 0x10d   : > { %1291 = vrot.lane.b32.xlu1 %v4859_v32, %s4541_s30  ;;  %1289 = vrot.lane.b32.xlu0 %v4855_v30, %s4541_s30  ;;  %v3624_v54 = vor.u32 %v4216_v44, %v3621_v46  ;;  %v3605_v8 = vld [vmem:[#allocation2 + $0x48] sm:$0xf0]  ;;  %v3588_v44 = vor.u32 %v4209_v6, %v3587_v2  ;;  %v3592_v46 = vor.u32 %v4208_v60, %v3589_v5 }
 0x10e   : > { %1293 = vrot.lane.b32.xlu2 %v4862_v34, %s4541_s30 }
 0x10f   : > { %v889_v11 = vpop.permute.xlu1 %888  ;;  %v676_v12 = vpop.permute.xlu0 %675 }
 0x110   : > { %v896_v13 = vrot.slane %v889_v11, 4  ;;  %v680_v14 = vrot.slane %v676_v12, 4  ;;  %v4914_v15 = vpop.permute.xlu2 %932 }
 0x112   : > { %v900_v16 = vsel %vm554_vm0, %v896_v13, %v897_v10  ;;  %v684_v17 = vsel %vm554_vm0, %v679_v9, %v680_v14  ;;  %v3603_v10 = vld [vmem:[#allocation2 + $0x40] sm:$0xf] }
 0x113   : > { %v901_v18 = vsel %vm556_vm2, %v889_v11, %v900_v16  ;;  %v685_v19 = vsel %vm682_vm7, %v674_v42, %v684_v17  ;;  %v3627_v29 = vld [vmem:[#allocation2 + $0x70] sm:$0xf]  ;;  %v4218_v37 = vld [vmem:[#allocation2 + $0x74] sm:$0xf]  ;;  %v4217_v42 = vld [vmem:[#allocation2 + $0x64] sm:$0xf0]  ;;  %v3604_v14 = vor.u32 %v4213_v7, %v3603_v10 }
 0x114   : > { %689 = vst [vmem:[#allocation2 + $0x78] sm:$0xff] %v685_v19  ;;  %v3620_v53 = vor.u32 %v4217_v42, %v3619_v43  ;;  %v4212_v11 = vld [vmem:[#allocation2 + $0x44] sm:$0xf]  ;;  %v4211_v17 = vld [vmem:[#allocation2 + $0x34] sm:$0xf0] }
 0x115   : > { %1309 = vrot.lane.b32.xlu1 %v4855_v30, %s4542_s6  ;;  %1307 = vrot.lane.b32.xlu0 %v4851_v23, %s4542_s6  ;;  %906 = vst [vmem:[#allocation2 + $0x10] sm:$0xff] %v901_v18  ;;  %v3608_v16 = vor.u32 %v4212_v11, %v3605_v8  ;;  %v4210_v19 = vld [vmem:[#allocation2 + $0x34] sm:$0xf] }
 0x116   : > { %1311 = vrot.lane.b32.xlu2 %v4859_v32, %s4542_s6 }
 0x117   : > { %v895_v22 = vpop.permute.xlu1 %894  ;;  %v893_v24 = vpop.permute.xlu0 %892 }
 0x118   : > { %v899_v25 = vrot.slane %v895_v22, 4  ;;  %v898_v26 = vrot.slane %v893_v24, 4  ;;  %v4930_v27 = vpop.permute.xlu2 %950  ;;  %v3595_v22 = vld [vmem:[#allocation2 + $0x30] sm:$0xf] }
 0x11a   : > { %v902_v28 = vsel %vm554_vm0, %v898_v26, %v899_v25  ;;  %v4380_v26 = vld [vmem:[%s4737_s15 + $0x18] sm:$0xff]  }
 0x11b   : > { %v903_v35 = vsel %vm556_vm2, %v893_v24, %v902_v28  ;;  %v4219_v36 = vld [vmem:[#allocation2 + $0x74] sm:$0xf0]  ;;  %v3629_v38 = vld [vmem:[#allocation2 + $0x78] sm:$0xf0] }
 0x11c   : > { %v3628_v39 = vor.u32 %v4219_v36, %v3627_v29  ;;  %v3632_v40 = vor.u32 %v4218_v37, %v3629_v38  ;;  %907 = vst [vmem:[#allocation2 + $0x18] sm:$0xff] %v903_v35  ;;  %v3597_v24 = vld [vmem:[#allocation2 + $0x38] sm:$0xf0]  ;;  %v3596_v29 = vor.u32 %v4211_v17, %v3595_v22  ;;  %v4360_v36 = vunpack.c.l.b16 %v4380_v26 }
 0x11d   : > { %1327 = vrot.lane.b32.xlu1 %v4851_v23, %s4543_s9  ;;  %1313 = vrot.lane.b32.xlu0 %v4862_v34, %s4542_s6  ;;  %v3600_v35 = vor.u32 %v4210_v19, %v3597_v24  ;;  %v938_v37 = vrot.slane %v4914_v15, 4  ;;  %v957_v38 = vrot.slane %v4930_v27, 4  ;;  %v4979_v27 = vld [vmem:[%s4731_s8 + $0x30] sm:$0xff] }
 0x11e   : > { %810 = vmatpush.bf16.msra.mxu0 %v3628_v39  ;;  %829 = vmatpush.bf16.msra.mxu1 %v3632_v40 }
 0x11f   : > { %v913_v49 = vpop.permute.xlu1 %912  ;;  %v911_v50 = vpop.permute.xlu0 %910  ;;  %1329 = vrot.lane.b32.xlu2 %v4855_v30, %s4543_s9 }
 0x120   : > { %v918_v51 = vrot.slane %v913_v49, 4  ;;  %v917_v52 = vrot.slane %v911_v50, 4  ;;  %v4946_v55 = vpop.permute.xlu2 %968 }
 0x122   : > { %v922_v58 = vsel %vm554_vm0, %v918_v51, %v919_v48  ;;  %v920_v59 = vsel %vm554_vm0, %v916_v47, %v917_v52  ;;  %811 = vmatpush.bf16.msra.mxu0 %v3620_v53  ;;  %830 = vmatpush.bf16.msra.mxu1 %v3624_v54  ;;  %v3580_v51 = vor.u32 %v4935_v33, %v4922_v21  ;;  %v4361_v53 = vunpack.c.h.b16 %v4380_v26  ;;  %v4993_v54 = vld [vmem:[%s4731_s8 + $0x38] sm:$0xff] }
 0x123   : > { %v923_v62 = vsel %vm577_vm1, %v913_v49, %v922_v58  ;;  %v921_v63 = vsel %vm577_vm1, %v4891_v61, %v920_v59  ;;  %v3584_v52 = vor.u32 %v4920_v20, %v4933_v31  ;;  %v976_v59 = vrot.slane %v4946_v55, 4 }
 0x124   : > { %926 = vst [vmem:[#allocation2 + $0x20] sm:$0xff] %v921_v63  ;;  %v4997_v31 = vpack.c.b16 %v4361_v53, %v4361_v53 }
 0x125   : > { %1333 = vrot.lane.b32.xlu1 %v4862_v34, %s4543_s9  ;;  %1331 = vrot.lane.b32.xlu0 %v4859_v32, %s4543_s9  ;;  %927 = vst [vmem:[#allocation2 + $0x28] sm:$0xff] %v923_v62 }
 0x126   : > { %812 = vmatpush.bf16.msra.mxu0 %v3612_v3  ;;  %831 = vmatpush.bf16.msra.mxu1 %v3616_v4 }
 0x127   : > { %v931_v61 = vpop.permute.xlu1 %930  ;;  %v929_v9 = vpop.permute.xlu0 %928  ;;  %1347 = vrot.lane.b32.xlu2 %v4851_v23, %s4544_s10 }
 0x128   : > { %v937_v12 = vrot.slane %v931_v61, 4  ;;  %v936_v13 = vrot.slane %v929_v9, 4  ;;  %v4959_v18 = vpop.permute.xlu2 %974 }
 0x129   : > { %v979_v60 = vrot.slane %v4959_v18, 4 }
 0x12a   : > { %v940_v25 = vsel %vm554_vm0, %v936_v13, %v937_v12  ;;  %813 = vmatpush.bf16.msra.mxu0 %v3604_v14  ;;  %832 = vmatpush.bf16.msra.mxu1 %v3608_v16 }
 0x12b   : > { %v941_v28 = vsel %vm598_vm3, %v929_v9, %v940_v25 }
 0x12c   : > { %946 = vst [vmem:[#allocation2 + $0x30] sm:$0xff] %v941_v28 }
 0x12d   : > { %1351 = vrot.lane.b32.xlu1 %v4859_v32, %s4544_s10  ;;  %1349 = vrot.lane.b32.xlu0 %v4855_v30, %s4544_s10  ;;  %v4974_v30 = vpack.c.b16 %v4360_v36, %v4360_v36 }
 0x12e   : > { %814 = vmatpush.bf16.msra.mxu0 %v3596_v29  ;;  %833 = vmatpush.bf16.msra.mxu1 %v3600_v35 }
 0x12f   : > { %v949_v39 = vpop.permute.xlu1 %948  ;;  %v935_v40 = vpop.permute.xlu0 %934  ;;  %1353 = vrot.lane.b32.xlu2 %v4862_v34, %s4544_s10 }
 0x130   : > { %v956_v42 = vrot.slane %v949_v39, 4  ;;  %v939_v43 = vrot.slane %v935_v40, 4  ;;  %v4972_v47 = vpop.permute.xlu2 %992 }
 0x131   : > { %v998_v12 = vrot.slane %v4972_v47, 4 }
 0x132   : > { %v960_v48 = vsel %vm554_vm0, %v956_v42, %v957_v38  ;;  %v942_v49 = vsel %vm554_vm0, %v938_v37, %v939_v43  ;;  %815 = vmatpush.bf16.msra.mxu0 %v3588_v44  ;;  %834 = vmatpush.bf16.msra.mxu1 %v3592_v46 }
 0x133   : > { %v961_v50 = vsel %vm619_vm4, %v949_v39, %v960_v48  ;;  %v943_v34 = vsel %vm598_vm3, %v4914_v15, %v942_v49 }
 0x134   : > { %966 = vst [vmem:[#allocation2 + $0x40] sm:$0xff] %v961_v50 }
 0x135   : > { %947 = vst [vmem:[#allocation2 + $0x38] sm:$0xff] %v943_v34  ;;  %1568 = vrot.lane.b32.xlu1 %v4974_v30, %s4538_s14  ;;  %1566 = vrot.lane.b32.xlu0 %v4979_v27, %s4538_s14 }
 0x136   : > { %816 = vmatpush.bf16.msra.mxu0 %v3580_v51  ;;  %835 = vmatpush.bf16.msra.mxu1 %v3584_v52  ;;  %v5056_v51 = vld [vmem:[#allocation2 + $0x14] sm:$0xf]  ;;  %v5058_v52 = vld [vmem:[#allocation2 + $0x10] sm:$0xf] }
 0x137   : > { %v955_v15 = vpop.permute.xlu1 %954  ;;  %v953_v56 = vpop.permute.xlu0 %952  ;;  %1570 = vrot.lane.b32.xlu2 %v4993_v54, %s4538_s14 }
 0x138   : > { %v959_v21 = vrot.slane %v955_v15, 4  ;;  %v958_v33 = vrot.slane %v953_v56, 4  ;;  %v1011_v20 = vpop.permute.xlu2 %1010 }
 0x139   : > { %v1017_v13 = vrot.slane %v1011_v20, 4 }
 0x13a   : > { %v962_v57 = vsel %vm554_vm0, %v958_v33, %v959_v21 }
 0x13b   : > { %v963_v58 = vsel %vm619_vm4, %v953_v56, %v962_v57 }
 0x13c   : > { %967 = vst [vmem:[#allocation2 + $0x48] sm:$0xff] %v963_v58  ;;  %v5062_v58 = vld [vmem:[#allocation2 + $0x18] sm:$0xf0] }
 0x13d   : > { %1586 = vrot.lane.b32.xlu1 %v4979_v27, %s4539_s18  ;;  %1572 = vrot.lane.b32.xlu0 %v4997_v31, %s4538_s14 }
 0x13f   : > { %v973_v62 = vpop.permute.xlu1 %972  ;;  %v971_v63 = vpop.permute.xlu0 %970  ;;  %1588 = vrot.lane.b32.xlu2 %v4974_v30, %s4539_s18 }
 0x140   : > { %v978_v0 = vrot.slane %v973_v62, 4  ;;  %v977_v1 = vrot.slane %v971_v63, 4  ;;  %v1228_v2 = vpop.permute.xlu2 %1227 }
 0x141   : > { %v1235_v40 = vrot.slane %v1228_v2, 4 }
 0x142   : > { %v982_v3 = vsel %vm554_vm0, %v978_v0, %v979_v60  ;;  %v980_v4 = vsel %vm554_vm0, %v976_v59, %v977_v1  ;;  %v5064_v59 = vld [vmem:[#allocation2 + $0x14] sm:$0xf0] }
 0x143   : > { %v983_v5 = vsel %vm640_vm5, %v973_v62, %v982_v3  ;;  %v981_v6 = vsel %vm640_vm5, %v4946_v55, %v980_v4 }
 0x144   : > { %987 = vst [vmem:[#allocation2 + $0x58] sm:$0xff] %v983_v5 }
 0x145   : > { %986 = vst [vmem:[#allocation2 + $0x50] sm:$0xff] %v981_v6  ;;  %1592 = vrot.lane.b32.xlu1 %v4997_v31, %s4539_s18  ;;  %1590 = vrot.lane.b32.xlu0 %v4993_v54, %s4539_s18 }
 0x147   : > { %v991_v7 = vpop.permute.xlu1 %990  ;;  %v989_v8 = vpop.permute.xlu0 %988  ;;  %1606 = vrot.lane.b32.xlu2 %v4979_v27, %s4540_s16 }
 0x148   : > { %v997_v61 = vrot.slane %v991_v7, 4  ;;  %v996_v9 = vrot.slane %v989_v8, 4  ;;  %v1234_v10 = vpop.permute.xlu2 %1233 }
 0x149   : > { %v1238_v42 = vrot.slane %v1234_v10, 4 }
 0x14a   : > { %v1000_v11 = vsel %vm554_vm0, %v996_v9, %v997_v61 }
 0x14b   : > { %v1001_v55 = vsel %vm661_vm6, %v989_v8, %v1000_v11  ;;  %v4233_v7 = vld [vmem:[#allocation2 + $0x54] sm:$0xf0]  ;;  %v3693_v10 = vld [vmem:[#allocation2 + $0x58] sm:$0xf0] }
 0x14c   : > { %1006 = vst [vmem:[#allocation2 + $0x60] sm:$0xff] %v1001_v55  ;;  %v3691_v61 = vld [vmem:[#allocation2 + $0x50] sm:$0xf]  ;;  %v4232_v9 = vld [vmem:[#allocation2 + $0x54] sm:$0xf] }
 0x14d   : > { %1610 = vrot.lane.b32.xlu1 %v4993_v54, %s4540_s16  ;;  %1608 = vrot.lane.b32.xlu0 %v4974_v30, %s4540_s16 }
 0x14f   : > { %v1009_v14 = vpop.permute.xlu1 %1008  ;;  %v995_v16 = vpop.permute.xlu0 %994  ;;  %1612 = vrot.lane.b32.xlu2 %v4997_v31, %s4540_s16 }
 0x150   : > { %v1016_v17 = vrot.slane %v1009_v14, 4  ;;  %v999_v18 = vrot.slane %v995_v16, 4  ;;  %v5029_v19 = vpop.permute.xlu2 %1251  ;;  %v3696_v16 = vor.u32 %v4232_v9, %v3693_v10 }
 0x152   : > { %v1020_v22 = vsel %vm554_vm0, %v1016_v17, %v1017_v13  ;;  %v1002_v24 = vsel %vm554_vm0, %v998_v12, %v999_v18  ;;  %v4226_v12 = vld [vmem:[#allocation2 + $0x24] sm:$0xf]  ;;  %v3667_v13 = vld [vmem:[#allocation2 + $0x20] sm:$0xf]  ;;  %v4231_v17 = vld [vmem:[#allocation2 + $0x44] sm:$0xf0] }
 0x153   : > { %v1021_v25 = vsel %vm682_vm7, %v1009_v14, %v1020_v22  ;;  %v1003_v26 = vsel %vm661_vm6, %v4972_v47, %v1002_v24  ;;  %v3699_v1 = vld [vmem:[#allocation2 + $0x60] sm:$0xf]  ;;  %v3692_v14 = vor.u32 %v4233_v7, %v3691_v61  ;;  %v3685_v18 = vld [vmem:[#allocation2 + $0x48] sm:$0xf0]  ;;  %v1257_v22 = vrot.slane %v5029_v19, 4 }
 0x154   : > { %1026 = vst [vmem:[#allocation2 + $0x70] sm:$0xff] %v1021_v25 }
 0x155   : > { %1007 = vst [vmem:[#allocation2 + $0x68] sm:$0xff] %v1003_v26  ;;  %1628 = vrot.lane.b32.xlu1 %v4974_v30, %s4541_s30  ;;  %1626 = vrot.lane.b32.xlu0 %v4979_v27, %s4541_s30 }
 0x157   : > { %v1015_v28 = vpop.permute.xlu1 %1014  ;;  %v1013_v29 = vpop.permute.xlu0 %1012  ;;  %1630 = vrot.lane.b32.xlu2 %v4993_v54, %s4541_s30 }
 0x158   : > { %v1019_v35 = vrot.slane %v1015_v28, 4  ;;  %v1018_v36 = vrot.slane %v1013_v29, 4  ;;  %v5042_v37 = vpop.permute.xlu2 %1269  ;;  %v3683_v28 = vld [vmem:[#allocation2 + $0x40] sm:$0xf] }
 0x159   : > { %v1276_v24 = vrot.slane %v5042_v37, 4 }
 0x15a   : > { %v1022_v38 = vsel %vm554_vm0, %v1018_v36, %v1019_v35 }
 0x15b   : > { %v1023_v39 = vsel %vm682_vm7, %v1013_v29, %v1022_v38  ;;  %v3707_v34 = vld [vmem:[#allocation2 + $0x70] sm:$0xf]  ;;  %v4236_v21 = vld [vmem:[#allocation2 + $0x74] sm:$0xf]  ;;  %v4230_v29 = vld [vmem:[#allocation2 + $0x44] sm:$0xf]  ;;  %v3684_v38 = vor.u32 %v4231_v17, %v3683_v28 }
 0x15c   : > { %1027 = vst [vmem:[#allocation2 + $0x78] sm:$0xff] %v1023_v39  ;;  %v4235_v60 = vld [vmem:[#allocation2 + $0x64] sm:$0xf0]  ;;  %v3701_v62 = vld [vmem:[#allocation2 + $0x68] sm:$0xf0]  ;;  %v3688_v39 = vor.u32 %v4230_v29, %v3685_v18 }
 0x15d   : > { %1646 = vrot.lane.b32.xlu1 %v4979_v27, %s4542_s6  ;;  %1632 = vrot.lane.b32.xlu0 %v4997_v31, %s4541_s30  ;;  %v3700_v5 = vor.u32 %v4235_v60, %v3699_v1  ;;  %v5102_v1 = vld [vmem:[%s4731_s8 + $0x40] sm:$0xff]  ;;  %v4205_v28 = vld [vmem:[#allocation2 + $0x4] sm:$0xf0] }
 0x15f   : > { %v1232_v43 = vpop.permute.xlu1 %1231  ;;  %v1230_v44 = vpop.permute.xlu0 %1229  ;;  %1648 = vrot.lane.b32.xlu2 %v4974_v30, %s4542_s6 }
 0x160   : > { %v1237_v46 = vrot.slane %v1232_v43, 4  ;;  %v1236_v47 = vrot.slane %v1230_v44, 4  ;;  %v5052_v48 = vpop.permute.xlu2 %1287 }
 0x161   : > { %v1295_v7 = vrot.slane %v5052_v48, 4 }
 0x162   : > { %v1241_v49 = vsel %vm554_vm0, %v1237_v46, %v1238_v42  ;;  %v1239_v50 = vsel %vm554_vm0, %v1235_v40, %v1236_v47  ;;  %v4229_v42 = vld [vmem:[#allocation2 + $0x34] sm:$0xf0] }
 0x163   : > { %v1242_v53 = vsel %vm556_vm2, %v1232_v43, %v1241_v49  ;;  %v1240_v15 = vsel %vm556_vm2, %v1228_v2, %v1239_v50  ;;  %v4237_v56 = vld [vmem:[#allocation2 + $0x74] sm:$0xf0]  ;;  %v3709_v33 = vld [vmem:[#allocation2 + $0x78] sm:$0xf0]  ;;  %v4234_v2 = vld [vmem:[#allocation2 + $0x64] sm:$0xf] }
 0x164   : > { %v3708_v20 = vor.u32 %v4237_v56, %v3707_v34  ;;  %v3712_v57 = vor.u32 %v4236_v21, %v3709_v33  ;;  %1245 = vst [vmem:[#allocation2 + $0x10] sm:$0xff] %v1240_v15  ;;  %v3704_v6 = vor.u32 %v4234_v2, %v3701_v62  ;;  %v3677_v43 = vld [vmem:[#allocation2 + $0x38] sm:$0xf0]  ;;  %v4228_v49 = vld [vmem:[#allocation2 + $0x34] sm:$0xf]  ;;  %v4381_v62 = vld [vmem:[%s4737_s15 + $0x20] sm:$0xff]  }
 0x165   : > { %1652 = vrot.lane.b32.xlu1 %v4997_v31, %s4542_s6  ;;  %1650 = vrot.lane.b32.xlu0 %v4993_v54, %s4542_s6  ;;  %1246 = vst [vmem:[#allocation2 + $0x18] sm:$0xff] %v1242_v53  ;;  %v3675_v50 = vld [vmem:[#allocation2 + $0x30] sm:$0xf]  ;;  %v3680_v53 = vor.u32 %v4228_v49, %v3677_v43  ;;  %v3669_v15 = vld [vmem:[#allocation2 + $0x28] sm:$0xf0] }
 0x166   : > { %1149 = vmatpush.bf16.msra.mxu2 %v3708_v20  ;;  %1168 = vmatpush.bf16.msra.mxu3 %v3712_v57  ;;  %v3676_v34 = vor.u32 %v4229_v42, %v3675_v50  ;;  %v4227_v56 = vld [vmem:[#allocation2 + $0x24] sm:$0xf0]  ;;  %v3672_v60 = vor.u32 %v4226_v12, %v3669_v15 }
 0x167   : > { %v1250_v63 = vpop.permute.xlu1 %1249  ;;  %v1248_v0 = vpop.permute.xlu0 %1247  ;;  %1666 = vrot.lane.b32.xlu2 %v4979_v27, %s4543_s9  ;;  %v3668_v57 = vor.u32 %v4227_v56, %v3667_v13 }
 0x168   : > { %v1256_v3 = vrot.slane %v1250_v63, 4  ;;  %v1255_v4 = vrot.slane %v1248_v0, 4  ;;  %v5072_v8 = vpop.permute.xlu2 %1293  ;;  %v4364_v63 = vunpack.c.l.b16 %v4381_v62 }
 0x169   : > { %v1298_v61 = vrot.slane %v5072_v8, 4 }
 0x16a   : > { %v1259_v11 = vsel %vm554_vm0, %v1255_v4, %v1256_v3  ;;  %1150 = vmatpush.bf16.msra.mxu2 %v3700_v5  ;;  %1169 = vmatpush.bf16.msra.mxu3 %v3704_v6  ;;  %v3660_v3 = vor.u32 %v5064_v59, %v5058_v52  ;;  %v3664_v4 = vor.u32 %v5056_v51, %v5062_v58  ;;  %v4365_v5 = vunpack.c.h.b16 %v4381_v62 }
 0x16b   : > { %v1260_v55 = vsel %vm577_vm1, %v1248_v0, %v1259_v11  ;;  %v5113_v6 = vpack.c.b16 %v4364_v63, %v4364_v63 }
 0x16c   : > { %1265 = vst [vmem:[#allocation2 + $0x20] sm:$0xff] %v1260_v55  ;;  %v5119_v9 = vpack.c.b16 %v4365_v5, %v4365_v5  ;;  %v5126_v55 = vld [vmem:[%s4731_s8 + $0x48] sm:$0xff] }
 0x16d   : > { %1670 = vrot.lane.b32.xlu1 %v4993_v54, %s4543_s9  ;;  %1668 = vrot.lane.b32.xlu0 %v4974_v30, %s4543_s9 }
 0x16e   : > { %1151 = vmatpush.bf16.msra.mxu2 %v3692_v14  ;;  %1170 = vmatpush.bf16.msra.mxu3 %v3696_v16 }
 0x16f   : > { %v1268_v25 = vpop.permute.xlu1 %1267  ;;  %v1254_v26 = vpop.permute.xlu0 %1253  ;;  %1672 = vrot.lane.b32.xlu2 %v4997_v31, %s4543_s9 }
 0x170   : > { %v1275_v35 = vrot.slane %v1268_v25, 4  ;;  %v1258_v36 = vrot.slane %v1254_v26, 4  ;;  %v5084_v40 = vpop.permute.xlu2 %1311  ;;  %v3573_v26 = vld [vmem:[#allocation2 + $0x8] sm:$0xf0] }
 0x171   : > { %885 = vst [vmem:[#allocation2 + $0x8] sm:$0xff] %v4779_v45 }
 0x172   : > { %v1279_v44 = vsel %vm554_vm0, %v1275_v35, %v1276_v24  ;;  %v1261_v46 = vsel %vm554_vm0, %v1257_v22, %v1258_v36  ;;  %1152 = vmatpush.bf16.msra.mxu2 %v3684_v38  ;;  %1171 = vmatpush.bf16.msra.mxu3 %v3688_v39  ;;  %v4204_v24 = vld [vmem:[#allocation2 + $0x4] sm:$0xf]  ;;  %v1317_v36 = vrot.slane %v5084_v40, 4 }
 0x173   : > { %v1280_v37 = vsel %vm598_vm3, %v1268_v25, %v1279_v44  ;;  %v1262_v47 = vsel %vm577_vm1, %v5029_v19, %v1261_v46  ;;  %v3571_v25 = vld [vmem:[#allocation2] sm:$0xf]  ;;  %v3576_v29 = vor.u32 %v4204_v24, %v3573_v26 }
 0x174   : > { %1285 = vst [vmem:[#allocation2 + $0x30] sm:$0xff] %v1280_v37  ;;  %v3572_v35 = vor.u32 %v4205_v28, %v3571_v25 }
 0x175   : > { %1688 = vrot.lane.b32.xlu1 %v4974_v30, %s4544_s10  ;;  %1686 = vrot.lane.b32.xlu0 %v4979_v27, %s4544_s10  ;;  %1266 = vst [vmem:[#allocation2 + $0x28] sm:$0xff] %v1262_v47 }
 0x176   : > { %1153 = vmatpush.bf16.msra.mxu2 %v3676_v34  ;;  %1172 = vmatpush.bf16.msra.mxu3 %v3680_v53  ;;  %884 = vst [vmem:[#allocation2] sm:$0xff] %v4767_v41 }
 0x177   : > { %v1274_v21 = vpop.permute.xlu1 %1273  ;;  %v1272_v19 = vpop.permute.xlu0 %1271  ;;  %1690 = vrot.lane.b32.xlu2 %v4993_v54, %s4544_s10  ;;  %836 = vmatpush.bf16.msra.mxu1 %v3576_v29 }
 0x178   : > { %v1278_v33 = vrot.slane %v1274_v21, 4  ;;  %v1277_v20 = vrot.slane %v1272_v19, 4  ;;  %817 = vmatpush.bf16.msra.mxu0 %v3572_v35 }
 0x179   : > { %v5098_v0 = vpop.permute.xlu2 %1329 }
 0x17a   : > { %v1281_v30 = vsel %vm554_vm0, %v1277_v20, %v1278_v33  ;;  %1154 = vmatpush.bf16.msra.mxu2 %v3668_v57  ;;  %1173 = vmatpush.bf16.msra.mxu3 %v3672_v60  ;;  %v1336_v38 = vrot.slane %v5098_v0, 4 }
 0x17b   : > { %v1282_v2 = vsel %vm598_vm3, %v1272_v19, %v1281_v30 }
 0x17c   : > { %1286 = vst [vmem:[#allocation2 + $0x38] sm:$0xff] %v1282_v2 }
 0x17d   : > { %1905 = vrot.lane.b32.xlu1 %v5102_v1, %s4538_s14  ;;  %1692 = vrot.lane.b32.xlu0 %v4997_v31, %s4544_s10 }
 0x17e   : > { %1155 = vmatpush.bf16.msra.mxu2 %v3660_v3  ;;  %1174 = vmatpush.bf16.msra.mxu3 %v3664_v4 }
 0x17f   : > { %v1292_v52 = vpop.permute.xlu1 %1291  ;;  %v1290_v59 = vpop.permute.xlu0 %1289  ;;  %1907 = vrot.lane.b32.xlu2 %v5113_v6, %s4538_s14 }
 0x180   : > { %v1297_v51 = vrot.slane %v1292_v52, 4  ;;  %v1296_v58 = vrot.slane %v1290_v59, 4  ;;  %v5187_v59 = vld [vmem:[#allocation2 + $0x10] sm:$0xf] }
 0x181   : > { %v5121_v31 = vpop.permute.xlu2 %1347 }
 0x182   : > { %v1301_v10 = vsel %vm554_vm0, %v1297_v51, %v1298_v61  ;;  %v1299_v11 = vsel %vm554_vm0, %v1295_v7, %v1296_v58  ;;  %v1355_v21 = vrot.slane %v5121_v31, 4 }
 0x183   : > { %v1302_v12 = vsel %vm619_vm4, %v1292_v52, %v1301_v10  ;;  %v1300_v8 = vsel %vm619_vm4, %v5052_v48, %v1299_v11  ;;  %v5190_v10 = vld [vmem:[#allocation2 + $0x14] sm:$0xf] }
 0x184   : > { %1306 = vst [vmem:[#allocation2 + $0x48] sm:$0xff] %v1302_v12 }
 0x185   : > { %1305 = vst [vmem:[#allocation2 + $0x40] sm:$0xff] %v1300_v8  ;;  %1911 = vrot.lane.b32.xlu1 %v5119_v9, %s4538_s14  ;;  %1909 = vrot.lane.b32.xlu0 %v5126_v55, %s4538_s14 }
 0x187   : > { %v1310_v13 = vpop.permute.xlu1 %1309  ;;  %v1308_v14 = vpop.permute.xlu0 %1307  ;;  %1925 = vrot.lane.b32.xlu2 %v5102_v1, %s4539_s18 }
 0x188   : > { %v1316_v16 = vrot.slane %v1310_v13, 4  ;;  %v1315_v17 = vrot.slane %v1308_v14, 4 }
 0x189   : > { %v1354_v18 = vpop.permute.xlu2 %1353 }
 0x18a   : > { %v1319_v22 = vsel %vm554_vm0, %v1315_v17, %v1316_v16  ;;  %v1358_v19 = vrot.slane %v1354_v18, 4 }
 0x18b   : > { %v1320_v48 = vsel %vm640_vm5, %v1308_v14, %v1319_v22 }
 0x18c   : > { %1325 = vst [vmem:[#allocation2 + $0x50] sm:$0xff] %v1320_v48 }
 0x18d   : > { %1929 = vrot.lane.b32.xlu1 %v5126_v55, %s4539_s18  ;;  %1927 = vrot.lane.b32.xlu0 %v5113_v6, %s4539_s18 }
 0x18f   : > { %v1328_v39 = vpop.permute.xlu1 %1327  ;;  %v1314_v42 = vpop.permute.xlu0 %1313  ;;  %1931 = vrot.lane.b32.xlu2 %v5119_v9, %s4539_s18 }
 0x190   : > { %v1335_v43 = vrot.slane %v1328_v39, 4  ;;  %v1318_v44 = vrot.slane %v1314_v42, 4 }
 0x191   : > { %v5149_v46 = vpop.permute.xlu2 %1570 }
 0x192   : > { %v1339_v37 = vsel %vm554_vm0, %v1335_v43, %v1336_v38  ;;  %v1321_v41 = vsel %vm554_vm0, %v1317_v36, %v1318_v44  ;;  %v1576_v14 = vrot.slane %v5149_v46, 4  ;;  %v5203_v44 = vld [vmem:[#allocation2 + $0x14] sm:$0xf0] }
 0x193   : > { %v1340_v47 = vsel %vm661_vm6, %v1328_v39, %v1339_v37  ;;  %v1322_v45 = vsel %vm640_vm5, %v5084_v40, %v1321_v41 }
 0x194   : > { %1345 = vst [vmem:[#allocation2 + $0x60] sm:$0xff] %v1340_v47  ;;  %v3747_v47 = vld [vmem:[#allocation2 + $0x20] sm:$0xf] }
 0x195   : > { %1326 = vst [vmem:[#allocation2 + $0x58] sm:$0xff] %v1322_v45  ;;  %1947 = vrot.lane.b32.xlu1 %v5113_v6, %s4540_s16  ;;  %1945 = vrot.lane.b32.xlu0 %v5102_v1, %s4540_s16  ;;  %v4244_v45 = vld [vmem:[#allocation2 + $0x24] sm:$0xf] }
 0x197   : > { %v1334_v49 = vpop.permute.xlu1 %1333  ;;  %v1332_v50 = vpop.permute.xlu0 %1331  ;;  %1949 = vrot.lane.b32.xlu2 %v5126_v55, %s4540_s16 }
 0x198   : > { %v1338_v34 = vrot.slane %v1334_v49, 4  ;;  %v1337_v53 = vrot.slane %v1332_v50, 4  ;;  %v5208_v49 = vld [vmem:[#allocation2 + $0x18] sm:$0xf0] }
 0x199   : > { %v1589_v15 = vpop.permute.xlu2 %1588 }
 0x19a   : > { %v1341_v56 = vsel %vm554_vm0, %v1337_v53, %v1338_v34  ;;  %v1595_v16 = vrot.slane %v1589_v15, 4  ;;  %v4250_v34 = vld [vmem:[#allocation2 + $0x54] sm:$0xf] }
 0x19b   : > { %v1342_v40 = vsel %vm661_vm6, %v1332_v50, %v1341_v56  ;;  %v3779_v26 = vld [vmem:[#allocation2 + $0x60] sm:$0xf]  ;;  %v4252_v28 = vld [vmem:[#allocation2 + $0x64] sm:$0xf]  ;;  %v3771_v50 = vld [vmem:[#allocation2 + $0x50] sm:$0xf] }
 0x19c   : > { %1346 = vst [vmem:[#allocation2 + $0x68] sm:$0xff] %v1342_v40  ;;  %v4251_v42 = vld [vmem:[#allocation2 + $0x54] sm:$0xf0]  ;;  %v3773_v43 = vld [vmem:[#allocation2 + $0x58] sm:$0xf0] }
 0x19d   : > { %1965 = vrot.lane.b32.xlu1 %v5102_v1, %s4541_s30  ;;  %1951 = vrot.lane.b32.xlu0 %v5119_v9, %s4540_s16  ;;  %v3772_v53 = vor.u32 %v4251_v42, %v3771_v50  ;;  %v3776_v15 = vor.u32 %v4250_v34, %v3773_v43  ;;  %v3763_v56 = vld [vmem:[#allocation2 + $0x40] sm:$0xf]  ;;  %v4248_v40 = vld [vmem:[#allocation2 + $0x44] sm:$0xf]  ;;  %v5250_v42 = vld [vmem:[%s4731_s8 + $0x58] sm:$0xff] }
 0x19f   : > { %v1352_v33 = vpop.permute.xlu1 %1351  ;;  %v1350_v20 = vpop.permute.xlu0 %1349  ;;  %1967 = vrot.lane.b32.xlu2 %v5113_v6, %s4541_s30 }
 0x1a0   : > { %v1357_v57 = vrot.slane %v1352_v33, 4  ;;  %v1356_v60 = vrot.slane %v1350_v20, 4 }
 0x1a1   : > { %v5171_v62 = vpop.permute.xlu2 %1606 }
 0x1a2   : > { %v1361_v63 = vsel %vm554_vm0, %v1357_v57, %v1358_v19  ;;  %v1359_v0 = vsel %vm554_vm0, %v1355_v21, %v1356_v60  ;;  %v3765_v21 = vld [vmem:[#allocation2 + $0x48] sm:$0xf0] }
 0x1a3   : > { %v1362_v30 = vsel %vm682_vm7, %v1352_v33, %v1361_v63  ;;  %v1360_v2 = vsel %vm682_vm7, %v5121_v31, %v1359_v0  ;;  %v4253_v17 = vld [vmem:[#allocation2 + $0x64] sm:$0xf0]  ;;  %v3781_v18 = vld [vmem:[#allocation2 + $0x68] sm:$0xf0]  ;;  %v3768_v63 = vor.u32 %v4248_v40, %v3765_v21 }
 0x1a4   : > { %1366 = vst [vmem:[#allocation2 + $0x78] sm:$0xff] %v1362_v30  ;;  %v3780_v29 = vor.u32 %v4253_v17, %v3779_v26  ;;  %v3784_v35 = vor.u32 %v4252_v28, %v3781_v18  ;;  %v5236_v26 = vld [vmem:[%s4731_s8 + $0x50] sm:$0xff] }
 0x1a5   : > { %1365 = vst [vmem:[#allocation2 + $0x70] sm:$0xff] %v1360_v2  ;;  %2027 = vrot.lane.b32.xlu1 %v5113_v6, %s4544_s10  ;;  %2025 = vrot.lane.b32.xlu0 %v5102_v1, %s4544_s10  ;;  %v4247_v2 = vld [vmem:[#allocation2 + $0x34] sm:$0xf0] }
 0x1a7   : > { %v1569_v3 = vpop.permute.xlu1 %1568  ;;  %v1567_v4 = vpop.permute.xlu0 %1566  ;;  %2029 = vrot.lane.b32.xlu2 %v5126_v55, %s4544_s10 }
 0x1a8   : > { %v1575_v5 = vrot.slane %v1569_v3, 4  ;;  %v1574_v7 = vrot.slane %v1567_v4, 4  ;;  %v3757_v3 = vld [vmem:[#allocation2 + $0x38] sm:$0xf0] }
 0x1a9   : > { %v5184_v61 = vpop.permute.xlu2 %1612 }
 0x1aa   : > { %v1578_v52 = vsel %vm554_vm0, %v1574_v7, %v1575_v5  ;;  %v4245_v7 = vld [vmem:[#allocation2 + $0x24] sm:$0xf0] }
 0x1ab   : > { %v1579_v51 = vsel %vm556_vm2, %v1567_v4, %v1578_v52  ;;  %v4255_v58 = vld [vmem:[#allocation2 + $0x74] sm:$0xf0]  ;;  %v3789_v31 = vld [vmem:[#allocation2 + $0x78] sm:$0xf0]  ;;  %v4382_v4 = vld [vmem:[%s4737_s15 + $0x28] sm:$0xff]  }
 0x1ac   : > { %v3787_v11 = vld [vmem:[#allocation2 + $0x70] sm:$0xf]  ;;  %v4254_v12 = vld [vmem:[#allocation2 + $0x74] sm:$0xf]  ;;  %1584 = vst [vmem:[#allocation2 + $0x10] sm:$0xff] %v1579_v51 }
 0x1ad   : > { %2005 = vrot.lane.b32.xlu1 %v5102_v1, %s4543_s9  ;;  %2031 = vrot.lane.b32.xlu0 %v5119_v9, %s4544_s10  ;;  %v3788_v8 = vor.u32 %v4255_v58, %v3787_v11  ;;  %v3792_v13 = vor.u32 %v4254_v12, %v3789_v31  ;;  %v3749_v52 = vld [vmem:[#allocation2 + $0x28] sm:$0xf0]  ;;  %v3755_v51 = vld [vmem:[#allocation2 + $0x30] sm:$0xf]  ;;  %v4246_v58 = vld [vmem:[#allocation2 + $0x34] sm:$0xf]  ;;  %v4368_v12 = vunpack.c.l.b16 %v4382_v4 }
 0x1ae   : > { %v3756_v31 = vor.u32 %v4247_v2, %v3755_v51  ;;  %v3760_v11 = vor.u32 %v4246_v58, %v3757_v3  ;;  %v3653_v2 = vld [vmem:[#allocation2 + $0x8] sm:$0xf0] }
 0x1af   : > { %1488 = vmatpush.bf16.msrb.mxu0 %v3788_v8  ;;  %1507 = vmatpush.bf16.msrb.mxu1 %v3792_v13  ;;  %v1587_v22 = vpop.permute.xlu1 %1586  ;;  %v1573_v48 = vpop.permute.xlu0 %1572  ;;  %v1614_v8 = vrot.slane %v5171_v62, 4  ;;  %v1617_v13 = vrot.slane %v5184_v61, 4 }
 0x1b0   : > { %v1594_v24 = vrot.slane %v1587_v22, 4  ;;  %v1577_v25 = vrot.slane %v1573_v48, 4  ;;  %2007 = vrot.lane.b32.xlu2 %v5113_v6, %s4543_s9  ;;  %v3752_v48 = vor.u32 %v4244_v45, %v3749_v52 }
 0x1b1   : > { %v5199_v36 = vpop.permute.xlu2 %1630 }
 0x1b2   : > { %v1598_v38 = vsel %vm554_vm0, %v1594_v24, %v1595_v16  ;;  %v1580_v39 = vsel %vm554_vm0, %v1576_v14, %v1577_v25 }
 0x1b3   : > { %v1599_v37 = vsel %vm577_vm1, %v1587_v22, %v1598_v38  ;;  %v1581_v41 = vsel %vm556_vm2, %v5149_v46, %v1580_v39  ;;  %1489 = vmatpush.bf16.msrb.mxu0 %v3780_v29  ;;  %1508 = vmatpush.bf16.msrb.mxu1 %v3784_v35  ;;  %v4249_v46 = vld [vmem:[#allocation2 + $0x44] sm:$0xf0]  ;;  %v3748_v22 = vor.u32 %v4245_v7, %v3747_v47  ;;  %v4369_v39 = vunpack.c.h.b16 %v4382_v4 }
 0x1b4   : > { %1604 = vst [vmem:[#allocation2 + $0x20] sm:$0xff] %v1599_v37  ;;  %v3764_v60 = vor.u32 %v4249_v46, %v3763_v56  ;;  %v3740_v35 = vor.u32 %v5203_v44, %v5187_v59  ;;  %v3744_v38 = vor.u32 %v5190_v10, %v5208_v49  ;;  %v1636_v10 = vrot.slane %v5199_v36, 4 }
 0x1b5   : > { %2011 = vrot.lane.b32.xlu1 %v5119_v9, %s4543_s9  ;;  %2009 = vrot.lane.b32.xlu0 %v5126_v55, %s4543_s9  ;;  %1585 = vst [vmem:[#allocation2 + $0x18] sm:$0xff] %v1581_v41  ;;  %v5254_v47 = vpack.c.b16 %v4369_v39, %v4369_v39 }
 0x1b7   : > { %1490 = vmatpush.bf16.msrb.mxu0 %v3772_v53  ;;  %1509 = vmatpush.bf16.msrb.mxu1 %v3776_v15  ;;  %v1593_v19 = vpop.permute.xlu1 %1592  ;;  %v1591_v33 = vpop.permute.xlu0 %1590 }
 0x1b8   : > { %v1597_v20 = vrot.slane %v1593_v19, 4  ;;  %v1596_v57 = vrot.slane %v1591_v33, 4  ;;  %1985 = vrot.lane.b32.xlu2 %v5102_v1, %s4542_s6 }
 0x1b9   : > { %v5216_v0 = vpop.permute.xlu2 %1648 }
 0x1ba   : > { %v1600_v30 = vsel %vm554_vm0, %v1596_v57, %v1597_v20  ;;  %v1655_v49 = vrot.slane %v5216_v0, 4  ;;  %v4222_v0 = vld [vmem:[#allocation2 + $0x4] sm:$0xf] }
 0x1bb   : > { %v1601_v5 = vsel %vm577_vm1, %v1591_v33, %v1600_v30  ;;  %1491 = vmatpush.bf16.msrb.mxu0 %v3764_v60  ;;  %1510 = vmatpush.bf16.msrb.mxu1 %v3768_v63  ;;  %v3651_v30 = vld [vmem:[#allocation2] sm:$0xf]  ;;  %v3656_v7 = vor.u32 %v4222_v0, %v3653_v2 }
 0x1bc   : > { %1605 = vst [vmem:[#allocation2 + $0x28] sm:$0xff] %v1601_v5  ;;  %v4223_v5 = vld [vmem:[#allocation2 + $0x4] sm:$0xf0] }
 0x1bd   : > { %1989 = vrot.lane.b32.xlu1 %v5126_v55, %s4542_s6  ;;  %1987 = vrot.lane.b32.xlu0 %v5113_v6, %s4542_s6  ;;  %v5229_v6 = vpack.c.b16 %v4368_v12, %v4368_v12  ;;  %1223 = vst [vmem:[#allocation2] sm:$0xff] %v4851_v23  ;;  %v3652_v58 = vor.u32 %v4223_v5, %v3651_v30 }
 0x1be   : > { %1224 = vst [vmem:[#allocation2 + $0x8] sm:$0xff] %v4859_v32  ;;  %1175 = vmatpush.bf16.msra.mxu3 %v3656_v7 }
 0x1bf   : > { %1492 = vmatpush.bf16.msrb.mxu0 %v3756_v31  ;;  %1511 = vmatpush.bf16.msrb.mxu1 %v3760_v11  ;;  %v1611_v14 = vpop.permute.xlu1 %1610  ;;  %v1609_v16 = vpop.permute.xlu0 %1608 }
 0x1c0   : > { %v1616_v17 = vrot.slane %v1611_v14, 4  ;;  %v1615_v18 = vrot.slane %v1609_v16, 4  ;;  %1991 = vrot.lane.b32.xlu2 %v5119_v9, %s4542_s6  ;;  %1156 = vmatpush.bf16.msra.mxu2 %v3652_v58 }
 0x1c1   : > { %v5231_v24 = vpop.permute.xlu2 %1666 }
 0x1c2   : > { %v1620_v25 = vsel %vm554_vm0, %v1616_v17, %v1617_v13  ;;  %v1618_v61 = vsel %vm554_vm0, %v1614_v8, %v1615_v18  ;;  %v1674_v3 = vrot.slane %v5231_v24, 4 }
 0x1c3   : > { %v1621_v28 = vsel %vm598_vm3, %v1611_v14, %v1620_v25  ;;  %v1619_v29 = vsel %vm598_vm3, %v5171_v62, %v1618_v61  ;;  %1493 = vmatpush.bf16.msrb.mxu0 %v3748_v22  ;;  %1512 = vmatpush.bf16.msrb.mxu1 %v3752_v48 }
 0x1c4   : > { %1625 = vst [vmem:[#allocation2 + $0x38] sm:$0xff] %v1621_v28 }
 0x1c5   : > { %1624 = vst [vmem:[#allocation2 + $0x30] sm:$0xff] %v1619_v29  ;;  %2366 = vrot.lane.b32.xlu1 %v5229_v6, %s4544_s10  ;;  %2364 = vrot.lane.b32.xlu0 %v5236_v26, %s4544_s10 }
 0x1c7   : > { %1494 = vmatpush.bf16.msrb.mxu0 %v3740_v35  ;;  %1513 = vmatpush.bf16.msrb.mxu1 %v3744_v38  ;;  %v1629_v62 = vpop.permute.xlu1 %1628  ;;  %v1627_v43 = vpop.permute.xlu0 %1626 }
 0x1c8   : > { %v1635_v37 = vrot.slane %v1629_v62, 4  ;;  %v1634_v41 = vrot.slane %v1627_v43, 4  ;;  %2368 = vrot.lane.b32.xlu2 %v5250_v42, %s4544_s10 }
 0x1c9   : > { %v1673_v45 = vpop.permute.xlu2 %1672 }
 0x1ca   : > { %v1638_v59 = vsel %vm554_vm0, %v1634_v41, %v1635_v37  ;;  %v1677_v4 = vrot.slane %v1673_v45, 4  ;;  %v5321_v45 = vld [vmem:[#allocation2 + $0x10] sm:$0xf] }
 0x1cb   : > { %v1639_v44 = vsel %vm619_vm4, %v1627_v43, %v1638_v59  ;;  %v5323_v59 = vld [vmem:[#allocation2 + $0x14] sm:$0xf] }
 0x1cc   : > { %1644 = vst [vmem:[#allocation2 + $0x40] sm:$0xff] %v1639_v44 }
 0x1cd   : > { %1969 = vrot.lane.b32.xlu1 %v5126_v55, %s4541_s30  ;;  %2370 = vrot.lane.b32.xlu0 %v5254_v47, %s4544_s10 }
 0x1cf   : > { %v1647_v50 = vpop.permute.xlu1 %1646  ;;  %v1633_v34 = vpop.permute.xlu0 %1632 }
 0x1d0   : > { %v1654_v53 = vrot.slane %v1647_v50, 4  ;;  %v1637_v15 = vrot.slane %v1633_v34, 4  ;;  %1971 = vrot.lane.b32.xlu2 %v5119_v9, %s4541_s30 }
 0x1d1   : > { %v5266_v56 = vpop.permute.xlu2 %1690 }
 0x1d2   : > { %v1658_v46 = vsel %vm554_vm0, %v1654_v53, %v1655_v49  ;;  %v1640_v40 = vsel %vm554_vm0, %v1636_v10, %v1637_v15  ;;  %v1696_v25 = vrot.slane %v5266_v56, 4 }
 0x1d3   : > { %v1659_v21 = vsel %vm640_vm5, %v1647_v50, %v1658_v46  ;;  %v1641_v19 = vsel %vm619_vm4, %v5199_v36, %v1640_v40  ;;  %v5336_v46 = vld [vmem:[#allocation2 + $0x18] sm:$0xf0] }
 0x1d4   : > { %1664 = vst [vmem:[#allocation2 + $0x50] sm:$0xff] %v1659_v21 }
 0x1d5   : > { %1645 = vst [vmem:[#allocation2 + $0x48] sm:$0xff] %v1641_v19  ;;  %2346 = vrot.lane.b32.xlu1 %v5229_v6, %s4543_s9  ;;  %2344 = vrot.lane.b32.xlu0 %v5236_v26, %s4543_s9 }
 0x1d7   : > { %v1653_v9 = vpop.permute.xlu1 %1652  ;;  %v1651_v33 = vpop.permute.xlu0 %1650 }
 0x1d8   : > { %v1657_v20 = vrot.slane %v1653_v9, 4  ;;  %v1656_v57 = vrot.slane %v1651_v33, 4  ;;  %2348 = vrot.lane.b32.xlu2 %v5250_v42, %s4543_s9 }
 0x1d9   : > { %v1908_v60 = vpop.permute.xlu2 %1907 }
 0x1da   : > { %v1660_v63 = vsel %vm554_vm0, %v1656_v57, %v1657_v20  ;;  %v1914_v61 = vrot.slane %v1908_v60, 4 }
 0x1db   : > { %v1661_v36 = vsel %vm640_vm5, %v1651_v33, %v1660_v63 }
 0x1dc   : > { %1665 = vst [vmem:[#allocation2 + $0x58] sm:$0xff] %v1661_v36 }
 0x1dd   : > { %2324 = vrot.lane.b32.xlu1 %v5236_v26, %s4542_s6  ;;  %2350 = vrot.lane.b32.xlu0 %v5254_v47, %s4543_s9 }
 0x1df   : > { %v1671_v52 = vpop.permute.xlu1 %1670  ;;  %v1669_v51 = vpop.permute.xlu0 %1668 }
 0x1e0   : > { %v1676_v31 = vrot.slane %v1671_v52, 4  ;;  %v1675_v11 = vrot.slane %v1669_v51, 4  ;;  %2326 = vrot.lane.b32.xlu2 %v5229_v6, %s4542_s6 }
 0x1e1   : > { %v5290_v12 = vpop.permute.xlu2 %1925 }
 0x1e2   : > { %v1680_v8 = vsel %vm554_vm0, %v1676_v31, %v1677_v4  ;;  %v1678_v13 = vsel %vm554_vm0, %v1674_v3, %v1675_v11  ;;  %v1933_v0 = vrot.slane %v5290_v12, 4 }
 0x1e3   : > { %v1681_v23 = vsel %vm661_vm6, %v1671_v52, %v1680_v8  ;;  %v1679_v14 = vsel %vm661_vm6, %v5231_v24, %v1678_v13  ;;  %v4269_v51 = vld [vmem:[#allocation2 + $0x54] sm:$0xf0]  ;;  %v3853_v58 = vld [vmem:[#allocation2 + $0x58] sm:$0xf0]  ;;  %v5351_v13 = vld [vmem:[#allocation2 + $0x20] sm:$0xf] }
 0x1e4   : > { %1685 = vst [vmem:[#allocation2 + $0x68] sm:$0xff] %v1681_v23 }
 0x1e5   : > { %1684 = vst [vmem:[#allocation2 + $0x60] sm:$0xff] %v1679_v14  ;;  %2330 = vrot.lane.b32.xlu1 %v5254_v47, %s4542_s6  ;;  %2328 = vrot.lane.b32.xlu0 %v5250_v42, %s4542_s6 }
 0x1e7   : > { %v1689_v32 = vpop.permute.xlu1 %1688  ;;  %v1687_v16 = vpop.permute.xlu0 %1686 }
 0x1e8   : > { %v1695_v17 = vrot.slane %v1689_v32, 4  ;;  %v1694_v18 = vrot.slane %v1687_v16, 4  ;;  %2304 = vrot.lane.b32.xlu2 %v5236_v26, %s4541_s30  ;;  %v3851_v32 = vld [vmem:[#allocation2 + $0x50] sm:$0xf] }
 0x1e9   : > { %v5303_v22 = vpop.permute.xlu2 %1931 }
 0x1ea   : > { %v1698_v48 = vsel %vm554_vm0, %v1694_v18, %v1695_v17  ;;  %v1936_v30 = vrot.slane %v5303_v22, 4  ;;  %v5356_v17 = vld [vmem:[#allocation2 + $0x24] sm:$0xf]  ;;  %v3852_v18 = vor.u32 %v4269_v51, %v3851_v32  ;;  %v5405_v32 = vld [vmem:[%s4731_s8 + $0x68] sm:$0xff] }
 0x1eb   : > { %v1699_v24 = vsel %vm682_vm7, %v1687_v16, %v1698_v48  ;;  %v4271_v57 = vld [vmem:[#allocation2 + $0x64] sm:$0xf0]  ;;  %v3861_v36 = vld [vmem:[#allocation2 + $0x68] sm:$0xf0]  ;;  %v4268_v16 = vld [vmem:[#allocation2 + $0x54] sm:$0xf] }
 0x1ec   : > { %1704 = vst [vmem:[#allocation2 + $0x70] sm:$0xff] %v1699_v24  ;;  %v3859_v60 = vld [vmem:[#allocation2 + $0x60] sm:$0xf]  ;;  %v4270_v63 = vld [vmem:[#allocation2 + $0x64] sm:$0xf]  ;;  %v3856_v22 = vor.u32 %v4268_v16, %v3853_v58 }
 0x1ed   : > { %2308 = vrot.lane.b32.xlu1 %v5250_v42, %s4541_s30  ;;  %2306 = vrot.lane.b32.xlu0 %v5229_v6, %s4541_s30  ;;  %v3860_v7 = vor.u32 %v4271_v57, %v3859_v60  ;;  %v3864_v52 = vor.u32 %v4270_v63, %v3861_v36  ;;  %v4263_v48 = vld [vmem:[#allocation2 + $0x24] sm:$0xf0]  ;;  %v3829_v24 = vld [vmem:[#allocation2 + $0x28] sm:$0xf0]  ;;  %v4240_v57 = vld [vmem:[#allocation2 + $0x4] sm:$0xf] }
 0x1ef   : > { %v1906_v28 = vpop.permute.xlu1 %1905  ;;  %v1693_v29 = vpop.permute.xlu0 %1692 }
 0x1f0   : > { %v1913_v35 = vrot.slane %v1906_v28, 4  ;;  %v1697_v38 = vrot.slane %v1693_v29, 4  ;;  %2310 = vrot.lane.b32.xlu2 %v5254_v47, %s4541_s30  ;;  %v3843_v29 = vld [vmem:[#allocation2 + $0x40] sm:$0xf] }
 0x1f1   : > { %v5314_v39 = vpop.permute.xlu2 %1949 }
 0x1f2   : > { %v1917_v62 = vsel %vm554_vm0, %v1913_v35, %v1914_v61  ;;  %v1700_v43 = vsel %vm554_vm0, %v1696_v25, %v1697_v38  ;;  %v4267_v25 = vld [vmem:[#allocation2 + $0x44] sm:$0xf0]  ;;  %v3845_v61 = vld [vmem:[#allocation2 + $0x48] sm:$0xf0]  ;;  %v4266_v35 = vld [vmem:[#allocation2 + $0x44] sm:$0xf] }
 0x1f3   : > { %v1918_v37 = vsel %vm556_vm2, %v1906_v28, %v1917_v62  ;;  %v1701_v41 = vsel %vm682_vm7, %v5266_v56, %v1700_v43  ;;  %v3867_v15 = vld [vmem:[#allocation2 + $0x70] sm:$0xf]  ;;  %v5334_v56 = vld [vmem:[#allocation2 + $0x14] sm:$0xf0]  ;;  %v4272_v19 = vld [vmem:[#allocation2 + $0x74] sm:$0xf]  ;;  %v3844_v43 = vor.u32 %v4267_v25, %v3843_v29 }
 0x1f4   : > { %1705 = vst [vmem:[#allocation2 + $0x78] sm:$0xff] %v1701_v41  ;;  %v4265_v41 = vld [vmem:[#allocation2 + $0x34] sm:$0xf0]  ;;  %v1955_v60 = vrot.slane %v5314_v39, 4 }
 0x1f5   : > { %2286 = vrot.lane.b32.xlu1 %v5229_v6, %s4540_s16  ;;  %2284 = vrot.lane.b32.xlu0 %v5236_v26, %s4540_s16  ;;  %1923 = vst [vmem:[#allocation2 + $0x10] sm:$0xff] %v1918_v37  ;;  %v3848_v37 = vor.u32 %v4266_v35, %v3845_v61 }
 0x1f7   : > { %v1912_v44 = vpop.permute.xlu1 %1911  ;;  %v1910_v10 = vpop.permute.xlu0 %1909 }
 0x1f8   : > { %v1916_v49 = vrot.slane %v1912_v44, 4  ;;  %v1915_v50 = vrot.slane %v1910_v10, 4  ;;  %2288 = vrot.lane.b32.xlu2 %v5250_v42, %s4540_s16  ;;  %v3835_v44 = vld [vmem:[#allocation2 + $0x30] sm:$0xf] }
 0x1f9   : > { %v5331_v34 = vpop.permute.xlu2 %1967 }
 0x1fa   : > { %v1919_v53 = vsel %vm554_vm0, %v1915_v50, %v1916_v49  ;;  %v3837_v49 = vld [vmem:[#allocation2 + $0x38] sm:$0xf0]  ;;  %v1974_v63 = vrot.slane %v5331_v34, 4  ;;  %v3832_v34 = vor.u32 %v5356_v17, %v3829_v24 }
 0x1fb   : > { %v1920_v40 = vsel %vm556_vm2, %v1910_v10, %v1919_v53  ;;  %v4273_v21 = vld [vmem:[#allocation2 + $0x74] sm:$0xf0]  ;;  %v3869_v9 = vld [vmem:[#allocation2 + $0x78] sm:$0xf0]  ;;  %v4264_v10 = vld [vmem:[#allocation2 + $0x34] sm:$0xf] }
 0x1fc   : > { %v3868_v33 = vor.u32 %v4273_v21, %v3867_v15  ;;  %v3872_v20 = vor.u32 %v4272_v19, %v3869_v9  ;;  %1924 = vst [vmem:[#allocation2 + $0x18] sm:$0xff] %v1920_v40  ;;  %v4383_v53 = vld [vmem:[%s4737_s15 + $0x30] sm:$0xff]   ;;  %v3836_v21 = vor.u32 %v4265_v41, %v3835_v44  ;;  %v3840_v19 = vor.u32 %v4264_v10, %v3837_v49  ;;  %v4384_v10 = vld [vmem:[%s4737_s15 + $0x38] sm:$0xff]  }
 0x1fd   : > { %2264 = vrot.lane.b32.xlu1 %v5236_v26, %s4539_s18  ;;  %2290 = vrot.lane.b32.xlu0 %v5254_v47, %s4540_s16  ;;  %v4372_v9 = vunpack.c.l.b16 %v4383_v53 }
 0x1fe   : > { %1827 = vmatpush.bf16.msrb.mxu2 %v3868_v33  ;;  %1846 = vmatpush.bf16.msrb.mxu3 %v3872_v20  ;;  %v3731_v33 = vld [vmem:[#allocation2] sm:$0xf]  ;;  %v4241_v20 = vld [vmem:[#allocation2 + $0x4] sm:$0xf0] }
 0x1ff   : > { %v1930_v2 = vpop.permute.xlu1 %1929  ;;  %v1928_v3 = vpop.permute.xlu0 %1927  ;;  %v3732_v36 = vor.u32 %v4241_v20, %v3731_v33  ;;  %1562 = vst [vmem:[#allocation2] sm:$0xff] %v4979_v27  ;;  %v5384_v27 = vpack.c.b16 %v4372_v9, %v4372_v9  ;;  %v4376_v9 = vunpack.c.l.b16 %v4384_v10 }
 0x200   : > { %v1935_v4 = vrot.slane %v1930_v2, 4  ;;  %v1934_v5 = vrot.slane %v1928_v3, 4  ;;  %2266 = vrot.lane.b32.xlu2 %v5229_v6, %s4539_s18 }
 0x201   : > { %v5347_v31 = vpop.permute.xlu2 %2029  ;;  %1495 = vmatpush.bf16.msrb.mxu0 %v3732_v36 }
 0x202   : > { %v1939_v11 = vsel %vm554_vm0, %v1935_v4, %v1936_v30  ;;  %v1937_v8 = vsel %vm554_vm0, %v1933_v0, %v1934_v5  ;;  %1828 = vmatpush.bf16.msrb.mxu2 %v3860_v7  ;;  %1847 = vmatpush.bf16.msrb.mxu3 %v3864_v52  ;;  %v3733_v0 = vld [vmem:[#allocation2 + $0x8] sm:$0xf0]  ;;  %v4202_v30 = vld [vmem:[%s5911_s2] sm:$0xff]  ;;  %v3828_v7 = vor.u32 %v4263_v48, %v5351_v13 }
 0x203   : > { %v1940_v23 = vsel %vm577_vm1, %v1930_v2, %v1939_v11  ;;  %v1938_v14 = vsel %vm577_vm1, %v5290_v12, %v1937_v8  ;;  %v3736_v3 = vor.u32 %v4240_v57, %v3733_v0  ;;  %1563 = vst [vmem:[#allocation2 + $0x8] sm:$0xff] %v4993_v54  ;;  %818 = vmatmul.bf16.vlgmr.msra.gmra.mxu0 %v4202_v30  ;;  %v5389_v54 = vld [vmem:[%s4731_s8 + $0x60] sm:$0xff] }
 0x204   : > { %1943 = vst [vmem:[#allocation2 + $0x20] sm:$0xff] %v1938_v14  ;;  %837 = vmatmul.bf16.vlgmr.msra.gmra.mxu1 %v4202_v30  ;;  %v3820_v8 = vor.u32 %v5334_v56, %v5321_v45  ;;  %v3824_v13 = vor.u32 %v5323_v59, %v5336_v46  ;;  %v4220_v30 = vld [vmem:[%s5911_s2 + $0x10] sm:$0xff] }
 0x205   : > { %2270 = vrot.lane.b32.xlu1 %v5254_v47, %s4539_s18  ;;  %2268 = vrot.lane.b32.xlu0 %v5250_v42, %s4539_s18  ;;  %1944 = vst [vmem:[#allocation2 + $0x28] sm:$0xff] %v1940_v23  ;;  %v4373_v23 = vunpack.c.h.b16 %v4383_v53 }
 0x206   : > { %1829 = vmatpush.bf16.msrb.mxu2 %v3852_v18  ;;  %1848 = vmatpush.bf16.msrb.mxu3 %v3856_v22  ;;  %v2035_v18 = vrot.slane %v5347_v31, 4  ;;  %v3811_v33 = vld [vmem:[#allocation2] sm:$0xf]  ;;  %v4258_v57 = vld [vmem:[#allocation2 + $0x4] sm:$0xf] }
 0x207   : > { %v1948_v12 = vpop.permute.xlu1 %1947  ;;  %v1946_v28 = vpop.permute.xlu0 %1945  ;;  %1514 = vmatpush.bf16.msrb.mxu1 %v3736_v3  ;;  %v5409_v45 = vpack.c.b16 %v4373_v23, %v4373_v23  ;;  %1901 = vst [vmem:[#allocation2] sm:$0xff] %v5102_v1  ;;  %1157 = vmatmul.bf16.vlgmr.msra.gmra.mxu2 %v4220_v30 }
 0x208   : > { %v1954_v38 = vrot.slane %v1948_v12, 4  ;;  %v1953_v62 = vrot.slane %v1946_v28, 4  ;;  %2244 = vrot.lane.b32.xlu2 %v5236_v26, %s4538_s14  ;;  %1176 = vmatmul.bf16.vlgmr.msra.gmra.mxu3 %v4220_v30 }
 0x20a   : > { %v1957_v50 = vsel %vm554_vm0, %v1953_v62, %v1954_v38  ;;  %1830 = vmatpush.bf16.msrb.mxu2 %v3844_v43  ;;  %1849 = vmatpush.bf16.msrb.mxu3 %v3848_v37  ;;  %v5366_v15 = vpop.permute.xlu2 %2007  ;;  %v4259_v20 = vld [vmem:[#allocation2 + $0x4] sm:$0xf0]  ;;  %v3813_v0 = vld [vmem:[#allocation2 + $0x8] sm:$0xf0] }
 0x20b   : > { %v1958_v40 = vsel %vm598_vm3, %v1946_v28, %v1957_v50  ;;  %v2014_v22 = vrot.slane %v5366_v15, 4  ;;  %v3812_v36 = vor.u32 %v4259_v20, %v3811_v33  ;;  %v3816_v3 = vor.u32 %v4258_v57, %v3813_v0  ;;  %1902 = vst [vmem:[#allocation2 + $0x8] sm:$0xff] %v5126_v55 }
 0x20c   : > { %1963 = vst [vmem:[#allocation2 + $0x30] sm:$0xff] %v1958_v40 }
 0x20d   : > { %2248 = vrot.lane.b32.xlu1 %v5250_v42, %s4538_s14  ;;  %2246 = vrot.lane.b32.xlu0 %v5229_v6, %s4538_s14 }
 0x20e   : > { %1831 = vmatpush.bf16.msrb.mxu2 %v3836_v21  ;;  %1850 = vmatpush.bf16.msrb.mxu3 %v3840_v19 }
 0x20f   : > { %v1966_v2 = vpop.permute.xlu1 %1965  ;;  %v1952_v6 = vpop.permute.xlu0 %1951 }
 0x210   : > { %v1973_v4 = vrot.slane %v1966_v2, 4  ;;  %v1956_v5 = vrot.slane %v1952_v6, 4  ;;  %2250 = vrot.lane.b32.xlu2 %v5254_v47, %s4538_s14 }
 0x212   : > { %v1977_v52 = vsel %vm554_vm0, %v1973_v4, %v1974_v63  ;;  %v1959_v51 = vsel %vm554_vm0, %v1955_v60, %v1956_v5  ;;  %1832 = vmatpush.bf16.msrb.mxu2 %v3828_v7  ;;  %1851 = vmatpush.bf16.msrb.mxu3 %v3832_v34  ;;  %v5391_v58 = vpop.permute.xlu2 %1985  ;;  %v5454_v7 = vpack.c.b16 %v4376_v9, %v4376_v9 }
 0x213   : > { %v1978_v11 = vsel %vm619_vm4, %v1966_v2, %v1977_v52  ;;  %v1960_v47 = vsel %vm598_vm3, %v5314_v39, %v1959_v51  ;;  %v1993_v60 = vrot.slane %v5391_v58, 4  ;;  %v5459_v52 = vld [vmem:[%s4731_s8 + $0x70] sm:$0xff] }
 0x214   : > { %1983 = vst [vmem:[#allocation2 + $0x40] sm:$0xff] %v1978_v11 }
 0x215   : > { %1964 = vst [vmem:[#allocation2 + $0x38] sm:$0xff] %v1960_v47  ;;  %2705 = vrot.lane.b32.xlu1 %v5384_v27, %s4544_s10  ;;  %2703 = vrot.lane.b32.xlu0 %v5389_v54, %s4544_s10 }
 0x216   : > { %1833 = vmatpush.bf16.msrb.mxu2 %v3820_v8  ;;  %1852 = vmatpush.bf16.msrb.mxu3 %v3824_v13 }
 0x217   : > { %v2028_v14 = vpop.permute.xlu1 %2027  ;;  %v2026_v39 = vpop.permute.xlu0 %2025 }
 0x218   : > { %v2034_v16 = vrot.slane %v2028_v14, 4  ;;  %v2033_v17 = vrot.slane %v2026_v39, 4  ;;  %2707 = vrot.lane.b32.xlu2 %v5405_v32, %s4544_s10 }
 0x21a   : > { %v2037_v59 = vsel %vm554_vm0, %v2033_v17, %v2034_v16  ;;  %v5412_v56 = vpop.permute.xlu2 %1991  ;;  %1834 = vmatpush.bf16.msrb.mxu2 %v3812_v36  ;;  %1853 = vmatpush.bf16.msrb.mxu3 %v3816_v3  ;;  %v4377_v16 = vunpack.c.h.b16 %v4384_v10  ;;  %v5471_v17 = vld [vmem:[%s4731_s8 + $0x78] sm:$0xff] }
 0x21b   : > { %v2038_v46 = vsel %vm682_vm7, %v2026_v39, %v2037_v59  ;;  %v1996_v63 = vrot.slane %v5412_v56, 4  ;;  %v3923_v20 = vld [vmem:[#allocation2 + $0x40] sm:$0xf]  ;;  %v4284_v57 = vld [vmem:[#allocation2 + $0x44] sm:$0xf] }
 0x21c   : > { %2043 = vst [vmem:[#allocation2 + $0x70] sm:$0xff] %v2038_v46 }
 0x21d   : > { %2683 = vrot.lane.b32.xlu1 %v5389_v54, %s4543_s9  ;;  %2709 = vrot.lane.b32.xlu0 %v5409_v45, %s4544_s10 }
 0x21f   : > { %v2006_v48 = vpop.permute.xlu1 %2005  ;;  %v2032_v24 = vpop.permute.xlu0 %2031 }
 0x220   : > { %v2013_v25 = vrot.slane %v2006_v48, 4  ;;  %v2036_v61 = vrot.slane %v2032_v24, 4  ;;  %2685 = vrot.lane.b32.xlu2 %v5384_v27, %s4543_s9 }
 0x222   : > { %v2017_v12 = vsel %vm554_vm0, %v2013_v25, %v2014_v22  ;;  %v2039_v28 = vsel %vm554_vm0, %v2035_v18, %v2036_v61  ;;  %v5425_v29 = vpop.permute.xlu2 %2368  ;;  %v5475_v18 = vpack.c.b16 %v4377_v16, %v4377_v16 }
 0x223   : > { %v2018_v35 = vsel %vm661_vm6, %v2006_v48, %v2017_v12  ;;  %v2040_v38 = vsel %vm682_vm7, %v5347_v31, %v2039_v28  ;;  %v3947_v50 = vld [vmem:[#allocation2 + $0x70] sm:$0xf]  ;;  %v4290_v53 = vld [vmem:[#allocation2 + $0x74] sm:$0xf] }
 0x224   : > { %2023 = vst [vmem:[#allocation2 + $0x60] sm:$0xff] %v2018_v35 }
 0x225   : > { %2044 = vst [vmem:[#allocation2 + $0x78] sm:$0xff] %v2040_v38  ;;  %2689 = vrot.lane.b32.xlu1 %v5409_v45, %s4543_s9  ;;  %2687 = vrot.lane.b32.xlu0 %v5405_v32, %s4543_s9 }
 0x227   : > { %v2012_v62 = vpop.permute.xlu1 %2011  ;;  %v2010_v43 = vpop.permute.xlu0 %2009 }
 0x228   : > { %v2016_v37 = vrot.slane %v2012_v62, 4  ;;  %v2015_v41 = vrot.slane %v2010_v43, 4  ;;  %2663 = vrot.lane.b32.xlu2 %v5389_v54, %s4542_s6  ;;  %v2374_v62 = vrot.slane %v5425_v29, 4 }
 0x22a   : > { %v2019_v44 = vsel %vm554_vm0, %v2015_v41, %v2016_v37  ;;  %v5438_v49 = vpop.permute.xlu2 %1971 }
 0x22b   : > { %v2020_v31 = vsel %vm661_vm6, %v2010_v43, %v2019_v44  ;;  %v3939_v51 = vld [vmem:[#allocation2 + $0x60] sm:$0xf]  ;;  %v4288_v13 = vld [vmem:[#allocation2 + $0x64] sm:$0xf]  ;;  %v1976_v43 = vrot.slane %v5438_v49, 4 }
 0x22c   : > { %2024 = vst [vmem:[#allocation2 + $0x68] sm:$0xff] %v2020_v31  ;;  %v4291_v15 = vld [vmem:[#allocation2 + $0x74] sm:$0xf0]  ;;  %v3949_v40 = vld [vmem:[#allocation2 + $0x78] sm:$0xf0] }
 0x22d   : > { %2667 = vrot.lane.b32.xlu1 %v5405_v32, %s4542_s6  ;;  %2665 = vrot.lane.b32.xlu0 %v5384_v27, %s4542_s6  ;;  %v3948_v21 = vor.u32 %v4291_v15, %v3947_v50  ;;  %v3952_v19 = vor.u32 %v4290_v53, %v3949_v40 }
 0x22f   : > { %2166 = vmatpush.bf16.msra.mxu0 %v3948_v21  ;;  %2185 = vmatpush.bf16.msra.mxu1 %v3952_v19  ;;  %v1990_v2 = vpop.permute.xlu1 %1989  ;;  %v1988_v6 = vpop.permute.xlu0 %1987 }
 0x230   : > { %v1995_v4 = vrot.slane %v1990_v2, 4  ;;  %v1994_v5 = vrot.slane %v1988_v6, 4  ;;  %2669 = vrot.lane.b32.xlu2 %v5409_v45, %s4542_s6 }
 0x232   : > { %v1999_v1 = vsel %vm554_vm0, %v1995_v4, %v1996_v63  ;;  %v1997_v34 = vsel %vm554_vm0, %v1993_v60, %v1994_v5  ;;  %v5461_v11 = vpop.permute.xlu2 %2348 }
 0x233   : > { %v2000_v55 = vsel %vm640_vm5, %v1990_v2, %v1999_v1  ;;  %v1998_v47 = vsel %vm640_vm5, %v5391_v58, %v1997_v34  ;;  %v4289_v8 = vld [vmem:[#allocation2 + $0x64] sm:$0xf0]  ;;  %v3941_v23 = vld [vmem:[#allocation2 + $0x68] sm:$0xf0]  ;;  %v4283_v34 = vld [vmem:[#allocation2 + $0x34] sm:$0xf0] }
 0x234   : > { %2004 = vst [vmem:[#allocation2 + $0x58] sm:$0xff] %v2000_v55  ;;  %v3940_v14 = vor.u32 %v4289_v8, %v3939_v51  ;;  %v3944_v39 = vor.u32 %v4288_v13, %v3941_v23  ;;  %v3917_v51 = vld [vmem:[#allocation2 + $0x38] sm:$0xf0]  ;;  %v2354_v55 = vrot.slane %v5461_v11, 4  ;;  %v3915_v23 = vld [vmem:[#allocation2 + $0x30] sm:$0xf] }
 0x235   : > { %2003 = vst [vmem:[#allocation2 + $0x50] sm:$0xff] %v1998_v47  ;;  %3044 = vrot.lane.b32.xlu1 %v5454_v7, %s4544_s10  ;;  %3042 = vrot.lane.b32.xlu0 %v5459_v52, %s4544_s10 }
 0x236   : > { %2167 = vmatpush.bf16.msra.mxu0 %v3940_v14  ;;  %2186 = vmatpush.bf16.msra.mxu1 %v3944_v39  ;;  %v4282_v14 = vld [vmem:[#allocation2 + $0x34] sm:$0xf] }
 0x237   : > { %v2367_v59 = vpop.permute.xlu1 %2366  ;;  %v2365_v58 = vpop.permute.xlu0 %2364 }
 0x238   : > { %v2373_v56 = vrot.slane %v2367_v59, 4  ;;  %v2372_v46 = vrot.slane %v2365_v58, 4  ;;  %3046 = vrot.lane.b32.xlu2 %v5471_v17, %s4544_s10  ;;  %v3916_v59 = vor.u32 %v4283_v34, %v3915_v23 }
 0x23a   : > { %v2376_v22 = vsel %vm554_vm0, %v2372_v46, %v2373_v56  ;;  %v5478_v48 = vpop.permute.xlu2 %2326  ;;  %v3907_v56 = vld [vmem:[#allocation2 + $0x20] sm:$0xf]  ;;  %v4281_v46 = vld [vmem:[#allocation2 + $0x24] sm:$0xf0] }
 0x23b   : > { %v2377_v24 = vsel %vm682_vm7, %v2365_v58, %v2376_v22  ;;  %v4287_v25 = vld [vmem:[#allocation2 + $0x54] sm:$0xf0]  ;;  %v3933_v61 = vld [vmem:[#allocation2 + $0x58] sm:$0xf0]  ;;  %v2333_v47 = vrot.slane %v5478_v48, 4  ;;  %v3920_v58 = vor.u32 %v4282_v14, %v3917_v51 }
 0x23c   : > { %2382 = vst [vmem:[#allocation2 + $0x70] sm:$0xff] %v2377_v24  ;;  %v3931_v12 = vld [vmem:[#allocation2 + $0x50] sm:$0xf]  ;;  %v4286_v28 = vld [vmem:[#allocation2 + $0x54] sm:$0xf] }
 0x23d   : > { %2643 = vrot.lane.b32.xlu1 %v5389_v54, %s4541_s30  ;;  %3048 = vrot.lane.b32.xlu0 %v5475_v18, %s4544_s10  ;;  %v3932_v35 = vor.u32 %v4287_v25, %v3931_v12  ;;  %v3936_v38 = vor.u32 %v4286_v28, %v3933_v61  ;;  %v4280_v22 = vld [vmem:[#allocation2 + $0x24] sm:$0xf]  ;;  %v3909_v24 = vld [vmem:[#allocation2 + $0x28] sm:$0xf0]  ;;  %s3557_s10 = sshll.u32 %s444_s7, 5 }
 0x23e   : > { %s5835_s20 = scalar_lea.vmem [#allocation6], %s3557_s10 }
 0x23f   : > { %2168 = vmatpush.bf16.msra.mxu0 %v3932_v35  ;;  %2187 = vmatpush.bf16.msra.mxu1 %v3936_v38  ;;  %v1970_v37 = vpop.permute.xlu1 %1969  ;;  %v2371_v41 = vpop.permute.xlu0 %2370  ;;  %v3908_v35 = vor.u32 %v4281_v46, %v3907_v56  ;;  %v3912_v38 = vor.u32 %v4280_v22, %v3909_v24  ;;  %s504_s7 = scalar_select %p503_p2, %s4524_s23, 1 }
 0x240   : > { %v1975_v44 = vrot.slane %v1970_v37, 4  ;;  %v2375_v10 = vrot.slane %v2371_v41, 4  ;;  %2645 = vrot.lane.b32.xlu2 %v5384_v27, %s4541_s30 }
 0x242   : > { %v1979_v31 = vsel %vm554_vm0, %v1975_v44, %v1976_v43  ;;  %v2378_v50 = vsel %vm554_vm0, %v2374_v62, %v2375_v10  ;;  %v5491_v53 = vpop.permute.xlu2 %2304  ;;  %v4279_v62 = vld [vmem:[#allocation2 + $0x14] sm:$0xf0]  ;;  %v3901_v43 = vld [vmem:[#allocation2 + $0x18] sm:$0xf0]  ;;  %v3899_v44 = vld [vmem:[#allocation2 + $0x10] sm:$0xf] }
 0x243   : > { %v1980_v15 = vsel %vm619_vm4, %v1970_v37, %v1979_v31  ;;  %v2379_v49 = vsel %vm682_vm7, %v5425_v29, %v2378_v50  ;;  %v4027_v29 = vld [vmem:[#allocation2 + $0x70] sm:$0xf]  ;;  %v4308_v30 = vld [vmem:[#allocation2 + $0x74] sm:$0xf]  ;;  %v3900_v50 = vor.u32 %v4279_v62, %v3899_v44 }
 0x244   : > { %1984 = vst [vmem:[#allocation2 + $0x48] sm:$0xff] %v1980_v15  ;;  %v4278_v10 = vld [vmem:[#allocation2 + $0x14] sm:$0xf] }
 0x245   : > { %2383 = vst [vmem:[#allocation2 + $0x78] sm:$0xff] %v2379_v49  ;;  %2649 = vrot.lane.b32.xlu1 %v5409_v45, %s4541_s30  ;;  %2647 = vrot.lane.b32.xlu0 %v5405_v32, %s4541_s30  ;;  %v3904_v15 = vor.u32 %v4278_v10, %v3901_v43 }
 0x247   : > { %v2347_v40 = vpop.permute.xlu1 %2346  ;;  %v2345_v21 = vpop.permute.xlu0 %2344 }
 0x248   : > { %v2353_v19 = vrot.slane %v2347_v40, 4  ;;  %v2352_v9 = vrot.slane %v2345_v21, 4  ;;  %3022 = vrot.lane.b32.xlu2 %v5459_v52, %s4543_s9 }
 0x24a   : > { %v2356_v33 = vsel %vm554_vm0, %v2352_v9, %v2353_v19  ;;  %v5503_v60 = vpop.permute.xlu2 %2310 }
 0x24b   : > { %v2357_v63 = vsel %vm661_vm6, %v2345_v21, %v2356_v33  ;;  %v4285_v36 = vld [vmem:[#allocation2 + $0x44] sm:$0xf0]  ;;  %v3925_v0 = vld [vmem:[#allocation2 + $0x48] sm:$0xf0] }
 0x24c   : > { %2362 = vst [vmem:[#allocation2 + $0x60] sm:$0xff] %v2357_v63  ;;  %v3924_v2 = vor.u32 %v4285_v36, %v3923_v20  ;;  %v3928_v6 = vor.u32 %v4284_v57, %v3925_v0  ;;  %v4309_v3 = vld [vmem:[#allocation2 + $0x74] sm:$0xf0]  ;;  %v4029_v4 = vld [vmem:[#allocation2 + $0x78] sm:$0xf0]  ;;  %v2312_v63 = vrot.slane %v5491_v53, 4 }
 0x24d   : > { %3026 = vrot.lane.b32.xlu1 %v5471_v17, %s4543_s9  ;;  %3024 = vrot.lane.b32.xlu0 %v5454_v7, %s4543_s9  ;;  %v4028_v5 = vor.u32 %v4309_v3, %v4027_v29  ;;  %v4032_v1 = vor.u32 %v4308_v30, %v4029_v4  ;;  %v2315_v36 = vrot.slane %v5503_v60, 4 }
 0x24e   : > { %2169 = vmatpush.bf16.msra.mxu0 %v3924_v2  ;;  %2188 = vmatpush.bf16.msra.mxu1 %v3928_v6 }
 0x24f   : > { %2505 = vmatpush.bf16.msra.mxu2 %v4028_v5  ;;  %2524 = vmatpush.bf16.msra.mxu3 %v4032_v1  ;;  %v2325_v8 = vpop.permute.xlu1 %2324  ;;  %v2351_v13 = vpop.permute.xlu0 %2350 }
 0x250   : > { %v2332_v39 = vrot.slane %v2325_v8, 4  ;;  %v2355_v16 = vrot.slane %v2351_v13, 4  ;;  %3028 = vrot.lane.b32.xlu2 %v5475_v18, %s4543_s9 }
 0x252   : > { %v2336_v25 = vsel %vm554_vm0, %v2332_v39, %v2333_v47  ;;  %v2358_v48 = vsel %vm554_vm0, %v2354_v55, %v2355_v16  ;;  %2170 = vmatpush.bf16.msra.mxu0 %v3916_v59  ;;  %2189 = vmatpush.bf16.msra.mxu1 %v3920_v58  ;;  %v5516_v61 = vpop.permute.xlu2 %2288 }
 0x253   : > { %v2337_v12 = vsel %vm640_vm5, %v2325_v8, %v2336_v25  ;;  %v2359_v28 = vsel %vm661_vm6, %v5461_v11, %v2358_v48  ;;  %v4019_v19 = vld [vmem:[#allocation2 + $0x60] sm:$0xf]  ;;  %v4306_v9 = vld [vmem:[#allocation2 + $0x64] sm:$0xf] }
 0x254   : > { %2342 = vst [vmem:[#allocation2 + $0x50] sm:$0xff] %v2337_v12  ;;  %v4203_v12 = vld [vmem:[%s5911_s2 + $0x8] sm:$0xff] }
 0x255   : > { %2363 = vst [vmem:[#allocation2 + $0x68] sm:$0xff] %v2359_v28  ;;  %2625 = vrot.lane.b32.xlu1 %v5384_v27, %s4540_s16  ;;  %2623 = vrot.lane.b32.xlu0 %v5389_v54, %s4540_s16  ;;  %v2294_v28 = vrot.slane %v5516_v61, 4 }
 0x256   : > { %2171 = vmatpush.bf16.msra.mxu0 %v3908_v35  ;;  %2190 = vmatpush.bf16.msra.mxu1 %v3912_v38 }
 0x257   : > { %v2331_v37 = vpop.permute.xlu1 %2330  ;;  %v2329_v41 = vpop.permute.xlu0 %2328  ;;  %823 = vmatmul.bf16.gmra.mxu0 %v4203_v12  ;;  %842 = vmatmul.bf16.gmra.mxu1 %v4203_v12 }
 0x258   : > { %v2335_v31 = vrot.slane %v2331_v37, 4  ;;  %v2334_v11 = vrot.slane %v2329_v41, 4  ;;  %2627 = vrot.lane.b32.xlu2 %v5405_v32, %s4540_s16 }
 0x25a   : > { %v2338_v49 = vsel %vm554_vm0, %v2334_v11, %v2335_v31  ;;  %2172 = vmatpush.bf16.msra.mxu0 %v3900_v50  ;;  %2191 = vmatpush.bf16.msra.mxu1 %v3904_v15  ;;  %v5528_v40 = vpop.permute.xlu2 %2266 }
 0x25b   : > { %v2339_v21 = vsel %vm640_vm5, %v2329_v41, %v2338_v49  ;;  %v4011_v5 = vld [vmem:[#allocation2 + $0x50] sm:$0xf]  ;;  %v4304_v55 = vld [vmem:[#allocation2 + $0x54] sm:$0xf]  ;;  %v2273_v35 = vrot.slane %v5528_v40, 4 }
 0x25c   : > { %2343 = vst [vmem:[#allocation2 + $0x58] sm:$0xff] %v2339_v21  ;;  %v4307_v33 = vld [vmem:[#allocation2 + $0x64] sm:$0xf0]  ;;  %v4021_v20 = vld [vmem:[#allocation2 + $0x68] sm:$0xf0] }
 0x25d   : > { %3002 = vrot.lane.b32.xlu1 %v5459_v52, %s4542_s6  ;;  %2629 = vrot.lane.b32.xlu0 %v5409_v45, %s4540_s16  ;;  %v4020_v57 = vor.u32 %v4307_v33, %v4019_v19  ;;  %v4024_v29 = vor.u32 %v4306_v9, %v4021_v20 }
 0x25f   : > { %2506 = vmatpush.bf16.msra.mxu2 %v4020_v57  ;;  %2525 = vmatpush.bf16.msra.mxu3 %v4024_v29  ;;  %v2309_v0 = vpop.permute.xlu1 %2308  ;;  %v2307_v30 = vpop.permute.xlu0 %2306  ;;  %v4221_v29 = vld [vmem:[%s5911_s2 + $0x18] sm:$0xff] }
 0x260   : > { %v2314_v2 = vrot.slane %v2309_v0, 4  ;;  %v2313_v6 = vrot.slane %v2307_v30, 4  ;;  %3004 = vrot.lane.b32.xlu2 %v5454_v7, %s4542_s6  ;;  %v4277_v30 = vld [vmem:[#allocation2 + $0x4] sm:$0xf0]  ;;  %1162 = vmatmul.bf16.gmra.mxu2 %v4221_v29 }
 0x261   : > { %1181 = vmatmul.bf16.gmra.mxu3 %v4221_v29 }
 0x262   : > { %v2318_v3 = vsel %vm554_vm0, %v2314_v2, %v2315_v36  ;;  %v2316_v4 = vsel %vm554_vm0, %v2312_v63, %v2313_v6  ;;  %v5541_v1 = vpop.permute.xlu2 %2244  ;;  %v4276_v2 = vld [vmem:[#allocation2 + $0x4] sm:$0xf] }
 0x263   : > { %v2319_v34 = vsel %vm619_vm4, %v2309_v0, %v2318_v3  ;;  %v2317_v60 = vsel %vm619_vm4, %v5491_v53, %v2316_v4  ;;  %v4305_v51 = vld [vmem:[#allocation2 + $0x54] sm:$0xf0]  ;;  %v4013_v47 = vld [vmem:[#allocation2 + $0x58] sm:$0xf0]  ;;  %v3891_v0 = vld [vmem:[#allocation2] sm:$0xf] }
 0x264   : > { %2323 = vst [vmem:[#allocation2 + $0x48] sm:$0xff] %v2319_v34  ;;  %v4012_v8 = vor.u32 %v4305_v51, %v4011_v5  ;;  %v4016_v13 = vor.u32 %v4304_v55, %v4013_v47  ;;  %v2252_v6 = vrot.slane %v5541_v1, 4  ;;  %v3892_v4 = vor.u32 %v4277_v30, %v3891_v0  ;;  %v3893_v5 = vld [vmem:[#allocation2 + $0x8] sm:$0xf0]  ;;  %v4238_v34 = vld [vmem:[%s5911_s2 + $0x20] sm:$0xff] }
 0x265   : > { %2322 = vst [vmem:[#allocation2 + $0x40] sm:$0xff] %v2317_v60  ;;  %3008 = vrot.lane.b32.xlu1 %v5475_v18, %s4542_s6  ;;  %3006 = vrot.lane.b32.xlu0 %v5471_v17, %s4542_s6  ;;  %v3896_v55 = vor.u32 %v4276_v2, %v3893_v5  ;;  %v4257_v2 = vld [vmem:[%s5911_s2 + $0x38] sm:$0xff] }
 0x266   : > { %2507 = vmatpush.bf16.msra.mxu2 %v4012_v8  ;;  %2526 = vmatpush.bf16.msra.mxu3 %v4016_v13  ;;  %2240 = vst [vmem:[#allocation2] sm:$0xff] %v5236_v26 }
 0x267   : > { %v2287_v23 = vpop.permute.xlu1 %2286  ;;  %v2285_v14 = vpop.permute.xlu0 %2284  ;;  %2241 = vst [vmem:[#allocation2 + $0x8] sm:$0xff] %v5250_v42  ;;  %2173 = vmatpush.bf16.msra.mxu0 %v3892_v4  ;;  %2192 = vmatpush.bf16.msra.mxu1 %v3896_v55 }
 0x268   : > { %v2293_v39 = vrot.slane %v2287_v23, 4  ;;  %v2292_v16 = vrot.slane %v2285_v14, 4  ;;  %2603 = vrot.lane.b32.xlu2 %v5389_v54, %s4539_s18  ;;  %1496 = vmatmul.bf16.vlgmr.msrb.gmra.mxu0 %v4238_v34 }
 0x269   : > { %1515 = vmatmul.bf16.vlgmr.msrb.gmra.mxu1 %v4238_v34 }
 0x26a   : > { %v2296_v53 = vsel %vm554_vm0, %v2292_v16, %v2293_v39  ;;  %v5553_v59 = vpop.permute.xlu2 %2250 }
 0x26b   : > { %v2297_v58 = vsel %vm598_vm3, %v2285_v14, %v2296_v53  ;;  %v4303_v56 = vld [vmem:[#allocation2 + $0x44] sm:$0xf0]  ;;  %v4005_v46 = vld [vmem:[#allocation2 + $0x48] sm:$0xf0]  ;;  %v2255_v3 = vrot.slane %v5553_v59, 4 }
 0x26c   : > { %2302 = vst [vmem:[#allocation2 + $0x30] sm:$0xff] %v2297_v58  ;;  %v4003_v22 = vld [vmem:[#allocation2 + $0x40] sm:$0xf]  ;;  %v4302_v24 = vld [vmem:[#allocation2 + $0x44] sm:$0xf] }
 0x26d   : > { %2607 = vrot.lane.b32.xlu1 %v5405_v32, %s4539_s18  ;;  %2605 = vrot.lane.b32.xlu0 %v5384_v27, %s4539_s18  ;;  %v4004_v25 = vor.u32 %v4303_v56, %v4003_v22  ;;  %v4008_v48 = vor.u32 %v4302_v24, %v4005_v46  ;;  %v3971_v4 = vld [vmem:[#allocation2] sm:$0xf]  ;;  %v4294_v34 = vld [vmem:[#allocation2 + $0x4] sm:$0xf] }
 0x26e   : > { %v4295_v5 = vld [vmem:[#allocation2 + $0x4] sm:$0xf0]  ;;  %2579 = vst [vmem:[#allocation2] sm:$0xff] %v5389_v54 }
 0x26f   : > { %2508 = vmatpush.bf16.msra.mxu2 %v4004_v25  ;;  %2527 = vmatpush.bf16.msra.mxu3 %v4008_v48  ;;  %v2265_v38 = vpop.permute.xlu1 %2264  ;;  %v2291_v62 = vpop.permute.xlu0 %2290  ;;  %v3972_v55 = vor.u32 %v4295_v5, %v3971_v4 }
 0x270   : > { %v2272_v43 = vrot.slane %v2265_v38, 4  ;;  %v2295_v37 = vrot.slane %v2291_v62, 4  ;;  %2609 = vrot.lane.b32.xlu2 %v5409_v45, %s4539_s18 }
 0x272   : > { %v2276_v41 = vsel %vm554_vm0, %v2272_v43, %v2273_v35  ;;  %v2298_v44 = vsel %vm554_vm0, %v2294_v28, %v2295_v37  ;;  %v5569_v10 = vpop.permute.xlu2 %2707 }
 0x273   : > { %v2277_v31 = vsel %vm577_vm1, %v2265_v38, %v2276_v41  ;;  %v2299_v11 = vsel %vm598_vm3, %v5516_v61, %v2298_v44  ;;  %v3995_v9 = vld [vmem:[#allocation2 + $0x30] sm:$0xf]  ;;  %v4300_v33 = vld [vmem:[#allocation2 + $0x34] sm:$0xf]  ;;  %v2713_v37 = vrot.slane %v5569_v10, 4 }
 0x274   : > { %2282 = vst [vmem:[#allocation2 + $0x20] sm:$0xff] %v2277_v31  ;;  %v4256_v38 = vld [vmem:[%s5911_s2 + $0x30] sm:$0xff] }
 0x275   : > { %2303 = vst [vmem:[#allocation2 + $0x38] sm:$0xff] %v2299_v11  ;;  %2984 = vrot.lane.b32.xlu1 %v5454_v7, %s4541_s30  ;;  %2982 = vrot.lane.b32.xlu0 %v5459_v52, %s4541_s30 }
 0x276   : > { %1835 = vmatmul.bf16.vlgmr.msrb.gmra.mxu2 %v4256_v38  ;;  %1854 = vmatmul.bf16.vlgmr.msrb.gmra.mxu3 %v4256_v38 }
 0x277   : > { %v2271_v50 = vpop.permute.xlu1 %2270  ;;  %v2269_v15 = vpop.permute.xlu0 %2268 }
 0x278   : > { %v2275_v49 = vrot.slane %v2271_v50, 4  ;;  %v2274_v40 = vrot.slane %v2269_v15, 4  ;;  %2986 = vrot.lane.b32.xlu2 %v5471_v17, %s4541_s30 }
 0x27a   : > { %v2278_v21 = vsel %vm554_vm0, %v2274_v40, %v2275_v49  ;;  %v5581_v19 = vpop.permute.xlu2 %2685 }
 0x27b   : > { %v2279_v61 = vsel %vm577_vm1, %v2269_v15, %v2278_v21  ;;  %v3987_v23 = vld [vmem:[#allocation2 + $0x20] sm:$0xf]  ;;  %v4298_v53 = vld [vmem:[#allocation2 + $0x24] sm:$0xf]  ;;  %v2692_v41 = vrot.slane %v5581_v19, 4 }
 0x27c   : > { %2283 = vst [vmem:[#allocation2 + $0x28] sm:$0xff] %v2279_v61  ;;  %v4301_v20 = vld [vmem:[#allocation2 + $0x34] sm:$0xf0]  ;;  %v3997_v57 = vld [vmem:[#allocation2 + $0x38] sm:$0xf0] }
 0x27d   : > { %2583 = vrot.lane.b32.xlu1 %v5389_v54, %s4538_s14  ;;  %2988 = vrot.lane.b32.xlu0 %v5475_v18, %s4541_s30  ;;  %v3996_v63 = vor.u32 %v4301_v20, %v3995_v9  ;;  %v4000_v36 = vor.u32 %v4300_v33, %v3997_v57  ;;  %s4385_s30 = smul.u32 12, %s504_s7 }
 0x27f   : > { %2509 = vmatpush.bf16.msra.mxu2 %v3996_v63  ;;  %2528 = vmatpush.bf16.msra.mxu3 %v4000_v36  ;;  %v2249_v60 = vpop.permute.xlu1 %2248  ;;  %v2247_v51 = vpop.permute.xlu0 %2246 }
 0x280   : > { %v2254_v47 = vrot.slane %v2249_v60, 4  ;;  %v2253_v8 = vrot.slane %v2247_v51, 4  ;;  %2585 = vrot.lane.b32.xlu2 %v5384_v27, %s4538_s14 }
 0x282   : > { %v2258_v26 = vsel %vm554_vm0, %v2254_v47, %v2255_v3  ;;  %v2256_v13 = vsel %vm554_vm0, %v2252_v6, %v2253_v8  ;;  %v5602_v14 = vpop.permute.xlu2 %2663  ;;  %v3973_v47 = vld [vmem:[#allocation2 + $0x8] sm:$0xf0] }
 0x283   : > { %v2259_v39 = vsel %vm556_vm2, %v2249_v60, %v2258_v26  ;;  %v2257_v42 = vsel %vm556_vm2, %v5541_v1, %v2256_v13  ;;  %v4299_v16 = vld [vmem:[#allocation2 + $0x24] sm:$0xf0]  ;;  %v3989_v59 = vld [vmem:[#allocation2 + $0x28] sm:$0xf0]  ;;  %v2671_v60 = vrot.slane %v5602_v14, 4  ;;  %v3976_v13 = vor.u32 %v4294_v34, %v3973_v47  ;;  %2580 = vst [vmem:[#allocation2 + $0x8] sm:$0xff] %v5405_v32 }
 0x284   : > { %2263 = vst [vmem:[#allocation2 + $0x18] sm:$0xff] %v2259_v39  ;;  %v3988_v27 = vor.u32 %v4299_v16, %v3987_v23  ;;  %v3992_v58 = vor.u32 %v4298_v53, %v3989_v59 }
 0x285   : > { %2262 = vst [vmem:[#allocation2 + $0x10] sm:$0xff] %v2257_v42  ;;  %2589 = vrot.lane.b32.xlu1 %v5409_v45, %s4538_s14  ;;  %2587 = vrot.lane.b32.xlu0 %v5405_v32, %s4538_s14  ;;  %v4239_v42 = vld [vmem:[%s5911_s2 + $0x28] sm:$0xff] }
 0x286   : > { %2510 = vmatpush.bf16.msra.mxu2 %v3988_v27  ;;  %2529 = vmatpush.bf16.msra.mxu3 %v3992_v58 }
 0x287   : > { %v2706_v56 = vpop.permute.xlu1 %2705  ;;  %v2704_v46 = vpop.permute.xlu0 %2703  ;;  %1840 = vmatmul.bf16.gmra.mxu2 %v4257_v2  ;;  %1859 = vmatmul.bf16.gmra.mxu3 %v4257_v2 }
 0x288   : > { %v2712_v22 = vrot.slane %v2706_v56, 4  ;;  %v2711_v24 = vrot.slane %v2704_v46, 4  ;;  %2962 = vrot.lane.b32.xlu2 %v5459_v52, %s4540_s16  ;;  %1501 = vmatmul.bf16.gmra.mxu0 %v4239_v42 }
 0x289   : > { %1520 = vmatmul.bf16.gmra.mxu1 %v4239_v42 }
 0x28a   : > { %v2715_v1 = vsel %vm554_vm0, %v2711_v24, %v2712_v22  ;;  %v5614_v25 = vpop.permute.xlu2 %2669 }
 0x28b   : > { %v2716_v48 = vsel %vm682_vm7, %v2704_v46, %v2715_v1  ;;  %v4297_v12 = vld [vmem:[#allocation2 + $0x14] sm:$0xf0]  ;;  %v3981_v45 = vld [vmem:[#allocation2 + $0x18] sm:$0xf0]  ;;  %v2674_v51 = vrot.slane %v5614_v25, 4 }
 0x28c   : > { %2721 = vst [vmem:[#allocation2 + $0x70] sm:$0xff] %v2716_v48  ;;  %v3979_v28 = vld [vmem:[#allocation2 + $0x10] sm:$0xf]  ;;  %v4296_v35 = vld [vmem:[#allocation2 + $0x14] sm:$0xf] }
 0x28d   : > { %2966 = vrot.lane.b32.xlu1 %v5471_v17, %s4540_s16  ;;  %2964 = vrot.lane.b32.xlu0 %v5454_v7, %s4540_s16  ;;  %v3980_v62 = vor.u32 %v4297_v12, %v3979_v28  ;;  %v3984_v43 = vor.u32 %v4296_v35, %v3981_v45 }
 0x28f   : > { %2511 = vmatpush.bf16.msra.mxu2 %v3980_v62  ;;  %2530 = vmatpush.bf16.msra.mxu3 %v3984_v43  ;;  %v2684_v44 = vpop.permute.xlu1 %2683  ;;  %v2710_v31 = vpop.permute.xlu0 %2709 }
 0x290   : > { %v2691_v11 = vrot.slane %v2684_v44, 4  ;;  %v2714_v50 = vrot.slane %v2710_v31, 4  ;;  %2968 = vrot.lane.b32.xlu2 %v5475_v18, %s4540_s16 }
 0x292   : > { %v2695_v15 = vsel %vm554_vm0, %v2691_v11, %v2692_v41  ;;  %v2717_v49 = vsel %vm554_vm0, %v2713_v37, %v2714_v50  ;;  %v5630_v40 = vpop.permute.xlu2 %3046 }
 0x293   : > { %v2696_v21 = vsel %vm661_vm6, %v2684_v44, %v2695_v15  ;;  %v2718_v19 = vsel %vm682_vm7, %v5569_v10, %v2717_v49  ;;  %v4107_v63 = vld [vmem:[#allocation2 + $0x70] sm:$0xf]  ;;  %v4326_v36 = vld [vmem:[#allocation2 + $0x74] sm:$0xf]  ;;  %2512 = vmatpush.bf16.msra.mxu2 %v3972_v55  ;;  %2531 = vmatpush.bf16.msra.mxu3 %v3976_v13  ;;  %v3052_v41 = vrot.slane %v5630_v40, 4  ;;  %v4274_v49 = vld [vmem:[%s5911_s2 + $0x40] sm:$0xff] }
 0x294   : > { %2701 = vst [vmem:[#allocation2 + $0x60] sm:$0xff] %v2696_v21 }
 0x295   : > { %2722 = vst [vmem:[#allocation2 + $0x78] sm:$0xff] %v2718_v19  ;;  %2944 = vrot.lane.b32.xlu1 %v5454_v7, %s4539_s18  ;;  %2942 = vrot.lane.b32.xlu0 %v5459_v52, %s4539_s18 }
 0x297   : > { %v2690_v61 = vpop.permute.xlu1 %2689  ;;  %v2688_v9 = vpop.permute.xlu0 %2687 }
 0x298   : > { %v2694_v33 = vrot.slane %v2690_v61, 4  ;;  %v2693_v20 = vrot.slane %v2688_v9, 4  ;;  %2946 = vrot.lane.b32.xlu2 %v5471_v17, %s4539_s18  ;;  %2174 = vmatmul.bf16.vlgmr.msra.gmra.mxu0 %v4274_v49 }
 0x299   : > { %2193 = vmatmul.bf16.vlgmr.msra.gmra.mxu1 %v4274_v49 }
 0x29a   : > { %v2697_v57 = vsel %vm554_vm0, %v2693_v20, %v2694_v33  ;;  %v5642_v29 = vpop.permute.xlu2 %2645 }
 0x29b   : > { %v2698_v10 = vsel %vm661_vm6, %v2688_v9, %v2697_v57  ;;  %v4099_v53 = vld [vmem:[#allocation2 + $0x60] sm:$0xf]  ;;  %v4324_v58 = vld [vmem:[#allocation2 + $0x64] sm:$0xf]  ;;  %v2652_v44 = vrot.slane %v5642_v29, 4 }
 0x29c   : > { %2702 = vst [vmem:[#allocation2 + $0x68] sm:$0xff] %v2698_v10  ;;  %v4327_v0 = vld [vmem:[#allocation2 + $0x74] sm:$0xf0]  ;;  %v4109_v30 = vld [vmem:[#allocation2 + $0x78] sm:$0xf0] }
 0x29d   : > { %2922 = vrot.lane.b32.xlu1 %v5459_v52, %s4538_s14  ;;  %2948 = vrot.lane.b32.xlu0 %v5475_v18, %s4539_s18  ;;  %v4108_v6 = vor.u32 %v4327_v0, %v4107_v63  ;;  %v4112_v3 = vor.u32 %v4326_v36, %v4109_v30 }
 0x29f   : > { %2844 = vmatpush.bf16.msrb.mxu0 %v4108_v6  ;;  %2863 = vmatpush.bf16.msrb.mxu1 %v4112_v3  ;;  %v2668_v8 = vpop.permute.xlu1 %2667  ;;  %v2666_v26 = vpop.permute.xlu0 %2665 }
 0x2a0   : > { %v2673_v23 = vrot.slane %v2668_v8, 4  ;;  %v2672_v39 = vrot.slane %v2666_v26, 4  ;;  %2924 = vrot.lane.b32.xlu2 %v5454_v7, %s4538_s14  ;;  %v4275_v26 = vld [vmem:[%s5911_s2 + $0x48] sm:$0xff] }
 0x2a2   : > { %v2677_v54 = vsel %vm554_vm0, %v2673_v23, %v2674_v51  ;;  %v2675_v16 = vsel %vm554_vm0, %v2671_v60, %v2672_v39  ;;  %v5663_v59 = vpop.permute.xlu2 %3022 }
 0x2a3   : > { %v2678_v32 = vsel %vm640_vm5, %v2668_v8, %v2677_v54  ;;  %v2676_v7 = vsel %vm640_vm5, %v5602_v14, %v2675_v16  ;;  %v4325_v27 = vld [vmem:[#allocation2 + $0x64] sm:$0xf0]  ;;  %v4101_v56 = vld [vmem:[#allocation2 + $0x68] sm:$0xf0]  ;;  %v3030_v34 = vrot.slane %v5663_v59, 4 }
 0x2a4   : > { %2682 = vst [vmem:[#allocation2 + $0x58] sm:$0xff] %v2678_v32  ;;  %v4100_v46 = vor.u32 %v4325_v27, %v4099_v53  ;;  %v4104_v22 = vor.u32 %v4324_v58, %v4101_v56 }
 0x2a5   : > { %2681 = vst [vmem:[#allocation2 + $0x50] sm:$0xff] %v2676_v7  ;;  %2928 = vrot.lane.b32.xlu1 %v5475_v18, %s4538_s14  ;;  %2926 = vrot.lane.b32.xlu0 %v5471_v17, %s4538_s14  ;;  %v4292_v18 = vld [vmem:[%s5911_s2 + $0x50] sm:$0xff]  ;;  %s5810_s14 = sshll.u32 %s4520_s22, 1  ;;  %s5940_s22 = smov (!%p505_p3, %s4520_s22), 2 }
 0x2a6   : > { %2845 = vmatpush.bf16.msrb.mxu0 %v4100_v46  ;;  %2864 = vmatpush.bf16.msrb.mxu1 %v4104_v22  ;;  %p498_p1 = scmp.lt.s32.totalorder %s5810_s14, 5  ;;  %s3559_s11 = sshll.u32 %s5940_s22, 2 }
 0x2a7   : > { %v3045_v24 = vpop.permute.xlu1 %3044  ;;  %v3043_v1 = vpop.permute.xlu0 %3042  ;;  %2513 = vmatmul.bf16.vlgmr.msra.gmra.mxu2 %v4292_v18  ;;  %2532 = vmatmul.bf16.vlgmr.msra.gmra.mxu3 %v4292_v18  ;;  %s509_s16 = sadd.s32 %s4385_s30, %s3559_s11  ;;  %s4386_s22 = smul.u32 (%p4668_p10), 24, %s4524_s23 }
 0x2a8   : > { %v3051_v25 = vrot.slane %v3045_v24, 4  ;;  %v3050_v48 = vrot.slane %v3043_v1, 4  ;;  %2179 = vmatmul.bf16.gmra.mxu0 %v4275_v26  ;;  %s499_s8 = scalar_select %p498_p1, %s5810_s14, 5 }
 0x2a9   : > { %2198 = vmatmul.bf16.gmra.mxu1 %v4275_v26  ;;  %s3560_s4 = sshll.u32 %s509_s16, 3  ;;  %s3327_s13 = sadd.s32 (%p4668_p10), %s4386_s22, %s5810_s14 }
 0x2aa   : > { %v3054_v14 = vsel %vm554_vm0, %v3050_v48, %v3051_v25  ;;  %v3029_v12 = vpop.permute.xlu2 %3028  ;;  %s500_s9 = scalar_lea.vmem %s5912_s3, %s499_s8  ;;  %s511_s12 = scalar_lea.vmem %s5914_s5, %s3560_s4 }
 0x2ab   : > { %v3055_v45 = vsel %vm682_vm7, %v3043_v1, %v3054_v14  ;;  %v4323_v28 = vld [vmem:[#allocation2 + $0x54] sm:$0xf0]  ;;  %v4093_v35 = vld [vmem:[#allocation2 + $0x58] sm:$0xf0]  ;;  %v3033_v60 = vrot.slane %v3029_v12, 4  ;;  %s4195_s8 = sshll.u32 (%p4668_p10), %s3327_s13, 2 }
 0x2ac   : > { %3060 = vst [vmem:[#allocation2 + $0x70] sm:$0xff] %v3055_v45  ;;  %v4091_v38 = vld [vmem:[#allocation2 + $0x50] sm:$0xf]  ;;  %v4322_v62 = vld [vmem:[#allocation2 + $0x54] sm:$0xf] }
 0x2ad   : > { %v4092_v43 = vor.u32 %v4323_v28, %v4091_v38  ;;  %v4096_v37 = vor.u32 %v4322_v62, %v4093_v35 }
 0x2af   : > { %2846 = vmatpush.bf16.msrb.mxu0 %v4092_v43  ;;  %2865 = vmatpush.bf16.msrb.mxu1 %v4096_v37  ;;  %v2644_v31 = vpop.permute.xlu1 %2643  ;;  %v3049_v11 = vpop.permute.xlu0 %3048 }
 0x2b0   : > { %v2651_v50 = vrot.slane %v2644_v31, 4  ;;  %v3053_v15 = vrot.slane %v3049_v11, 4 }
 0x2b2   : > { %v2655_v21 = vsel %vm554_vm0, %v2651_v50, %v2652_v44  ;;  %v3056_v19 = vsel %vm554_vm0, %v3052_v41, %v3053_v15  ;;  %v5684_v61 = vpop.permute.xlu2 %2627 }
 0x2b3   : > { %v2656_v9 = vsel %vm619_vm4, %v2644_v31, %v2655_v21  ;;  %v3057_v33 = vsel %vm682_vm7, %v5630_v40, %v3056_v19  ;;  %v4187_v30 = vld [vmem:[#allocation2 + $0x70] sm:$0xf]  ;;  %v4344_v2 = vld [vmem:[#allocation2 + $0x74] sm:$0xf]  ;;  %v4293_v40 = vld [vmem:[%s5911_s2 + $0x58] sm:$0xff]  ;;  %v2633_v38 = vrot.slane %v5684_v61, 4 }
 0x2b4   : > { %2661 = vst [vmem:[#allocation2 + $0x40] sm:$0xff] %v2656_v9 }
 0x2b5   : > { %3061 = vst [vmem:[#allocation2 + $0x78] sm:$0xff] %v3057_v33 }
 0x2b7   : > { %v2650_v20 = vpop.permute.xlu1 %2649  ;;  %v2648_v57 = vpop.permute.xlu0 %2647  ;;  %2518 = vmatmul.bf16.gmra.mxu2 %v4293_v40  ;;  %2537 = vmatmul.bf16.gmra.mxu3 %v4293_v40 }
 0x2b8   : > { %v2654_v29 = vrot.slane %v2650_v20, 4  ;;  %v2653_v10 = vrot.slane %v2648_v57, 4 }
 0x2ba   : > { %v2657_v63 = vsel %vm554_vm0, %v2653_v10, %v2654_v29  ;;  %v3005_v36 = vpop.permute.xlu2 %3004 }
 0x2bb   : > { %v2658_v0 = vsel %vm619_vm4, %v2648_v57, %v2657_v63  ;;  %v4083_v39 = vld [vmem:[#allocation2 + $0x40] sm:$0xf]  ;;  %v4320_v32 = vld [vmem:[#allocation2 + $0x44] sm:$0xf]  ;;  %v3011_v62 = vrot.slane %v3005_v36, 4 }
 0x2bc   : > { %2662 = vst [vmem:[#allocation2 + $0x48] sm:$0xff] %v2658_v0  ;;  %v4345_v6 = vld [vmem:[#allocation2 + $0x74] sm:$0xf0]  ;;  %v4189_v3 = vld [vmem:[#allocation2 + $0x78] sm:$0xf0] }
 0x2bd   : > { %v4188_v4 = vor.u32 %v4345_v6, %v4187_v30  ;;  %v4192_v5 = vor.u32 %v4344_v2, %v4189_v3 }
 0x2bf   : > { %3183 = vmatpush.bf16.msrb.mxu2 %v4188_v4  ;;  %3202 = vmatpush.bf16.msrb.mxu3 %v4192_v5  ;;  %v3027_v51 = vpop.permute.xlu1 %3026  ;;  %v3025_v55 = vpop.permute.xlu0 %3024 }
 0x2c0   : > { %v3032_v47 = vrot.slane %v3027_v51, 4  ;;  %v3031_v8 = vrot.slane %v3025_v55, 4 }
 0x2c2   : > { %v3036_v13 = vsel %vm554_vm0, %v3032_v47, %v3033_v60  ;;  %v3034_v23 = vsel %vm554_vm0, %v3030_v34, %v3031_v8  ;;  %v5700_v42 = vpop.permute.xlu2 %2603 }
 0x2c3   : > { %v3037_v54 = vsel %vm661_vm6, %v3027_v51, %v3036_v13  ;;  %v3035_v16 = vsel %vm661_vm6, %v5663_v59, %v3034_v23  ;;  %v4321_v53 = vld [vmem:[#allocation2 + $0x44] sm:$0xf0]  ;;  %v4085_v7 = vld [vmem:[#allocation2 + $0x48] sm:$0xf0] }
 0x2c4   : > { %3041 = vst [vmem:[#allocation2 + $0x68] sm:$0xff] %v3037_v54  ;;  %v4084_v27 = vor.u32 %v4321_v53, %v4083_v39  ;;  %v4088_v58 = vor.u32 %v4320_v32, %v4085_v7  ;;  %v5724_v7 = vld [vmem:[#allocation2] sm:$0xf] }
 0x2c5   : > { %3040 = vst [vmem:[#allocation2 + $0x60] sm:$0xff] %v3035_v16 }
 0x2c6   : > { %2847 = vmatpush.bf16.msrb.mxu0 %v4084_v27  ;;  %2866 = vmatpush.bf16.msrb.mxu1 %v4088_v58  ;;  %v5726_v27 = vld [vmem:[#allocation2 + $0x4] sm:$0xf] }
 0x2c7   : > { %v2626_v56 = vpop.permute.xlu1 %2625  ;;  %v2624_v46 = vpop.permute.xlu0 %2623  ;;  %2918 = vst [vmem:[#allocation2] sm:$0xff] %v5459_v52 }
 0x2c8   : > { %v2632_v22 = vrot.slane %v2626_v56, 4  ;;  %v2631_v24 = vrot.slane %v2624_v46, 4 }
 0x2ca   : > { %v2635_v1 = vsel %vm554_vm0, %v2631_v24, %v2632_v22  ;;  %v2610_v45 = vpop.permute.xlu2 %2609 }
 0x2cb   : > { %v2636_v25 = vsel %vm598_vm3, %v2624_v46, %v2635_v1  ;;  %v4343_v48 = vld [vmem:[#allocation2 + $0x64] sm:$0xf0]  ;;  %v4181_v14 = vld [vmem:[#allocation2 + $0x68] sm:$0xf0]  ;;  %v2614_v30 = vrot.slane %v2610_v45, 4  ;;  %v819_v1 = vpop.f32.mrf.mxu0 }
 0x2cc   : > { %2641 = vst [vmem:[#allocation2 + $0x30] sm:$0xff] %v2636_v25  ;;  %v4179_v59 = vld [vmem:[#allocation2 + $0x60] sm:$0xf]  ;;  %v4342_v12 = vld [vmem:[#allocation2 + $0x64] sm:$0xf]  ;;  %v838_v25 = vpop.f32.mrf.mxu1 }
 0x2cd   : > { %v4180_v28 = vor.u32 %v4343_v48, %v4179_v59  ;;  %v4184_v35 = vor.u32 %v4342_v12, %v4181_v14  ;;  %v5732_v59 = vld [vmem:[#allocation2 + $0x4] sm:$0xf0]  ;;  %v5734_v12 = vld [vmem:[#allocation2 + $0x8] sm:$0xf0] }
 0x2ce   : > { %2919 = vst [vmem:[#allocation2 + $0x8] sm:$0xff] %v5471_v17 }
 0x2cf   : > { %3184 = vmatpush.bf16.msrb.mxu2 %v4180_v28  ;;  %3203 = vmatpush.bf16.msrb.mxu3 %v4184_v35  ;;  %v3003_v18 = vpop.permute.xlu1 %3002  ;;  %v2630_v43 = vpop.permute.xlu0 %2629 }
 0x2d0   : > { %v3010_v37 = vrot.slane %v3003_v18, 4  ;;  %v2634_v41 = vrot.slane %v2630_v43, 4  ;;  %v1177_v43 = vpop.f32.mrf.mxu3 }
 0x2d2   : > { %v3014_v44 = vsel %vm554_vm0, %v3010_v37, %v3011_v62  ;;  %v2637_v31 = vsel %vm554_vm0, %v2633_v38, %v2634_v41  ;;  %v5713_v15 = vpop.permute.xlu2 %2986 }
 0x2d3   : > { %v3015_v11 = vsel %vm640_vm5, %v3003_v18, %v3014_v44  ;;  %v2638_v50 = vsel %vm598_vm3, %v5684_v61, %v2637_v31  ;;  %v4075_v57 = vld [vmem:[#allocation2 + $0x30] sm:$0xf]  ;;  %v4318_v29 = vld [vmem:[#allocation2 + $0x34] sm:$0xf]  ;;  %v2611_v61 = vrot.slane %v5700_v42, 4  ;;  %v2992_v45 = vrot.slane %v5713_v15, 4  ;;  %v1158_v18 = vpop.f32.mrf.mxu2 }
 0x2d4   : > { %3020 = vst [vmem:[#allocation2 + $0x50] sm:$0xff] %v3015_v11  ;;  %v5743_v17 = vadd.f32 %v1158_v18, %v819_v1  ;;  %v5745_v11 = vadd.f32 %v1177_v43, %v838_v25  ;;  %v4052_v25 = vor.u32 %v5732_v59, %v5724_v7 }
 0x2d5   : > { %2642 = vst [vmem:[#allocation2 + $0x38] sm:$0xff] %v2638_v50  ;;  %v821_v50 = vpop.f32.mrf.mxu0 }
 0x2d7   : > { %v3009_v49 = vpop.permute.xlu1 %3008  ;;  %v3007_v21 = vpop.permute.xlu0 %3006 }
 0x2d8   : > { %v3013_v19 = vrot.slane %v3009_v49, 4  ;;  %v3012_v9 = vrot.slane %v3007_v21, 4  ;;  %v840_v49 = vpop.f32.mrf.mxu1 }
 0x2da   : > { %v3016_v33 = vsel %vm554_vm0, %v3012_v9, %v3013_v19  ;;  %v2586_v4 = vpop.permute.xlu2 %2585 }
 0x2db   : > { %v3017_v20 = vsel %vm640_vm5, %v3007_v21, %v3016_v33  ;;  %v4171_v60 = vld [vmem:[#allocation2 + $0x50] sm:$0xf]  ;;  %v4340_v8 = vld [vmem:[#allocation2 + $0x54] sm:$0xf]  ;;  %v2592_v28 = vrot.slane %v2586_v4, 4 }
 0x2dc   : > { %3021 = vst [vmem:[#allocation2 + $0x58] sm:$0xff] %v3017_v20  ;;  %v4319_v10 = vld [vmem:[#allocation2 + $0x34] sm:$0xf0]  ;;  %v4077_v63 = vld [vmem:[#allocation2 + $0x38] sm:$0xf0] }
 0x2dd   : > { %v4076_v36 = vor.u32 %v4319_v10, %v4075_v57  ;;  %v4080_v0 = vor.u32 %v4318_v29, %v4077_v63  ;;  %v1160_v57 = vpop.f32.mrf.mxu2  ;;  %v1179_v29 = vpop.f32.mrf.mxu3 }
 0x2df   : > { %2848 = vmatpush.bf16.msrb.mxu0 %v4076_v36  ;;  %2867 = vmatpush.bf16.msrb.mxu1 %v4080_v0  ;;  %v2608_v2 = vpop.permute.xlu1 %2607  ;;  %v2606_v6 = vpop.permute.xlu0 %2605 }
 0x2e0   : > { %v2613_v3 = vrot.slane %v2608_v2, 4  ;;  %v2612_v40 = vrot.slane %v2606_v6, 4 }
 0x2e2   : > { %v2617_v5 = vsel %vm554_vm0, %v2613_v3, %v2614_v30  ;;  %v2615_v34 = vsel %vm554_vm0, %v2611_v61, %v2612_v40  ;;  %v5729_v46 = vpop.permute.xlu2 %2962  ;;  %v5749_v30 = vadd.f32 %v1160_v57, %v821_v50 }
 0x2e3   : > { %v2618_v51 = vsel %vm577_vm1, %v2608_v2, %v2617_v5  ;;  %v2616_v55 = vsel %vm577_vm1, %v5700_v42, %v2615_v34  ;;  %v4341_v47 = vld [vmem:[#allocation2 + $0x54] sm:$0xf0]  ;;  %v4173_v26 = vld [vmem:[#allocation2 + $0x58] sm:$0xf0]  ;;  %v5751_v2 = vadd.f32 %v1179_v29, %v840_v49  ;;  %v2970_v40 = vrot.slane %v5729_v46, 4  ;;  %v824_v5 = vpop.f32.mrf.mxu0  ;;  %v843_v34 = vpop.f32.mrf.mxu1 }
 0x2e4   : > { %2622 = vst [vmem:[#allocation2 + $0x28] sm:$0xff] %v2618_v51  ;;  %v4172_v13 = vor.u32 %v4341_v47, %v4171_v60  ;;  %v4176_v23 = vor.u32 %v4340_v8, %v4173_v26 }
 0x2e5   : > { %2621 = vst [vmem:[#allocation2 + $0x20] sm:$0xff] %v2616_v55  ;;  %v1163_v26 = vpop.f32.mrf.mxu2 }
 0x2e6   : > { %3185 = vmatpush.bf16.msrb.mxu2 %v4172_v13  ;;  %3204 = vmatpush.bf16.msrb.mxu3 %v4176_v23  ;;  %v1182_v13 = vpop.f32.mrf.mxu3 }
 0x2e7   : > { %v2985_v39 = vpop.permute.xlu1 %2984  ;;  %v2983_v54 = vpop.permute.xlu0 %2982 }
 0x2e8   : > { %v2991_v16 = vrot.slane %v2985_v39, 4  ;;  %v2990_v53 = vrot.slane %v2983_v54, 4 }
 0x2ea   : > { %v2994_v32 = vsel %vm554_vm0, %v2990_v53, %v2991_v16  ;;  %v2969_v21 = vpop.permute.xlu2 %2968  ;;  %v5756_v16 = vadd.f32 %v1163_v26, %v824_v5  ;;  %v5758_v53 = vadd.f32 %v1182_v13, %v843_v34  ;;  %v4331_v26 = vld [vmem:[#allocation2 + $0x4] sm:$0xf0] }
 0x2eb   : > { %v2995_v42 = vsel %vm619_vm4, %v2983_v54, %v2994_v32  ;;  %v4317_v58 = vld [vmem:[#allocation2 + $0x24] sm:$0xf0]  ;;  %v4069_v56 = vld [vmem:[#allocation2 + $0x28] sm:$0xf0]  ;;  %v2973_v4 = vrot.slane %v2969_v21, 4 }
 0x2ec   : > { %3000 = vst [vmem:[#allocation2 + $0x40] sm:$0xff] %v2995_v42  ;;  %v4067_v22 = vld [vmem:[#allocation2 + $0x20] sm:$0xf]  ;;  %v4316_v24 = vld [vmem:[#allocation2 + $0x24] sm:$0xf] }
 0x2ed   : > { %v4068_v48 = vor.u32 %v4317_v58, %v4067_v22  ;;  %v4072_v14 = vor.u32 %v4316_v24, %v4069_v56 }
 0x2ee   : > { %v1184_v18 = vpop.f32.mrf.mxu3 }
 0x2ef   : > { %2849 = vmatpush.bf16.msrb.mxu0 %v4068_v48  ;;  %2868 = vmatpush.bf16.msrb.mxu1 %v4072_v14  ;;  %v2584_v35 = vpop.permute.xlu1 %2583  ;;  %v2989_v52 = vpop.permute.xlu0 %2988  ;;  %v4056_v48 = vor.u32 %v5726_v27, %v5734_v12 }
 0x2f0   : > { %v2591_v38 = vrot.slane %v2584_v35, 4  ;;  %v2993_v62 = vrot.slane %v2989_v52, 4  ;;  %v845_v52 = vpop.f32.mrf.mxu1 }
 0x2f1   : > { %v5773_v59 = vadd.f32 %v1184_v18, %v845_v52 }
 0x2f2   : > { %v2595_v37 = vsel %vm554_vm0, %v2591_v38, %v2592_v28  ;;  %v2996_v41 = vsel %vm554_vm0, %v2992_v45, %v2993_v62  ;;  %v2947_v8 = vpop.permute.xlu2 %2946  ;;  %v4310_v38 = vld [vmem:[%s5911_s2 + $0x60] sm:$0xff]  ;;  %v1165_v62 = vpop.f32.mrf.mxu2 }
 0x2f3   : > { %v2596_v44 = vsel %vm556_vm2, %v2584_v35, %v2595_v37  ;;  %v2997_v31 = vsel %vm619_vm4, %v5713_v15, %v2996_v41  ;;  %v4163_v15 = vld [vmem:[#allocation2 + $0x40] sm:$0xf]  ;;  %v4338_v36 = vld [vmem:[#allocation2 + $0x44] sm:$0xf]  ;;  %v2952_v21 = vrot.slane %v2947_v8, 4 }
 0x2f4   : > { %2601 = vst [vmem:[#allocation2 + $0x10] sm:$0xff] %v2596_v44 }
 0x2f5   : > { %3001 = vst [vmem:[#allocation2 + $0x48] sm:$0xff] %v2997_v31 }
 0x2f7   : > { %v2590_v19 = vpop.permute.xlu1 %2589  ;;  %v2588_v9 = vpop.permute.xlu0 %2587 }
 0x2f8   : > { %v2594_v33 = vrot.slane %v2590_v19, 4  ;;  %v2593_v20 = vrot.slane %v2588_v9, 4 }
 0x2fa   : > { %v2597_v10 = vsel %vm554_vm0, %v2593_v20, %v2594_v33  ;;  %v2925_v41 = vpop.permute.xlu2 %2924 }
 0x2fb   : > { %v2598_v63 = vsel %vm556_vm2, %v2588_v9, %v2597_v10  ;;  %v4059_v54 = vld [vmem:[#allocation2 + $0x10] sm:$0xf]  ;;  %v4314_v56 = vld [vmem:[#allocation2 + $0x14] sm:$0xf]  ;;  %v2931_v19 = vrot.slane %v2925_v41, 4 }
 0x2fc   : > { %2602 = vst [vmem:[#allocation2 + $0x18] sm:$0xff] %v2598_v63  ;;  %v4339_v0 = vld [vmem:[#allocation2 + $0x44] sm:$0xf0]  ;;  %v4165_v61 = vld [vmem:[#allocation2 + $0x48] sm:$0xf0] }
 0x2fd   : > { %v4164_v6 = vor.u32 %v4339_v0, %v4163_v15  ;;  %v4168_v3 = vor.u32 %v4338_v36, %v4165_v61 }
 0x2ff   : > { %3186 = vmatpush.bf16.msrb.mxu2 %v4164_v6  ;;  %3205 = vmatpush.bf16.msrb.mxu3 %v4168_v3  ;;  %v2967_v60 = vpop.permute.xlu1 %2966  ;;  %v2965_v51 = vpop.permute.xlu0 %2964  ;;  %v4311_v3 = vld [vmem:[%s5911_s2 + $0x68] sm:$0xff] }
 0x300   : > { %v2972_v55 = vrot.slane %v2967_v60, 4  ;;  %v2971_v47 = vrot.slane %v2965_v51, 4 }
 0x302   : > { %v2976_v23 = vsel %vm554_vm0, %v2972_v55, %v2973_v4  ;;  %v2974_v39 = vsel %vm554_vm0, %v2970_v40, %v2971_v47 }
 0x303   : > { %v2977_v32 = vsel %vm598_vm3, %v2967_v60, %v2976_v23  ;;  %v2975_v42 = vsel %vm598_vm3, %v5729_v46, %v2974_v39  ;;  %v4315_v58 = vld [vmem:[#allocation2 + $0x14] sm:$0xf0]  ;;  %v4061_v22 = vld [vmem:[#allocation2 + $0x18] sm:$0xf0]  ;;  %v826_v46 = vpop.f32.mrf.mxu0  ;;  %v4330_v23 = vld [vmem:[#allocation2 + $0x4] sm:$0xf] }
 0x304   : > { %2981 = vst [vmem:[#allocation2 + $0x38] sm:$0xff] %v2977_v32  ;;  %v4060_v24 = vor.u32 %v4315_v58, %v4059_v54  ;;  %v4064_v1 = vor.u32 %v4314_v56, %v4061_v22  ;;  %v5771_v7 = vadd.f32 %v1165_v62, %v826_v46  ;;  %v4133_v39 = vld [vmem:[#allocation2 + $0x8] sm:$0xf0]  ;;  %v1855_v46 = vpop.f32.mrf.mxu3 }
 0x305   : > { %2980 = vst [vmem:[#allocation2 + $0x30] sm:$0xff] %v2975_v42 }
 0x306   : > { %2850 = vmatpush.bf16.msrb.mxu0 %v4060_v24  ;;  %2869 = vmatpush.bf16.msrb.mxu1 %v4064_v1  ;;  %v4136_v24 = vor.u32 %v4330_v23, %v4133_v39  ;;  %v4328_v1 = vld [vmem:[%s5911_s2 + $0x70] sm:$0xff] }
 0x307   : > { %v2945_v14 = vpop.permute.xlu1 %2944  ;;  %v2943_v45 = vpop.permute.xlu0 %2942 }
 0x308   : > { %v2951_v28 = vrot.slane %v2945_v14, 4  ;;  %v2950_v35 = vrot.slane %v2943_v45, 4  ;;  %v1516_v14 = vpop.f32.mrf.mxu1 }
 0x30a   : > { %v2954_v43 = vsel %vm554_vm0, %v2950_v35, %v2951_v28  ;;  %2851 = vmatpush.bf16.msrb.mxu0 %v4052_v25  ;;  %2870 = vmatpush.bf16.msrb.mxu1 %v4056_v48  ;;  %v4329_v25 = vld [vmem:[%s5911_s2 + $0x78] sm:$0xff]  ;;  %v1836_v35 = vpop.f32.mrf.mxu2 }
 0x30b   : > { %v2955_v27 = vsel %vm577_vm1, %v2943_v45, %v2954_v43  ;;  %v4337_v12 = vld [vmem:[#allocation2 + $0x34] sm:$0xf0]  ;;  %v4157_v37 = vld [vmem:[#allocation2 + $0x38] sm:$0xf0]  ;;  %v1497_v48 = vpop.f32.mrf.mxu0 }
 0x30c   : > { %2960 = vst [vmem:[#allocation2 + $0x20] sm:$0xff] %v2955_v27  ;;  %v4155_v44 = vld [vmem:[#allocation2 + $0x30] sm:$0xf]  ;;  %v4336_v31 = vld [vmem:[#allocation2 + $0x34] sm:$0xf]  ;;  %v1857_v18 = vpop.f32.mrf.mxu3 }
 0x30d   : > { %2852 = vmatmul.bf16.vlgmr.msrb.gmra.mxu0 %v4310_v38  ;;  %2871 = vmatmul.bf16.vlgmr.msrb.gmra.mxu1 %v4310_v38  ;;  %v4156_v50 = vor.u32 %v4337_v12, %v4155_v44  ;;  %v4160_v49 = vor.u32 %v4336_v31, %v4157_v37 }
 0x30f   : > { %3187 = vmatpush.bf16.msrb.mxu2 %v4156_v50  ;;  %3206 = vmatpush.bf16.msrb.mxu3 %v4160_v49  ;;  %v2923_v9 = vpop.permute.xlu1 %2922  ;;  %v2949_v33 = vpop.permute.xlu0 %2948 }
 0x310   : > { %v2930_v20 = vrot.slane %v2923_v9, 4  ;;  %v2953_v57 = vrot.slane %v2949_v33, 4  ;;  %v1518_v28 = vpop.f32.mrf.mxu1 }
 0x312   : > { %v2934_v29 = vsel %vm554_vm0, %v2930_v20, %v2931_v19  ;;  %v2956_v10 = vsel %vm554_vm0, %v2952_v21, %v2953_v57  ;;  %v1838_v62 = vpop.f32.mrf.mxu2 }
 0x313   : > { %v2935_v63 = vsel %vm556_vm2, %v2923_v9, %v2934_v29  ;;  %v2957_v15 = vsel %vm577_vm1, %v2947_v8, %v2956_v10  ;;  %v4147_v5 = vld [vmem:[#allocation2 + $0x20] sm:$0xf]  ;;  %v4334_v34 = vld [vmem:[#allocation2 + $0x24] sm:$0xf]  ;;  %v1499_v45 = vpop.f32.mrf.mxu0 }
 0x314   : > { %2940 = vst [vmem:[#allocation2 + $0x10] sm:$0xff] %v2935_v63  ;;  %v4131_v8 = vld [vmem:[#allocation2] sm:$0xf]  ;;  %v1860_v37 = vpop.f32.mrf.mxu3 }
 0x315   : > { %2961 = vst [vmem:[#allocation2 + $0x28] sm:$0xff] %v2957_v15  ;;  %v4132_v22 = vor.u32 %v4331_v26, %v4131_v8 }
 0x317   : > { %v2929_v36 = vpop.permute.xlu1 %2928  ;;  %v2927_v0 = vpop.permute.xlu0 %2926 }
 0x318   : > { %v2933_v61 = vrot.slane %v2929_v36, 4  ;;  %v2932_v6 = vrot.slane %v2927_v0, 4  ;;  %v1521_v38 = vpop.f32.mrf.mxu1 }
 0x31a   : > { %v2936_v40 = vsel %vm554_vm0, %v2932_v6, %v2933_v61  ;;  %v1841_v12 = vpop.f32.mrf.mxu2  ;;  %v1527_v61 = vadd.f32 %v1516_v14, %v5745_v11  ;;  %v3253_v11 = vld [vmem:[%s500_s9] sm:$0x3]  ;;  %s5923_s9 = sld [smem:[#allocation9_spill]] (%p4668_p10) }
 0x31b   : > { %v2937_v4 = vsel %vm556_vm2, %v2927_v0, %v2936_v40  ;;  %v4139_v13 = vld [vmem:[#allocation2 + $0x10] sm:$0xf]  ;;  %v4332_v32 = vld [vmem:[#allocation2 + $0x14] sm:$0xf]  ;;  %v1502_v52 = vpop.f32.mrf.mxu0  ;;  %v1526_v0 = vadd.f32 %v1497_v48, %v5743_v17 }
 0x31c   : > { %2941 = vst [vmem:[#allocation2 + $0x18] sm:$0xff] %v2937_v4  ;;  %v4335_v60 = vld [vmem:[#allocation2 + $0x24] sm:$0xf0]  ;;  %v4149_v51 = vld [vmem:[#allocation2 + $0x28] sm:$0xf0]  ;;  %v5797_v50 = vpop.f32.mrf.mxu3 }
 0x31d   : > { %2857 = vmatmul.bf16.gmra.mxu0 %v4311_v3  ;;  %2876 = vmatmul.bf16.gmra.mxu1 %v4311_v3  ;;  %v4148_v55 = vor.u32 %v4335_v60, %v4147_v5  ;;  %v4152_v47 = vor.u32 %v4334_v34, %v4149_v51  ;;  %v1865_v6 = vadd.f32 %v1836_v35, %v1526_v0 }
 0x31e   : > { %v1866_v3 = vadd.f32 %v1855_v46, %v1527_v61  ;;  %v1528_v5 = vadd.f32 %v1499_v45, %v5749_v30  ;;  %v1529_v51 = vadd.f32 %v1518_v28, %v5751_v2  ;;  %v5829_v2 = vperm.slane %v3253_v11, 1 }
 0x31f   : > { %3188 = vmatpush.bf16.msrb.mxu2 %v4148_v55  ;;  %3207 = vmatpush.bf16.msrb.mxu3 %v4152_v47 }
 0x320   : > { %v5793_v27 = vpop.f32.mrf.mxu1  ;;  %v1867_v17 = vadd.f32 %v1838_v62, %v1528_v5  ;;  %v1868_v8 = vadd.f32 %v1857_v18, %v1529_v51  ;;  %s3329_s10 = scalar_lea.vmem (%p4668_p10), %s5923_s9, %s4195_s8 }
 0x322   : > { %v5795_v31 = vpop.f32.mrf.mxu2 }
 0x323   : > { %v4333_v54 = vld [vmem:[#allocation2 + $0x14] sm:$0xf0]  ;;  %v4141_v42 = vld [vmem:[#allocation2 + $0x18] sm:$0xf0]  ;;  %v5791_v43 = vpop.f32.mrf.mxu0 }
 0x324   : > { %v4140_v58 = vor.u32 %v4333_v54, %v4139_v13  ;;  %v4144_v56 = vor.u32 %v4332_v32, %v4141_v42  ;;  %v5825_v32 = vperm.slane %v3253_v11, 0  ;;  %v1530_v42 = vadd.f32 %v1502_v52, %v5756_v16 }
 0x326   : > { %3189 = vmatpush.bf16.msrb.mxu2 %v4140_v58  ;;  %3208 = vmatpush.bf16.msrb.mxu3 %v4144_v56  ;;  %v1531_v58 = vadd.f32 %v1521_v38, %v5758_v53  ;;  %v1869_v35 = vadd.f32 %v1841_v12, %v1530_v42  ;;  %v1533_v12 = vadd.f32 %v5793_v27, %v5773_v59 }
 0x328   : > { %v2194_v44 = vpop.f32.mrf.mxu1  ;;  %v1870_v46 = vadd.f32 %v1860_v37, %v1531_v58 }
 0x329   : > { %v2205_v47 = vadd.f32 %v2194_v44, %v1866_v3 }
 0x32a   : > { %3190 = vmatpush.bf16.msrb.mxu2 %v4132_v22  ;;  %3209 = vmatpush.bf16.msrb.mxu3 %v4136_v24  ;;  %v2514_v19 = vpop.f32.mrf.mxu2  ;;  %v2533_v9 = vpop.f32.mrf.mxu3 }
 0x32b   : > { %v2175_v41 = vpop.f32.mrf.mxu0  ;;  %v2544_v13 = vadd.f32 %v2533_v9, %v2205_v47 }
 0x32c   : > { %v2204_v55 = vadd.f32 %v2175_v41, %v1865_v6 }
 0x32d   : > { %3191 = vmatmul.bf16.vlgmr.msrb.gmra.mxu2 %v4328_v1  ;;  %3210 = vmatmul.bf16.vlgmr.msrb.gmra.mxu3 %v4328_v1 }
 0x32e   : > { %v2543_v26 = vadd.f32 %v2514_v19, %v2204_v55 }
 0x330   : > { %v2196_v21 = vpop.f32.mrf.mxu1 }
 0x331   : > { %v2207_v1 = vadd.f32 %v2196_v21, %v1868_v8 }
 0x332   : > { %v2516_v57 = vpop.f32.mrf.mxu2  ;;  %v2535_v29 = vpop.f32.mrf.mxu3 }
 0x333   : > { %v2177_v49 = vpop.f32.mrf.mxu0  ;;  %v2546_v18 = vadd.f32 %v2535_v29, %v2207_v1 }
 0x334   : > { %v2206_v56 = vadd.f32 %v2177_v49, %v1867_v17  ;;  %v1532_v49 = vadd.f32 %v5791_v43, %v5771_v7  ;;  %v1872_v43 = vadd.f32 %v5797_v50, %v1533_v12 }
 0x336   : > { %v2545_v62 = vadd.f32 %v2516_v57, %v2206_v56  ;;  %v1871_v7 = vadd.f32 %v5795_v31, %v1532_v49 }
 0x338   : > { %v5799_v20 = vpop.f32.mrf.mxu1 }
 0x339   : > { %v2209_v9 = vadd.f32 %v5799_v20, %v1870_v46 }
 0x33a   : > { %v5805_v15 = vpop.f32.mrf.mxu2  ;;  %v5807_v36 = vpop.f32.mrf.mxu3 }
 0x33b   : > { %v2180_v33 = vpop.f32.mrf.mxu0  ;;  %v2548_v27 = vadd.f32 %v5807_v36, %v2209_v9 }
 0x33c   : > { %v2208_v37 = vadd.f32 %v2180_v33, %v1869_v35 }
 0x33d   : > { %3196 = vmatmul.bf16.gmra.mxu2 %v4329_v25  ;;  %3215 = vmatmul.bf16.gmra.mxu3 %v4329_v25 }
 0x33e   : > { %v2547_v59 = vadd.f32 %v5805_v15, %v2208_v37 }
 0x340   : > { %v5803_v63 = vpop.f32.mrf.mxu1 }
 0x341   : > { %v2211_v31 = vadd.f32 %v5803_v63, %v1872_v43 }
 0x342   : > { %v5817_v34 = vpop.f32.mrf.mxu2  ;;  %v5819_v60 = vpop.f32.mrf.mxu3 }
 0x343   : > { %v5801_v10 = vpop.f32.mrf.mxu0 }
 0x344   : > { %v2210_v47 = vadd.f32 %v5801_v10, %v1871_v7 }
 0x38a   : > { %v2853_v40 = vpop.f32.mrf.mxu0  ;;  %v2872_v4 = vpop.f32.mrf.mxu1 }
 0x38b   : > { %v2882_v23 = vadd.f32 %v2853_v40, %v2543_v26  ;;  %v2883_v30 = vadd.f32 %v2872_v4, %v2544_v13  ;;  %v2549_v13 = vadd.f32 %v5817_v34, %v2210_v47 }
 0x392   : > { %v2855_v39 = vpop.f32.mrf.mxu0  ;;  %v2874_v54 = vpop.f32.mrf.mxu1 }
 0x393   : > { %v2884_v52 = vadd.f32 %v2855_v39, %v2545_v62  ;;  %v2885_v38 = vadd.f32 %v2874_v54, %v2546_v18  ;;  %v2550_v39 = vadd.f32 %v5819_v60, %v2211_v31 }
 0x39a   : > { %v2858_v0 = vpop.f32.mrf.mxu0  ;;  %v2877_v61 = vpop.f32.mrf.mxu1 }
 0x39b   : > { %v2886_v5 = vadd.f32 %v2858_v0, %v2547_v59  ;;  %v2887_v51 = vadd.f32 %v2877_v61, %v2548_v27 }
 0x3b0   : > { %v3192_v22 = vpop.f32.mrf.mxu2  ;;  %v3211_v24 = vpop.f32.mrf.mxu3 }
 0x3b1   : > { %v3221_v25 = vadd.f32 %v3192_v22, %v2882_v23  ;;  %v3222_v48 = vadd.f32 %v3211_v24, %v2883_v30  ;;  %v2860_v23 = vpop.f32.mrf.mxu0  ;;  %v2879_v30 = vpop.f32.mrf.mxu1 }
 0x3b2   : > { %v2888_v58 = vadd.f32 %v2860_v23, %v2549_v13  ;;  %v2889_v63 = vadd.f32 %v2879_v30, %v2550_v39 }
 0x3b3   : > { %v3259_v14 = vmul.f32 %v5825_v32, %v3221_v25  ;;  %v3245_v45 = vpack.c.bf16 %v3222_v48, %v3221_v25  ;;  %v3260_v28 = vmul.f32 %v5829_v2, %v3222_v48 }
 0x3b5   : > { %v3279_v41 = vmul.f32 %v3259_v14, %v3221_v25  ;;  %3249 = vst [vmem:[%s5835_s20] sm:$0xff] %v3245_v45  ;;  %v3280_v16 = vmul.f32 %v3260_v28, %v3222_v48  ;;  %v3267_v53 = vadd.f32 %v3260_v28, %v3259_v14 }
 0x3b7   : > { %3268 = vadd.xlane.f32.xlu2 %v3267_v53  ;;  %v3287_v44 = vadd.f32 %v3280_v16, %v3279_v41 }
 0x3b8   : > { %v3194_v21 = vpop.f32.mrf.mxu2  ;;  %v3213_v19 = vpop.f32.mrf.mxu3 }
 0x3b9   : > { %v3223_v57 = vadd.f32 %v3194_v21, %v2884_v52  ;;  %v3224_v29 = vadd.f32 %v3213_v19, %v2885_v38 }
 0x3bb   : > { %v3261_v6 = vmul.f32 %v5825_v32, %v3223_v57  ;;  %v3246_v3 = vpack.c.bf16 %v3224_v29, %v3223_v57  ;;  %v3262_v40 = vmul.f32 %v5829_v2, %v3224_v29 }
 0x3bc   : > { %v3364_v12 = vld [vmem:[%s5835_s20] sm:$0xff] (%p4668_p10) }
 0x3bd   : > { %v3281_v33 = vmul.f32 %v3261_v6, %v3223_v57  ;;  %3250 = vst [vmem:[%s5835_s20 + $0x8] sm:$0xff] %v3246_v3  ;;  %v3282_v20 = vmul.f32 %v3262_v40, %v3224_v29  ;;  %v3270_v4 = vadd.f32 %v3262_v40, %v3261_v6 }
 0x3be   : > { %3365 = vst [vmem:[%s3329_s10] sm:$0xff] (%p4668_p10), %v3364_v12 }
 0x3bf   : > { %3271 = vadd.xlane.f32.xlu0 %v3270_v4  ;;  %v3290_v55 = vadd.f32 %v3282_v20, %v3281_v33 }
 0x3c0   : > { %v3197_v17 = vpop.f32.mrf.mxu2  ;;  %v3216_v11 = vpop.f32.mrf.mxu3 }
 0x3c1   : > { %v3225_v50 = vadd.f32 %v3197_v17, %v2886_v5  ;;  %v3226_v8 = vadd.f32 %v3216_v11, %v2887_v51 }
 0x3c3   : > { %v3263_v15 = vmul.f32 %v5825_v32, %v3225_v50  ;;  %v3247_v36 = vpack.c.bf16 %v3226_v8, %v3225_v50  ;;  %v3264_v26 = vmul.f32 %v5829_v2, %v3226_v8 }
 0x3c4   : > { %v3366_v37 = vld [vmem:[%s5835_s20 + $0x8] sm:$0xff] (%p4668_p10) }
 0x3c5   : > { %v3283_v54 = vmul.f32 %v3263_v15, %v3225_v50  ;;  %3251 = vst [vmem:[%s5835_s20 + $0x10] sm:$0xff] %v3247_v36  ;;  %v3284_v10 = vmul.f32 %v3264_v26, %v3226_v8  ;;  %v3273_v42 = vadd.f32 %v3264_v26, %v3263_v15 }
 0x3c6   : > { %3367 = vst [vmem:[%s3329_s10 + $0x18] sm:$0xff] (%p4668_p10), %v3366_v37 }
 0x3c7   : > { %3291 = vadd.xlane.f32.xlu0 %v3290_v55  ;;  %3274 = vadd.xlane.f32.xlu1 %v3273_v42  ;;  %v3293_v56 = vadd.f32 %v3284_v10, %v3283_v54 }
 0x3c8   : > { %v3199_v22 = vpop.f32.mrf.mxu2  ;;  %v3218_v24 = vpop.f32.mrf.mxu3 }
 0x3c9   : > { %v3227_v1 = vadd.f32 %v3199_v22, %v2888_v58  ;;  %v3228_v34 = vadd.f32 %v3218_v24, %v2889_v63 }
 0x3cb   : > { %v3265_v60 = vmul.f32 %v5825_v32, %v3227_v1  ;;  %v3248_v25 = vpack.c.bf16 %v3228_v34, %v3227_v1  ;;  %v3266_v48 = vmul.f32 %v5829_v2, %v3228_v34 }
 0x3cc   : > { %v3368_v21 = vld [vmem:[%s5835_s20 + $0x10] sm:$0xff] (%p4668_p10) }
 0x3cd   : > { %v3285_v14 = vmul.f32 %v3265_v60, %v3227_v1  ;;  %3252 = vst [vmem:[%s5835_s20 + $0x18] sm:$0xff] %v3248_v25  ;;  %v3286_v45 = vmul.f32 %v3266_v48, %v3228_v34  ;;  %v3276_v28 = vadd.f32 %v3266_v48, %v3265_v60 }
 0x3ce   : > { %3369 = vst [vmem:[%s3329_s10 + $0x30] sm:$0xff] (%p4668_p10), %v3368_v21 }
 0x3cf   : > { %3294 = vadd.xlane.f32.xlu1 %v3293_v56  ;;  %3277 = vadd.xlane.f32.xlu2 %v3276_v28  ;;  %v3296_v35 = vadd.f32 %v3286_v45, %v3285_v14 }
 0x3d4   : > { %v3370_v19 = vld [vmem:[%s5835_s20 + $0x18] sm:$0xff] (%p4668_p10) }
 0x3d5   : > { %3371 = vst [vmem:[%s3329_s10 + $0x48] sm:$0xff] (%p4668_p10), %v3370_v19 }
 0x3d7   : > { %3288 = vadd.xlane.f32.xlu2 %v3287_v44 }
 0x3df   : > { %3297 = vadd.xlane.f32.xlu2 %v3296_v35 }
 0x42a   : > { %v3269_v32 = vpop.xlane.xlu2 %3268 }
 0x432   : > { %v3272_v46 = vpop.xlane.xlu0 %3271 }
 0x43a   : > { %v3292_v2 = vpop.xlane.xlu0 %3291  ;;  %v3275_v62 = vpop.xlane.xlu1 %3274 }
 0x43b   : > { %v3301_v18 = vsel %vm3299_vm8, %v3272_v46, %v3292_v2 }
 0x43c   : > { %3306 = vst.msk [vmem:[%s511_s12 + $0x8] sm:$0xff] %vm3304_vm9, %v3301_v18 }
 0x442   : > { %v3295_v41 = vpop.xlane.xlu1 %3294  ;;  %v3278_v16 = vpop.xlane.xlu2 %3277 }
 0x443   : > { %v3302_v53 = vsel %vm3299_vm8, %v3275_v62, %v3295_v41 }
 0x444   : > { %3307 = vst.msk [vmem:[%s511_s12 + $0x10] sm:$0xff] %vm3304_vm9, %v3302_v53 }
 0x44a   : > { %v3289_v52 = vpop.xlane.xlu2 %3288 }
 0x44b   : > { %v3300_v38 = vsel %vm3299_vm8, %v3269_v32, %v3289_v52 }
 0x44c   : > { %3305 = vst.msk [vmem:[%s511_s12] sm:$0xff] %vm3304_vm9, %v3300_v38 }
 0x450   : > { %3324 = sbr.rel (!%p4668_p10) target bundleno = 1109 (0x455), region = 119 }
 0x452   : > { %v3298_v44 = vpop.xlane.xlu2 %3297 }
 0x453   : > { %v3303_v49 = vsel %vm3299_vm8, %v3278_v16, %v3298_v44 }
 0x454   : > { %3308 = vst.msk [vmem:[%s511_s12 + $0x18] sm:$0xff] %vm3304_vm9, %v3303_v49 }
 0x455 PF: > { %s16_s26 = sadd.s32 1, %s4536_s26   ;;  %s5924_s22 = sld [smem:[#allocation7_spill]] }
 0x456   : > { %p13_p4 = scmp.ge.s32.totalorder %s16_s26, 8   ;;  %s5925_s29 = sld [smem:[#allocation8_spill]] }
 0x457   : > { %s5926_s18 = smov %s4508_s19  ;;  %s5927_s19 = smov %s4657_s24 }
 0x458   : > { %s5928_s20 = smov %s4516_s21  ;;  %s5929_s21 = smov %s4654_s17 }
 0x459   : > { %s5930_s23 = smov %s4532_s25  ;;  %s5931_s24 = smov %s5934_s28 }
 0x45a   :  { %15 = sbr.rel (!%p13_p4) target bundleno = 7 (0x7), region = 232 }
 0x45c   : > { %s5932_s25 = smov %s5925_s29 }

</bundles_post_ra>
